<compile_context>
chip_gen: v6e
topology: v6e:2x2x1
jax: 0.10.0
libtpu: 0.0.40
codegen_flags: <defaults>
</compile_context>

<pallas_src>
import functools
import math

import jax
import jax.numpy as jnp
import numpy as np
from jax.experimental import pallas as pl
from jax.experimental.pallas import tpu as pltpu


class settings:
    feature_map_num = 8
    res_block_num = 2
    connection_style = "dense_connection"
    use_se = False            # SE == NoSEBlock == identity


LEAKY_SLOPE = 0.2


def _dilations(num):
    return sorted({1} | {2 ** i for i in range(num)})


# ---------------------------------------------------------------------------
# Fused whole-forward kernel.  One grid step = one image (or all images, when
# the batch has been folded into the lane axis on single-TensorCore chips).
# Activation layout everywhere is channels-first, lane-dense: (C, L), with
# L = H*W (or N*H*W when folded) on the 128-wide lane axis.
# ---------------------------------------------------------------------------
def _rescan_kernel(x_ref, w3_ref, w1_ref, b_ref, mask_ref,
                   o_diff, o_p1, o_p3, o_p5, o_pool,
                   patch_ref, *, C, W, L, num):
    n3 = 3 * num + 3          # extract, num*(p1,p3,p5), exit3x3, pool-const
    dils = _dilations(num)

    def leaky(v):
        return jnp.where(v >= 0, v, LEAKY_SLOPE * v)

    def fill_patch(xv, d):
        """im2col of a zero-padded SAME 3x3 conv at dilation d -> scratch (9C, L)."""
        base = dils.index(d) * 9
        for t in range(9):
            kh, kw = divmod(t, 3)
            s = ((kh - 1) * W + (kw - 1)) * d          # out[:, i] = x[:, i + s]
            if s == 0:                                 # centre tap: no roll, no mask
                v = xv
            else:
                v = pltpu.roll(xv, (-s) % L, axis=1) * mask_ref[base + t]
            patch_ref[t * C:(t + 1) * C, :] = v

    def fill_rows(vals):
        """Stack (C, L) activations into scratch rows (input of a 1x1 conv)."""
        for j, v in enumerate(vals):
            patch_ref[j * C:(j + 1) * C, :] = v

    def dot_rows(w, krows, bias_idx, act):
        y = jnp.dot(w, patch_ref[0:krows, :], preferred_element_type=jnp.float32)
        y = y + b_ref[bias_idx]
        return leaky(y) if act else y

    def conv3(l, act=True):
        return dot_rows(w3_ref[l], 9 * C, l, act)

    def conv1(l, cin, act):
        return dot_rows(w1_ref[l][:, :cin], cin, n3 + l, act)

    exit3_idx = 3 * num + 1
    pool_w_idx = 3 * num + 2

    x = x_ref[0].astype(jnp.float32)                   # (C, L); channels >= 3 are zero

    # extract: conv3x3 + LeakyReLU(0.2) + SE (identity since use_se=False)
    fill_patch(x, 1)
    cur = conv3(0)

    # My_blocks, dense_connection
    outs = [cur]
    for i in range(num):
        d = 2 ** i
        # TODO(synk): My_unit is not defined in the provided source; this is a
        # synthetic multi-path dilated unit (3 chained dilated 3x3 convs, a 3x3
        # same avg-pool, 1x1 fuse + residual) with the same interface.
        fill_patch(cur, d)
        p1 = conv3(1 + 3 * i)
        if d == 1:                                     # pool reuses the d=1 patch of cur
            pool = conv3(pool_w_idx, act=False)
        fill_patch(p1, d)
        p3 = conv3(2 + 3 * i)
        fill_patch(p3, d)
        p5 = conv3(3 + 3 * i)
        if d != 1:
            fill_patch(cur, 1)
            pool = conv3(pool_w_idx, act=False)        # AvgPool2d(3,1,1), /9 incl. pad
        if i == 0:
            dt = o_p1.dtype
            o_p1[0] = p1.astype(dt)
            o_p3[0] = p3.astype(dt)
            o_p5[0] = p5.astype(dt)
            o_pool[0] = pool.astype(dt)
        fill_rows([p1, p3, p5, pool])
        cur = conv1(2 * i, 4 * C, act=True) + cur      # 1x1 fuse + residual
        outs.append(cur)
        fill_rows(outs[:i + 2])                        # cat_dense[i+1] over all prior outs
        cur = conv1(2 * i + 1, (i + 2) * C, act=False)

    # exit: conv3x3 + LeakyReLU + SE(identity) + conv1x1(C->3), fused with x - out
    fill_patch(cur, 1)
    e = conv3(exit3_idx)
    fill_rows([e])
    final = conv1(2 * num, C, act=False)               # rows >= 3 are exactly zero
    o_diff[0] = (x - final).astype(o_diff.dtype)


# ---------------------------------------------------------------------------
# Precomputed zero-padding masks for the roll-based im2col.
# ---------------------------------------------------------------------------
def _build_masks(H, W, L, dils):
    """{0,1} f32 masks, shape (len(dils)*9, C, L); row block di*9+t is tap t of
    dilation dils[di]; entry is 1 iff the tap is in-bounds for the pixel's own
    image (pixels are laid out image-major along lanes, pixel = idx % (H*W))."""
    C = settings.feature_map_num
    HW = H * W
    p = np.arange(L) % HW
    hh, ww = p // W, p % W
    m = np.zeros((len(dils) * 9, C, L), np.float32)
    for di, d in enumerate(dils):
        for t in range(9):
            kh, kw = divmod(t, 3)
            dh, dw = (kh - 1) * d, (kw - 1) * d
            valid = ((hh + dh >= 0) & (hh + dh < H)
                     & (ww + dw >= 0) & (ww + dw < W))
            m[di * 9 + t] = valid.astype(np.float32)[None, :]
    return jnp.asarray(m)


# ---------------------------------------------------------------------------
# Parameter init: packed into 3 stacked arrays (per the performance review).
#   w3 : (3*num+3, C, 9*C)   all 3x3 weights (+ constant avg-pool weight last)
#   w1 : (2*num+1, C, maxCin) all 1x1 weights, zero-padded on Cin (and Cout for
#        the exit 1x1, 3 -> C, which keeps diff rows >= 3 exactly zero)
#   b  : (n3 + n1, C, 1)      all biases, 3x3 layers first.
# 3x3 weight column index = tap*C + cin, matching the kernel's im2col rows.
# ---------------------------------------------------------------------------
def init_rescan_params(key):
    C = settings.feature_map_num
    num = settings.res_block_num
    max_cin = C * max(4, num + 1)
    keys = iter(jax.random.split(key, 5 * num + 3))

    def conv3x3(k, cin):
        kw_, kb_ = jax.random.split(k)
        bound = 1.0 / math.sqrt(9 * cin)
        w = jax.random.uniform(kw_, (C, 9, cin), jnp.float32, -bound, bound)
        if cin < C:
            w = jnp.pad(w, ((0, 0), (0, 0), (0, C - cin)))
        b = jax.random.uniform(kb_, (C, 1), jnp.float32, -bound, bound)
        return w.reshape(C, 9 * C), b

    def conv1x1(k, cin, cout):
        kw_, kb_ = jax.random.split(k)
        bound = 1.0 / math.sqrt(cin)
        w = jax.random.uniform(kw_, (cout, cin), jnp.float32, -bound, bound)
        b = jax.random.uniform(kb_, (cout, 1), jnp.float32, -bound, bound)
        if cout < C:
            w = jnp.pad(w, ((0, C - cout), (0, 0)))
            b = jnp.pad(b, ((0, C - cout), (0, 0)))
        if cin < max_cin:
            w = jnp.pad(w, ((0, 0), (0, max_cin - cin)))
        return w, b

    w3, b3, w1, b1 = [], [], [], []

    w, b = conv3x3(next(keys), 3); w3.append(w); b3.append(b)          # extract 3->C
    for _ in range(num):
        for _ in range(3):                                             # path1/3/5 convs
            w, b = conv3x3(next(keys), C); w3.append(w); b3.append(b)
    w, b = conv3x3(next(keys), C); w3.append(w); b3.append(b)          # exit conv3x3
    # AvgPool2d(3, stride=1, pad=1, count_include_pad=True) as a constant conv.
    w3.append(jnp.tile(jnp.eye(C, dtype=jnp.float32), (1, 9)) / 9.0)
    b3.append(jnp.zeros((C, 1), jnp.float32))

    for i in range(num):
        w, b = conv1x1(next(keys), 4 * C, C); w1.append(w); b1.append(b)        # unit 1x1 fuse
        w, b = conv1x1(next(keys), (i + 2) * C, C); w1.append(w); b1.append(b)  # cat_dense[i+1]
    # TODO(synk): cat_dense[0] exists in the PyTorch module but is never used in
    # forward(); its parameters are intentionally omitted.
    w, b = conv1x1(next(keys), C, 3); w1.append(w); b1.append(b)       # exit 1x1 (C->3)

    assert len(w3) == 3 * num + 3 and len(w1) == 2 * num + 1
    return {"w3": jnp.stack(w3), "w1": jnp.stack(w1), "b": jnp.stack(b3 + b1)}


# ---------------------------------------------------------------------------
# Forward wrapper (NCHW in / NCHW out).
# ---------------------------------------------------------------------------
def _single_tensorcore_chip():
    """v5e/v6e have a single TensorCore -> fold the batch into lanes; multi-TC
    chips (v7x, v4/v5p megacore) keep the batch grid so "parallel" can shard it."""
    try:
        kind = jax.devices()[0].device_kind.lower()
    except Exception:
        return False
    return ("lite" in kind) or ("v5e" in kind) or ("v6e" in kind)


@functools.partial(jax.jit, static_argnames=("fold",))
def _rescan_forward_impl(params, x_nchw, fold):
    N, Cin, H, W = x_nchw.shape
    C = settings.feature_map_num
    num = settings.res_block_num
    HW = H * W
    assert Cin <= C

    x = x_nchw.reshape(N, Cin, HW).astype(jnp.float32)
    if Cin < C:
        x = jnp.pad(x, ((0, 0), (0, C - Cin), (0, 0)))   # zero-pad channels to C

    fold = bool(fold) and N > 1
    if fold:
        # Images laid side by side along the lane axis: (1, C, N*HW), grid=(1,)
        x_in = jnp.transpose(x, (1, 0, 2)).reshape(1, C, N * HW)
        G, L = 1, N * HW
    else:
        x_in, G, L = x, N, HW

    dils = _dilations(num)
    # roll+mask im2col stays within one image as long as no tap shift wraps it
    assert max(dils) * (W + 1) < HW, "tap shift would wrap around an image"
    masks = _build_masks(H, W, L, dils)

    w3, w1, b = params["w3"], params["w1"], params["b"]
    kern = functools.partial(_rescan_kernel, C=C, W=W, L=L, num=num)

    def full_spec(a):
        return pl.BlockSpec(a.shape, lambda n, nd=a.ndim: (0,) * nd)

    img_spec = pl.BlockSpec((1, C, L), lambda n: (n, 0, 0))
    img_out = jax.ShapeDtypeStruct((G, C, L), jnp.float32)

    # TODO(synk): add a row-band spatial-tiling path (halo = d*W) once C*H*W no
    # longer fits comfortably in VMEM (hits ~2x sooner on v7x's 64 MiB).
    diff, p1, p3, p5, pool = pl.pallas_call(
        kern,
        out_shape=(img_out,) * 5,
        grid_spec=pltpu.PrefetchScalarGridSpec(
            num_scalar_prefetch=0,
            grid=(G,),
            in_specs=[img_spec, full_spec(w3), full_spec(w1),
                      full_spec(b), full_spec(masks)],
            out_specs=(img_spec,) * 5,
            scratch_shapes=[pltpu.VMEM((9 * C, L), jnp.float32)],
        ),
        compiler_params=pltpu.CompilerParams(
            # TODO(synk): on v7x, verify in xprof that the 2 grid steps land on
            # the 2 TensorCores; force CORE_PARALLEL / pl.core_map if they don't.
            dimension_semantics=("parallel",),
        ),
    )(x_in, w3, w1, b, masks)

    def unfold(t, ch):
        if fold:
            t = t.reshape(C, N, HW).transpose(1, 0, 2)
        return t[:, :ch, :].reshape(N, ch, H, W).astype(x_nchw.dtype)

    return ([unfold(diff, Cin)], unfold(p1, C), unfold(p3, C),
            unfold(p5, C), unfold(pool, C))


def rescan_forward(params, x_nchw):
    return _rescan_forward_impl(params, x_nchw, fold=_single_tensorcore_chip())


# ---------------------------------------------------------------------------
if __name__ == "__main__":
    key = jax.random.PRNGKey(0)
    k_param, k_x = jax.random.split(key)
    params = init_rescan_params(k_param)

    x = jax.random.normal(k_x, (2, 3, 16, 16), jnp.float32)   # NCHW, like PyTorch

    out, path1, path3, path5, pool1 = rescan_forward(params, x)
    jax.block_until_ready((out[0], path1, path3, path5, pool1))

    C = settings.feature_map_num
    assert out[0].shape == (2, 3, 16, 16)
    assert path1.shape == (2, C, 16, 16)
    assert path3.shape == (2, C, 16, 16)
    assert path5.shape == (2, C, 16, 16)
    assert pool1.shape == (2, C, 16, 16)
    for t in (out[0], path1, path3, path5, pool1):
        assert bool(jnp.isfinite(t).all())
    print("KERNEL_OK")
</pallas_src>

<mosaic_0001>
module attributes {stable_mosaic.version = 11 : i64} {
  func.func @_rescan_kernel(%arg0: i32, %arg1: memref<1x8x256xf32, #tpu.memory_space<vmem>>, %arg2: memref<9x8x72xf32, #tpu.memory_space<vmem>>, %arg3: memref<5x8x32xf32, #tpu.memory_space<vmem>>, %arg4: memref<14x8x1xf32, #tpu.memory_space<vmem>>, %arg5: memref<18x8x256xf32, #tpu.memory_space<vmem>>, %arg6: memref<1x8x256xf32, #tpu.memory_space<vmem>>, %arg7: memref<1x8x256xf32, #tpu.memory_space<vmem>>, %arg8: memref<1x8x256xf32, #tpu.memory_space<vmem>>, %arg9: memref<1x8x256xf32, #tpu.memory_space<vmem>>, %arg10: memref<1x8x256xf32, #tpu.memory_space<vmem>>, %arg11: memref<72x256xf32, #tpu.memory_space<vmem>>) attributes {dimension_semantics = [#tpu.dimension_semantics<parallel>], iteration_bounds = array<i64: 2>, scalar_prefetch = 0 : i64, scratch_operands = 1 : i64, tpu.core_type = #tpu.core_type<tc>, window_params = [{transform_indices = @transform_0, window_bounds = array<i64: 1, 8, 256>}, {pipeline_mode = #tpu.pipeline_mode<synchronous>, transform_indices = @transform_1, window_bounds = array<i64: 9, 8, 72>}, {pipeline_mode = #tpu.pipeline_mode<synchronous>, transform_indices = @transform_2, window_bounds = array<i64: 5, 8, 32>}, {pipeline_mode = #tpu.pipeline_mode<synchronous>, transform_indices = @transform_3, window_bounds = array<i64: 14, 8, 1>}, {pipeline_mode = #tpu.pipeline_mode<synchronous>, transform_indices = @transform_4, window_bounds = array<i64: 18, 8, 256>}, {transform_indices = @transform_5, window_bounds = array<i64: 1, 8, 256>}, {transform_indices = @transform_6, window_bounds = array<i64: 1, 8, 256>}, {transform_indices = @transform_7, window_bounds = array<i64: 1, 8, 256>}, {transform_indices = @transform_8, window_bounds = array<i64: 1, 8, 256>}, {transform_indices = @transform_9, window_bounds = array<i64: 1, 8, 256>}]} {
    %c0 = arith.constant 0 : index
    %c0_0 = arith.constant 0 : index
    %c0_1 = arith.constant 0 : index
    %0 = vector.load %arg1[%c0, %c0_0, %c0_1] : memref<1x8x256xf32, #tpu.memory_space<vmem>>, vector<1x8x256xf32>
    %1 = vector.shape_cast %0 : vector<1x8x256xf32> to vector<8x256xf32>
    %c17_i32 = arith.constant 17 : i32
    %2 = tpu.dynamic_rotate %1 by %c17_i32 dim 1 : vector<8x256xf32>, i32 -> vector<8x256xf32>
    %c0_2 = arith.constant 0 : index
    %c0_3 = arith.constant 0 : index
    %c0_4 = arith.constant 0 : index
    %3 = vector.load %arg5[%c0_2, %c0_3, %c0_4] : memref<18x8x256xf32, #tpu.memory_space<vmem>>, vector<1x8x256xf32>
    %4 = vector.shape_cast %3 : vector<1x8x256xf32> to vector<8x256xf32>
    %5 = arith.mulf %2, %4 : vector<8x256xf32>
    %c0_5 = arith.constant 0 : index
    %c0_6 = arith.constant 0 : index
    %6 = vector.load %arg11[%c0_5, %c0_6] : memref<72x256xf32, #tpu.memory_space<vmem>>, vector<8x256xf32>
    tpu.vector_store %arg11[%c0_5, %c0_6], %5 {strides = array<i32>} : memref<72x256xf32, #tpu.memory_space<vmem>>, vector<8x256xf32>,
    %c16_i32 = arith.constant 16 : i32
    %7 = tpu.dynamic_rotate %1 by %c16_i32 dim 1 : vector<8x256xf32>, i32 -> vector<8x256xf32>
    %c1 = arith.constant 1 : index
    %c0_7 = arith.constant 0 : index
    %c0_8 = arith.constant 0 : index
    %8 = vector.load %arg5[%c1, %c0_7, %c0_8] : memref<18x8x256xf32, #tpu.memory_space<vmem>>, vector<1x8x256xf32>
    %9 = vector.shape_cast %8 : vector<1x8x256xf32> to vector<8x256xf32>
    %10 = arith.mulf %7, %9 : vector<8x256xf32>
    %c8 = arith.constant 8 : index
    %c0_9 = arith.constant 0 : index
    %11 = vector.load %arg11[%c8, %c0_9] : memref<72x256xf32, #tpu.memory_space<vmem>>, vector<8x256xf32>
    tpu.vector_store %arg11[%c8, %c0_9], %10 {strides = array<i32>} : memref<72x256xf32, #tpu.memory_space<vmem>>, vector<8x256xf32>,
    %c15_i32 = arith.constant 15 : i32
    %12 = tpu.dynamic_rotate %1 by %c15_i32 dim 1 : vector<8x256xf32>, i32 -> vector<8x256xf32>
    %c2 = arith.constant 2 : index
    %c0_10 = arith.constant 0 : index
    %c0_11 = arith.constant 0 : index
    %13 = vector.load %arg5[%c2, %c0_10, %c0_11] : memref<18x8x256xf32, #tpu.memory_space<vmem>>, vector<1x8x256xf32>
    %14 = vector.shape_cast %13 : vector<1x8x256xf32> to vector<8x256xf32>
    %15 = arith.mulf %12, %14 : vector<8x256xf32>
    %c16 = arith.constant 16 : index
    %c0_12 = arith.constant 0 : index
    %16 = vector.load %arg11[%c16, %c0_12] : memref<72x256xf32, #tpu.memory_space<vmem>>, vector<8x256xf32>
    tpu.vector_store %arg11[%c16, %c0_12], %15 {strides = array<i32>} : memref<72x256xf32, #tpu.memory_space<vmem>>, vector<8x256xf32>,
    %c1_i32 = arith.constant 1 : i32
    %17 = tpu.dynamic_rotate %1 by %c1_i32 dim 1 : vector<8x256xf32>, i32 -> vector<8x256xf32>
    %c3 = arith.constant 3 : index
    %c0_13 = arith.constant 0 : index
    %c0_14 = arith.constant 0 : index
    %18 = vector.load %arg5[%c3, %c0_13, %c0_14] : memref<18x8x256xf32, #tpu.memory_space<vmem>>, vector<1x8x256xf32>
    %19 = vector.shape_cast %18 : vector<1x8x256xf32> to vector<8x256xf32>
    %20 = arith.mulf %17, %19 : vector<8x256xf32>
    %c24 = arith.constant 24 : index
    %c0_15 = arith.constant 0 : index
    %21 = vector.load %arg11[%c24, %c0_15] : memref<72x256xf32, #tpu.memory_space<vmem>>, vector<8x256xf32>
    tpu.vector_store %arg11[%c24, %c0_15], %20 {strides = array<i32>} : memref<72x256xf32, #tpu.memory_space<vmem>>, vector<8x256xf32>,
    %c32 = arith.constant 32 : index
    %c0_16 = arith.constant 0 : index
    %22 = vector.load %arg11[%c32, %c0_16] : memref<72x256xf32, #tpu.memory_space<vmem>>, vector<8x256xf32>
    tpu.vector_store %arg11[%c32, %c0_16], %1 {strides = array<i32>} : memref<72x256xf32, #tpu.memory_space<vmem>>, vector<8x256xf32>,
    %c255_i32 = arith.constant 255 : i32
    %23 = tpu.dynamic_rotate %1 by %c255_i32 dim 1 : vector<8x256xf32>, i32 -> vector<8x256xf32>
    %c5 = arith.constant 5 : index
    %c0_17 = arith.constant 0 : index
    %c0_18 = arith.constant 0 : index
    %24 = vector.load %arg5[%c5, %c0_17, %c0_18] : memref<18x8x256xf32, #tpu.memory_space<vmem>>, vector<1x8x256xf32>
    %25 = vector.shape_cast %24 : vector<1x8x256xf32> to vector<8x256xf32>
    %26 = arith.mulf %23, %25 : vector<8x256xf32>
    %c40 = arith.constant 40 : index
    %c0_19 = arith.constant 0 : index
    %27 = vector.load %arg11[%c40, %c0_19] : memref<72x256xf32, #tpu.memory_space<vmem>>, vector<8x256xf32>
    tpu.vector_store %arg11[%c40, %c0_19], %26 {strides = array<i32>} : memref<72x256xf32, #tpu.memory_space<vmem>>, vector<8x256xf32>,
    %c241_i32 = arith.constant 241 : i32
    %28 = tpu.dynamic_rotate %1 by %c241_i32 dim 1 : vector<8x256xf32>, i32 -> vector<8x256xf32>
    %c6 = arith.constant 6 : index
    %c0_20 = arith.constant 0 : index
    %c0_21 = arith.constant 0 : index
    %29 = vector.load %arg5[%c6, %c0_20, %c0_21] : memref<18x8x256xf32, #tpu.memory_space<vmem>>, vector<1x8x256xf32>
    %30 = vector.shape_cast %29 : vector<1x8x256xf32> to vector<8x256xf32>
    %31 = arith.mulf %28, %30 : vector<8x256xf32>
    %c48 = arith.constant 48 : index
    %c0_22 = arith.constant 0 : index
    %32 = vector.load %arg11[%c48, %c0_22] : memref<72x256xf32, #tpu.memory_space<vmem>>, vector<8x256xf32>
    tpu.vector_store %arg11[%c48, %c0_22], %31 {strides = array<i32>} : memref<72x256xf32, #tpu.memory_space<vmem>>, vector<8x256xf32>,
    %c240_i32 = arith.constant 240 : i32
    %33 = tpu.dynamic_rotate %1 by %c240_i32 dim 1 : vector<8x256xf32>, i32 -> vector<8x256xf32>
    %c7 = arith.constant 7 : index
    %c0_23 = arith.constant 0 : index
    %c0_24 = arith.constant 0 : index
    %34 = vector.load %arg5[%c7, %c0_23, %c0_24] : memref<18x8x256xf32, #tpu.memory_space<vmem>>, vector<1x8x256xf32>
    %35 = vector.shape_cast %34 : vector<1x8x256xf32> to vector<8x256xf32>
    %36 = arith.mulf %33, %35 : vector<8x256xf32>
    %c56 = arith.constant 56 : index
    %c0_25 = arith.constant 0 : index
    %37 = vector.load %arg11[%c56, %c0_25] : memref<72x256xf32, #tpu.memory_space<vmem>>, vector<8x256xf32>
    tpu.vector_store %arg11[%c56, %c0_25], %36 {strides = array<i32>} : memref<72x256xf32, #tpu.memory_space<vmem>>, vector<8x256xf32>,
    %c239_i32 = arith.constant 239 : i32
    %38 = tpu.dynamic_rotate %1 by %c239_i32 dim 1 : vector<8x256xf32>, i32 -> vector<8x256xf32>
    %c8_26 = arith.constant 8 : index
    %c0_27 = arith.constant 0 : index
    %c0_28 = arith.constant 0 : index
    %39 = vector.load %arg5[%c8_26, %c0_27, %c0_28] : memref<18x8x256xf32, #tpu.memory_space<vmem>>, vector<1x8x256xf32>
    %40 = vector.shape_cast %39 : vector<1x8x256xf32> to vector<8x256xf32>
    %41 = arith.mulf %38, %40 : vector<8x256xf32>
    %c64 = arith.constant 64 : index
    %c0_29 = arith.constant 0 : index
    %42 = vector.load %arg11[%c64, %c0_29] : memref<72x256xf32, #tpu.memory_space<vmem>>, vector<8x256xf32>
    tpu.vector_store %arg11[%c64, %c0_29], %41 {strides = array<i32>} : memref<72x256xf32, #tpu.memory_space<vmem>>, vector<8x256xf32>,
    %c0_30 = arith.constant 0 : index
    %c0_31 = arith.constant 0 : index
    %c0_32 = arith.constant 0 : index
    %43 = vector.load %arg2[%c0_30, %c0_31, %c0_32] : memref<9x8x72xf32, #tpu.memory_space<vmem>>, vector<1x8x72xf32>
    %44 = vector.shape_cast %43 : vector<1x8x72xf32> to vector<8x72xf32>
    %c0_33 = arith.constant 0 : index
    %c0_34 = arith.constant 0 : index
    %45 = vector.load %arg11[%c0_33, %c0_34] : memref<72x256xf32, #tpu.memory_space<vmem>>, vector<72x256xf32>
    %cst = arith.constant dense<0.000000e+00> : vector<8x256xf32>
    %46 = tpu.matmul %44, %45, %cst {dimension_numbers = #tpu.dot_dimension_numbers<[1], [0], [0], [1], [0, 0, 1, 1], [], []>} : vector<8x72xf32>, vector<72x256xf32>, vector<8x256xf32> -> vector<8x256xf32>
    %c0_35 = arith.constant 0 : index
    %c0_36 = arith.constant 0 : index
    %c0_37 = arith.constant 0 : index
    %47 = vector.load %arg4[%c0_35, %c0_36, %c0_37] : memref<14x8x1xf32, #tpu.memory_space<vmem>>, vector<1x8x1xf32>
    %48 = vector.shape_cast %47 : vector<1x8x1xf32> to vector<8x1xf32>
    %49 = vector.broadcast %48 : vector<8x1xf32> to vector<8x256xf32>
    %50 = arith.addf %46, %49 : vector<8x256xf32>
    %cst_38 = arith.constant 0.000000e+00 : f32
    %51 = vector.broadcast %cst_38 : f32 to vector<8x256xf32>
    %52 = arith.cmpf oge, %50, %51 : vector<8x256xf32>
    %cst_39 = arith.constant 2.000000e-01 : f32
    %53 = vector.broadcast %cst_39 : f32 to vector<8x256xf32>
    %54 = arith.mulf %53, %50 : vector<8x256xf32>
    %55 = arith.select %52, %50, %54 : vector<8x256xi1>, vector<8x256xf32>
    %c17_i32_40 = arith.constant 17 : i32
    %56 = tpu.dynamic_rotate %55 by %c17_i32_40 dim 1 : vector<8x256xf32>, i32 -> vector<8x256xf32>
    %c0_41 = arith.constant 0 : index
    %c0_42 = arith.constant 0 : index
    %c0_43 = arith.constant 0 : index
    %57 = vector.load %arg5[%c0_41, %c0_42, %c0_43] : memref<18x8x256xf32, #tpu.memory_space<vmem>>, vector<1x8x256xf32>
    %58 = vector.shape_cast %57 : vector<1x8x256xf32> to vector<8x256xf32>
    %59 = arith.mulf %56, %58 : vector<8x256xf32>
    %c0_44 = arith.constant 0 : index
    %c0_45 = arith.constant 0 : index
    %60 = vector.load %arg11[%c0_44, %c0_45] : memref<72x256xf32, #tpu.memory_space<vmem>>, vector<8x256xf32>
    tpu.vector_store %arg11[%c0_44, %c0_45], %59 {strides = array<i32>} : memref<72x256xf32, #tpu.memory_space<vmem>>, vector<8x256xf32>,
    %c16_i32_46 = arith.constant 16 : i32
    %61 = tpu.dynamic_rotate %55 by %c16_i32_46 dim 1 : vector<8x256xf32>, i32 -> vector<8x256xf32>
    %c1_47 = arith.constant 1 : index
    %c0_48 = arith.constant 0 : index
    %c0_49 = arith.constant 0 : index
    %62 = vector.load %arg5[%c1_47, %c0_48, %c0_49] : memref<18x8x256xf32, #tpu.memory_space<vmem>>, vector<1x8x256xf32>
    %63 = vector.shape_cast %62 : vector<1x8x256xf32> to vector<8x256xf32>
    %64 = arith.mulf %61, %63 : vector<8x256xf32>
    %c8_50 = arith.constant 8 : index
    %c0_51 = arith.constant 0 : index
    %65 = vector.load %arg11[%c8_50, %c0_51] : memref<72x256xf32, #tpu.memory_space<vmem>>, vector<8x256xf32>
    tpu.vector_store %arg11[%c8_50, %c0_51], %64 {strides = array<i32>} : memref<72x256xf32, #tpu.memory_space<vmem>>, vector<8x256xf32>,
    %c15_i32_52 = arith.constant 15 : i32
    %66 = tpu.dynamic_rotate %55 by %c15_i32_52 dim 1 : vector<8x256xf32>, i32 -> vector<8x256xf32>
    %c2_53 = arith.constant 2 : index
    %c0_54 = arith.constant 0 : index
    %c0_55 = arith.constant 0 : index
    %67 = vector.load %arg5[%c2_53, %c0_54, %c0_55] : memref<18x8x256xf32, #tpu.memory_space<vmem>>, vector<1x8x256xf32>
    %68 = vector.shape_cast %67 : vector<1x8x256xf32> to vector<8x256xf32>
    %69 = arith.mulf %66, %68 : vector<8x256xf32>
    %c16_56 = arith.constant 16 : index
    %c0_57 = arith.constant 0 : index
    %70 = vector.load %arg11[%c16_56, %c0_57] : memref<72x256xf32, #tpu.memory_space<vmem>>, vector<8x256xf32>
    tpu.vector_store %arg11[%c16_56, %c0_57], %69 {strides = array<i32>} : memref<72x256xf32, #tpu.memory_space<vmem>>, vector<8x256xf32>,
    %c1_i32_58 = arith.constant 1 : i32
    %71 = tpu.dynamic_rotate %55 by %c1_i32_58 dim 1 : vector<8x256xf32>, i32 -> vector<8x256xf32>
    %c3_59 = arith.constant 3 : index
    %c0_60 = arith.constant 0 : index
    %c0_61 = arith.constant 0 : index
    %72 = vector.load %arg5[%c3_59, %c0_60, %c0_61] : memref<18x8x256xf32, #tpu.memory_space<vmem>>, vector<1x8x256xf32>
    %73 = vector.shape_cast %72 : vector<1x8x256xf32> to vector<8x256xf32>
    %74 = arith.mulf %71, %73 : vector<8x256xf32>
    %c24_62 = arith.constant 24 : index
    %c0_63 = arith.constant 0 : index
    %75 = vector.load %arg11[%c24_62, %c0_63] : memref<72x256xf32, #tpu.memory_space<vmem>>, vector<8x256xf32>
    tpu.vector_store %arg11[%c24_62, %c0_63], %74 {strides = array<i32>} : memref<72x256xf32, #tpu.memory_space<vmem>>, vector<8x256xf32>,
    %c32_64 = arith.constant 32 : index
    %c0_65 = arith.constant 0 : index
    %76 = vector.load %arg11[%c32_64, %c0_65] : memref<72x256xf32, #tpu.memory_space<vmem>>, vector<8x256xf32>
    tpu.vector_store %arg11[%c32_64, %c0_65], %55 {strides = array<i32>} : memref<72x256xf32, #tpu.memory_space<vmem>>, vector<8x256xf32>,
    %c255_i32_66 = arith.constant 255 : i32
    %77 = tpu.dynamic_rotate %55 by %c255_i32_66 dim 1 : vector<8x256xf32>, i32 -> vector<8x256xf32>
    %c5_67 = arith.constant 5 : index
    %c0_68 = arith.constant 0 : index
    %c0_69 = arith.constant 0 : index
    %78 = vector.load %arg5[%c5_67, %c0_68, %c0_69] : memref<18x8x256xf32, #tpu.memory_space<vmem>>, vector<1x8x256xf32>
    %79 = vector.shape_cast %78 : vector<1x8x256xf32> to vector<8x256xf32>
    %80 = arith.mulf %77, %79 : vector<8x256xf32>
    %c40_70 = arith.constant 40 : index
    %c0_71 = arith.constant 0 : index
    %81 = vector.load %arg11[%c40_70, %c0_71] : memref<72x256xf32, #tpu.memory_space<vmem>>, vector<8x256xf32>
    tpu.vector_store %arg11[%c40_70, %c0_71], %80 {strides = array<i32>} : memref<72x256xf32, #tpu.memory_space<vmem>>, vector<8x256xf32>,
    %c241_i32_72 = arith.constant 241 : i32
    %82 = tpu.dynamic_rotate %55 by %c241_i32_72 dim 1 : vector<8x256xf32>, i32 -> vector<8x256xf32>
    %c6_73 = arith.constant 6 : index
    %c0_74 = arith.constant 0 : index
    %c0_75 = arith.constant 0 : index
    %83 = vector.load %arg5[%c6_73, %c0_74, %c0_75] : memref<18x8x256xf32, #tpu.memory_space<vmem>>, vector<1x8x256xf32>
    %84 = vector.shape_cast %83 : vector<1x8x256xf32> to vector<8x256xf32>
    %85 = arith.mulf %82, %84 : vector<8x256xf32>
    %c48_76 = arith.constant 48 : index
    %c0_77 = arith.constant 0 : index
    %86 = vector.load %arg11[%c48_76, %c0_77] : memref<72x256xf32, #tpu.memory_space<vmem>>, vector<8x256xf32>
    tpu.vector_store %arg11[%c48_76, %c0_77], %85 {strides = array<i32>} : memref<72x256xf32, #tpu.memory_space<vmem>>, vector<8x256xf32>,
    %c240_i32_78 = arith.constant 240 : i32
    %87 = tpu.dynamic_rotate %55 by %c240_i32_78 dim 1 : vector<8x256xf32>, i32 -> vector<8x256xf32>
    %c7_79 = arith.constant 7 : index
    %c0_80 = arith.constant 0 : index
    %c0_81 = arith.constant 0 : index
    %88 = vector.load %arg5[%c7_79, %c0_80, %c0_81] : memref<18x8x256xf32, #tpu.memory_space<vmem>>, vector<1x8x256xf32>
    %89 = vector.shape_cast %88 : vector<1x8x256xf32> to vector<8x256xf32>
    %90 = arith.mulf %87, %89 : vector<8x256xf32>
    %c56_82 = arith.constant 56 : index
    %c0_83 = arith.constant 0 : index
    %91 = vector.load %arg11[%c56_82, %c0_83] : memref<72x256xf32, #tpu.memory_space<vmem>>, vector<8x256xf32>
    tpu.vector_store %arg11[%c56_82, %c0_83], %90 {strides = array<i32>} : memref<72x256xf32, #tpu.memory_space<vmem>>, vector<8x256xf32>,
    %c239_i32_84 = arith.constant 239 : i32
    %92 = tpu.dynamic_rotate %55 by %c239_i32_84 dim 1 : vector<8x256xf32>, i32 -> vector<8x256xf32>
    %c8_85 = arith.constant 8 : index
    %c0_86 = arith.constant 0 : index
    %c0_87 = arith.constant 0 : index
    %93 = vector.load %arg5[%c8_85, %c0_86, %c0_87] : memref<18x8x256xf32, #tpu.memory_space<vmem>>, vector<1x8x256xf32>
    %94 = vector.shape_cast %93 : vector<1x8x256xf32> to vector<8x256xf32>
    %95 = arith.mulf %92, %94 : vector<8x256xf32>
    %c64_88 = arith.constant 64 : index
    %c0_89 = arith.constant 0 : index
    %96 = vector.load %arg11[%c64_88, %c0_89] : memref<72x256xf32, #tpu.memory_space<vmem>>, vector<8x256xf32>
    tpu.vector_store %arg11[%c64_88, %c0_89], %95 {strides = array<i32>} : memref<72x256xf32, #tpu.memory_space<vmem>>, vector<8x256xf32>,
    %c1_90 = arith.constant 1 : index
    %c0_91 = arith.constant 0 : index
    %c0_92 = arith.constant 0 : index
    %97 = vector.load %arg2[%c1_90, %c0_91, %c0_92] : memref<9x8x72xf32, #tpu.memory_space<vmem>>, vector<1x8x72xf32>
    %98 = vector.shape_cast %97 : vector<1x8x72xf32> to vector<8x72xf32>
    %c0_93 = arith.constant 0 : index
    %c0_94 = arith.constant 0 : index
    %99 = vector.load %arg11[%c0_93, %c0_94] : memref<72x256xf32, #tpu.memory_space<vmem>>, vector<72x256xf32>
    %cst_95 = arith.constant dense<0.000000e+00> : vector<8x256xf32>
    %100 = tpu.matmul %98, %99, %cst_95 {dimension_numbers = #tpu.dot_dimension_numbers<[1], [0], [0], [1], [0, 0, 1, 1], [], []>} : vector<8x72xf32>, vector<72x256xf32>, vector<8x256xf32> -> vector<8x256xf32>
    %c1_96 = arith.constant 1 : index
    %c0_97 = arith.constant 0 : index
    %c0_98 = arith.constant 0 : index
    %101 = vector.load %arg4[%c1_96, %c0_97, %c0_98] : memref<14x8x1xf32, #tpu.memory_space<vmem>>, vector<1x8x1xf32>
    %102 = vector.shape_cast %101 : vector<1x8x1xf32> to vector<8x1xf32>
    %103 = vector.broadcast %102 : vector<8x1xf32> to vector<8x256xf32>
    %104 = arith.addf %100, %103 : vector<8x256xf32>
    %cst_99 = arith.constant 0.000000e+00 : f32
    %105 = vector.broadcast %cst_99 : f32 to vector<8x256xf32>
    %106 = arith.cmpf oge, %104, %105 : vector<8x256xf32>
    %cst_100 = arith.constant 2.000000e-01 : f32
    %107 = vector.broadcast %cst_100 : f32 to vector<8x256xf32>
    %108 = arith.mulf %107, %104 : vector<8x256xf32>
    %109 = arith.select %106, %104, %108 : vector<8x256xi1>, vector<8x256xf32>
    %c8_101 = arith.constant 8 : index
    %c0_102 = arith.constant 0 : index
    %c0_103 = arith.constant 0 : index
    %110 = vector.load %arg2[%c8_101, %c0_102, %c0_103] : memref<9x8x72xf32, #tpu.memory_space<vmem>>, vector<1x8x72xf32>
    %111 = vector.shape_cast %110 : vector<1x8x72xf32> to vector<8x72xf32>
    %c0_104 = arith.constant 0 : index
    %c0_105 = arith.constant 0 : index
    %112 = vector.load %arg11[%c0_104, %c0_105] : memref<72x256xf32, #tpu.memory_space<vmem>>, vector<72x256xf32>
    %cst_106 = arith.constant dense<0.000000e+00> : vector<8x256xf32>
    %113 = tpu.matmul %111, %112, %cst_106 {dimension_numbers = #tpu.dot_dimension_numbers<[1], [0], [0], [1], [0, 0, 1, 1], [], []>} : vector<8x72xf32>, vector<72x256xf32>, vector<8x256xf32> -> vector<8x256xf32>
    %c8_107 = arith.constant 8 : index
    %c0_108 = arith.constant 0 : index
    %c0_109 = arith.constant 0 : index
    %114 = vector.load %arg4[%c8_107, %c0_108, %c0_109] : memref<14x8x1xf32, #tpu.memory_space<vmem>>, vector<1x8x1xf32>
    %115 = vector.shape_cast %114 : vector<1x8x1xf32> to vector<8x1xf32>
    %116 = vector.broadcast %115 : vector<8x1xf32> to vector<8x256xf32>
    %117 = arith.addf %113, %116 : vector<8x256xf32>
    %c17_i32_110 = arith.constant 17 : i32
    %118 = tpu.dynamic_rotate %109 by %c17_i32_110 dim 1 : vector<8x256xf32>, i32 -> vector<8x256xf32>
    %c0_111 = arith.constant 0 : index
    %c0_112 = arith.constant 0 : index
    %c0_113 = arith.constant 0 : index
    %119 = vector.load %arg5[%c0_111, %c0_112, %c0_113] : memref<18x8x256xf32, #tpu.memory_space<vmem>>, vector<1x8x256xf32>
    %120 = vector.shape_cast %119 : vector<1x8x256xf32> to vector<8x256xf32>
    %121 = arith.mulf %118, %120 : vector<8x256xf32>
    %c0_114 = arith.constant 0 : index
    %c0_115 = arith.constant 0 : index
    %122 = vector.load %arg11[%c0_114, %c0_115] : memref<72x256xf32, #tpu.memory_space<vmem>>, vector<8x256xf32>
    tpu.vector_store %arg11[%c0_114, %c0_115], %121 {strides = array<i32>} : memref<72x256xf32, #tpu.memory_space<vmem>>, vector<8x256xf32>,
    %c16_i32_116 = arith.constant 16 : i32
    %123 = tpu.dynamic_rotate %109 by %c16_i32_116 dim 1 : vector<8x256xf32>, i32 -> vector<8x256xf32>
    %c1_117 = arith.constant 1 : index
    %c0_118 = arith.constant 0 : index
    %c0_119 = arith.constant 0 : index
    %124 = vector.load %arg5[%c1_117, %c0_118, %c0_119] : memref<18x8x256xf32, #tpu.memory_space<vmem>>, vector<1x8x256xf32>
    %125 = vector.shape_cast %124 : vector<1x8x256xf32> to vector<8x256xf32>
    %126 = arith.mulf %123, %125 : vector<8x256xf32>
    %c8_120 = arith.constant 8 : index
    %c0_121 = arith.constant 0 : index
    %127 = vector.load %arg11[%c8_120, %c0_121] : memref<72x256xf32, #tpu.memory_space<vmem>>, vector<8x256xf32>
    tpu.vector_store %arg11[%c8_120, %c0_121], %126 {strides = array<i32>} : memref<72x256xf32, #tpu.memory_space<vmem>>, vector<8x256xf32>,
    %c15_i32_122 = arith.constant 15 : i32
    %128 = tpu.dynamic_rotate %109 by %c15_i32_122 dim 1 : vector<8x256xf32>, i32 -> vector<8x256xf32>
    %c2_123 = arith.constant 2 : index
    %c0_124 = arith.constant 0 : index
    %c0_125 = arith.constant 0 : index
    %129 = vector.load %arg5[%c2_123, %c0_124, %c0_125] : memref<18x8x256xf32, #tpu.memory_space<vmem>>, vector<1x8x256xf32>
    %130 = vector.shape_cast %129 : vector<1x8x256xf32> to vector<8x256xf32>
    %131 = arith.mulf %128, %130 : vector<8x256xf32>
    %c16_126 = arith.constant 16 : index
    %c0_127 = arith.constant 0 : index
    %132 = vector.load %arg11[%c16_126, %c0_127] : memref<72x256xf32, #tpu.memory_space<vmem>>, vector<8x256xf32>
    tpu.vector_store %arg11[%c16_126, %c0_127], %131 {strides = array<i32>} : memref<72x256xf32, #tpu.memory_space<vmem>>, vector<8x256xf32>,
    %c1_i32_128 = arith.constant 1 : i32
    %133 = tpu.dynamic_rotate %109 by %c1_i32_128 dim 1 : vector<8x256xf32>, i32 -> vector<8x256xf32>
    %c3_129 = arith.constant 3 : index
    %c0_130 = arith.constant 0 : index
    %c0_131 = arith.constant 0 : index
    %134 = vector.load %arg5[%c3_129, %c0_130, %c0_131] : memref<18x8x256xf32, #tpu.memory_space<vmem>>, vector<1x8x256xf32>
    %135 = vector.shape_cast %134 : vector<1x8x256xf32> to vector<8x256xf32>
    %136 = arith.mulf %133, %135 : vector<8x256xf32>
    %c24_132 = arith.constant 24 : index
    %c0_133 = arith.constant 0 : index
    %137 = vector.load %arg11[%c24_132, %c0_133] : memref<72x256xf32, #tpu.memory_space<vmem>>, vector<8x256xf32>
    tpu.vector_store %arg11[%c24_132, %c0_133], %136 {strides = array<i32>} : memref<72x256xf32, #tpu.memory_space<vmem>>, vector<8x256xf32>,
    %c32_134 = arith.constant 32 : index
    %c0_135 = arith.constant 0 : index
    %138 = vector.load %arg11[%c32_134, %c0_135] : memref<72x256xf32, #tpu.memory_space<vmem>>, vector<8x256xf32>
    tpu.vector_store %arg11[%c32_134, %c0_135], %109 {strides = array<i32>} : memref<72x256xf32, #tpu.memory_space<vmem>>, vector<8x256xf32>,
    %c255_i32_136 = arith.constant 255 : i32
    %139 = tpu.dynamic_rotate %109 by %c255_i32_136 dim 1 : vector<8x256xf32>, i32 -> vector<8x256xf32>
    %c5_137 = arith.constant 5 : index
    %c0_138 = arith.constant 0 : index
    %c0_139 = arith.constant 0 : index
    %140 = vector.load %arg5[%c5_137, %c0_138, %c0_139] : memref<18x8x256xf32, #tpu.memory_space<vmem>>, vector<1x8x256xf32>
    %141 = vector.shape_cast %140 : vector<1x8x256xf32> to vector<8x256xf32>
    %142 = arith.mulf %139, %141 : vector<8x256xf32>
    %c40_140 = arith.constant 40 : index
    %c0_141 = arith.constant 0 : index
    %143 = vector.load %arg11[%c40_140, %c0_141] : memref<72x256xf32, #tpu.memory_space<vmem>>, vector<8x256xf32>
    tpu.vector_store %arg11[%c40_140, %c0_141], %142 {strides = array<i32>} : memref<72x256xf32, #tpu.memory_space<vmem>>, vector<8x256xf32>,
    %c241_i32_142 = arith.constant 241 : i32
    %144 = tpu.dynamic_rotate %109 by %c241_i32_142 dim 1 : vector<8x256xf32>, i32 -> vector<8x256xf32>
    %c6_143 = arith.constant 6 : index
    %c0_144 = arith.constant 0 : index
    %c0_145 = arith.constant 0 : index
    %145 = vector.load %arg5[%c6_143, %c0_144, %c0_145] : memref<18x8x256xf32, #tpu.memory_space<vmem>>, vector<1x8x256xf32>
    %146 = vector.shape_cast %145 : vector<1x8x256xf32> to vector<8x256xf32>
    %147 = arith.mulf %144, %146 : vector<8x256xf32>
    %c48_146 = arith.constant 48 : index
    %c0_147 = arith.constant 0 : index
    %148 = vector.load %arg11[%c48_146, %c0_147] : memref<72x256xf32, #tpu.memory_space<vmem>>, vector<8x256xf32>
    tpu.vector_store %arg11[%c48_146, %c0_147], %147 {strides = array<i32>} : memref<72x256xf32, #tpu.memory_space<vmem>>, vector<8x256xf32>,
    %c240_i32_148 = arith.constant 240 : i32
    %149 = tpu.dynamic_rotate %109 by %c240_i32_148 dim 1 : vector<8x256xf32>, i32 -> vector<8x256xf32>
    %c7_149 = arith.constant 7 : index
    %c0_150 = arith.constant 0 : index
    %c0_151 = arith.constant 0 : index
    %150 = vector.load %arg5[%c7_149, %c0_150, %c0_151] : memref<18x8x256xf32, #tpu.memory_space<vmem>>, vector<1x8x256xf32>
    %151 = vector.shape_cast %150 : vector<1x8x256xf32> to vector<8x256xf32>
    %152 = arith.mulf %149, %151 : vector<8x256xf32>
    %c56_152 = arith.constant 56 : index
    %c0_153 = arith.constant 0 : index
    %153 = vector.load %arg11[%c56_152, %c0_153] : memref<72x256xf32, #tpu.memory_space<vmem>>, vector<8x256xf32>
    tpu.vector_store %arg11[%c56_152, %c0_153], %152 {strides = array<i32>} : memref<72x256xf32, #tpu.memory_space<vmem>>, vector<8x256xf32>,
    %c239_i32_154 = arith.constant 239 : i32
    %154 = tpu.dynamic_rotate %109 by %c239_i32_154 dim 1 : vector<8x256xf32>, i32 -> vector<8x256xf32>
    %c8_155 = arith.constant 8 : index
    %c0_156 = arith.constant 0 : index
    %c0_157 = arith.constant 0 : index
    %155 = vector.load %arg5[%c8_155, %c0_156, %c0_157] : memref<18x8x256xf32, #tpu.memory_space<vmem>>, vector<1x8x256xf32>
    %156 = vector.shape_cast %155 : vector<1x8x256xf32> to vector<8x256xf32>
    %157 = arith.mulf %154, %156 : vector<8x256xf32>
    %c64_158 = arith.constant 64 : index
    %c0_159 = arith.constant 0 : index
    %158 = vector.load %arg11[%c64_158, %c0_159] : memref<72x256xf32, #tpu.memory_space<vmem>>, vector<8x256xf32>
    tpu.vector_store %arg11[%c64_158, %c0_159], %157 {strides = array<i32>} : memref<72x256xf32, #tpu.memory_space<vmem>>, vector<8x256xf32>,
    %c2_160 = arith.constant 2 : index
    %c0_161 = arith.constant 0 : index
    %c0_162 = arith.constant 0 : index
    %159 = vector.load %arg2[%c2_160, %c0_161, %c0_162] : memref<9x8x72xf32, #tpu.memory_space<vmem>>, vector<1x8x72xf32>
    %160 = vector.shape_cast %159 : vector<1x8x72xf32> to vector<8x72xf32>
    %c0_163 = arith.constant 0 : index
    %c0_164 = arith.constant 0 : index
    %161 = vector.load %arg11[%c0_163, %c0_164] : memref<72x256xf32, #tpu.memory_space<vmem>>, vector<72x256xf32>
    %cst_165 = arith.constant dense<0.000000e+00> : vector<8x256xf32>
    %162 = tpu.matmul %160, %161, %cst_165 {dimension_numbers = #tpu.dot_dimension_numbers<[1], [0], [0], [1], [0, 0, 1, 1], [], []>} : vector<8x72xf32>, vector<72x256xf32>, vector<8x256xf32> -> vector<8x256xf32>
    %c2_166 = arith.constant 2 : index
    %c0_167 = arith.constant 0 : index
    %c0_168 = arith.constant 0 : index
    %163 = vector.load %arg4[%c2_166, %c0_167, %c0_168] : memref<14x8x1xf32, #tpu.memory_space<vmem>>, vector<1x8x1xf32>
    %164 = vector.shape_cast %163 : vector<1x8x1xf32> to vector<8x1xf32>
    %165 = vector.broadcast %164 : vector<8x1xf32> to vector<8x256xf32>
    %166 = arith.addf %162, %165 : vector<8x256xf32>
    %cst_169 = arith.constant 0.000000e+00 : f32
    %167 = vector.broadcast %cst_169 : f32 to vector<8x256xf32>
    %168 = arith.cmpf oge, %166, %167 : vector<8x256xf32>
    %cst_170 = arith.constant 2.000000e-01 : f32
    %169 = vector.broadcast %cst_170 : f32 to vector<8x256xf32>
    %170 = arith.mulf %169, %166 : vector<8x256xf32>
    %171 = arith.select %168, %166, %170 : vector<8x256xi1>, vector<8x256xf32>
    %c17_i32_171 = arith.constant 17 : i32
    %172 = tpu.dynamic_rotate %171 by %c17_i32_171 dim 1 : vector<8x256xf32>, i32 -> vector<8x256xf32>
    %c0_172 = arith.constant 0 : index
    %c0_173 = arith.constant 0 : index
    %c0_174 = arith.constant 0 : index
    %173 = vector.load %arg5[%c0_172, %c0_173, %c0_174] : memref<18x8x256xf32, #tpu.memory_space<vmem>>, vector<1x8x256xf32>
    %174 = vector.shape_cast %173 : vector<1x8x256xf32> to vector<8x256xf32>
    %175 = arith.mulf %172, %174 : vector<8x256xf32>
    %c0_175 = arith.constant 0 : index
    %c0_176 = arith.constant 0 : index
    %176 = vector.load %arg11[%c0_175, %c0_176] : memref<72x256xf32, #tpu.memory_space<vmem>>, vector<8x256xf32>
    tpu.vector_store %arg11[%c0_175, %c0_176], %175 {strides = array<i32>} : memref<72x256xf32, #tpu.memory_space<vmem>>, vector<8x256xf32>,
    %c16_i32_177 = arith.constant 16 : i32
    %177 = tpu.dynamic_rotate %171 by %c16_i32_177 dim 1 : vector<8x256xf32>, i32 -> vector<8x256xf32>
    %c1_178 = arith.constant 1 : index
    %c0_179 = arith.constant 0 : index
    %c0_180 = arith.constant 0 : index
    %178 = vector.load %arg5[%c1_178, %c0_179, %c0_180] : memref<18x8x256xf32, #tpu.memory_space<vmem>>, vector<1x8x256xf32>
    %179 = vector.shape_cast %178 : vector<1x8x256xf32> to vector<8x256xf32>
    %180 = arith.mulf %177, %179 : vector<8x256xf32>
    %c8_181 = arith.constant 8 : index
    %c0_182 = arith.constant 0 : index
    %181 = vector.load %arg11[%c8_181, %c0_182] : memref<72x256xf32, #tpu.memory_space<vmem>>, vector<8x256xf32>
    tpu.vector_store %arg11[%c8_181, %c0_182], %180 {strides = array<i32>} : memref<72x256xf32, #tpu.memory_space<vmem>>, vector<8x256xf32>,
    %c15_i32_183 = arith.constant 15 : i32
    %182 = tpu.dynamic_rotate %171 by %c15_i32_183 dim 1 : vector<8x256xf32>, i32 -> vector<8x256xf32>
    %c2_184 = arith.constant 2 : index
    %c0_185 = arith.constant 0 : index
    %c0_186 = arith.constant 0 : index
    %183 = vector.load %arg5[%c2_184, %c0_185, %c0_186] : memref<18x8x256xf32, #tpu.memory_space<vmem>>, vector<1x8x256xf32>
    %184 = vector.shape_cast %183 : vector<1x8x256xf32> to vector<8x256xf32>
    %185 = arith.mulf %182, %184 : vector<8x256xf32>
    %c16_187 = arith.constant 16 : index
    %c0_188 = arith.constant 0 : index
    %186 = vector.load %arg11[%c16_187, %c0_188] : memref<72x256xf32, #tpu.memory_space<vmem>>, vector<8x256xf32>
    tpu.vector_store %arg11[%c16_187, %c0_188], %185 {strides = array<i32>} : memref<72x256xf32, #tpu.memory_space<vmem>>, vector<8x256xf32>,
    %c1_i32_189 = arith.constant 1 : i32
    %187 = tpu.dynamic_rotate %171 by %c1_i32_189 dim 1 : vector<8x256xf32>, i32 -> vector<8x256xf32>
    %c3_190 = arith.constant 3 : index
    %c0_191 = arith.constant 0 : index
    %c0_192 = arith.constant 0 : index
    %188 = vector.load %arg5[%c3_190, %c0_191, %c0_192] : memref<18x8x256xf32, #tpu.memory_space<vmem>>, vector<1x8x256xf32>
    %189 = vector.shape_cast %188 : vector<1x8x256xf32> to vector<8x256xf32>
    %190 = arith.mulf %187, %189 : vector<8x256xf32>
    %c24_193 = arith.constant 24 : index
    %c0_194 = arith.constant 0 : index
    %191 = vector.load %arg11[%c24_193, %c0_194] : memref<72x256xf32, #tpu.memory_space<vmem>>, vector<8x256xf32>
    tpu.vector_store %arg11[%c24_193, %c0_194], %190 {strides = array<i32>} : memref<72x256xf32, #tpu.memory_space<vmem>>, vector<8x256xf32>,
    %c32_195 = arith.constant 32 : index
    %c0_196 = arith.constant 0 : index
    %192 = vector.load %arg11[%c32_195, %c0_196] : memref<72x256xf32, #tpu.memory_space<vmem>>, vector<8x256xf32>
    tpu.vector_store %arg11[%c32_195, %c0_196], %171 {strides = array<i32>} : memref<72x256xf32, #tpu.memory_space<vmem>>, vector<8x256xf32>,
    %c255_i32_197 = arith.constant 255 : i32
    %193 = tpu.dynamic_rotate %171 by %c255_i32_197 dim 1 : vector<8x256xf32>, i32 -> vector<8x256xf32>
    %c5_198 = arith.constant 5 : index
    %c0_199 = arith.constant 0 : index
    %c0_200 = arith.constant 0 : index
    %194 = vector.load %arg5[%c5_198, %c0_199, %c0_200] : memref<18x8x256xf32, #tpu.memory_space<vmem>>, vector<1x8x256xf32>
    %195 = vector.shape_cast %194 : vector<1x8x256xf32> to vector<8x256xf32>
    %196 = arith.mulf %193, %195 : vector<8x256xf32>
    %c40_201 = arith.constant 40 : index
    %c0_202 = arith.constant 0 : index
    %197 = vector.load %arg11[%c40_201, %c0_202] : memref<72x256xf32, #tpu.memory_space<vmem>>, vector<8x256xf32>
    tpu.vector_store %arg11[%c40_201, %c0_202], %196 {strides = array<i32>} : memref<72x256xf32, #tpu.memory_space<vmem>>, vector<8x256xf32>,
    %c241_i32_203 = arith.constant 241 : i32
    %198 = tpu.dynamic_rotate %171 by %c241_i32_203 dim 1 : vector<8x256xf32>, i32 -> vector<8x256xf32>
    %c6_204 = arith.constant 6 : index
    %c0_205 = arith.constant 0 : index
    %c0_206 = arith.constant 0 : index
    %199 = vector.load %arg5[%c6_204, %c0_205, %c0_206] : memref<18x8x256xf32, #tpu.memory_space<vmem>>, vector<1x8x256xf32>
    %200 = vector.shape_cast %199 : vector<1x8x256xf32> to vector<8x256xf32>
    %201 = arith.mulf %198, %200 : vector<8x256xf32>
    %c48_207 = arith.constant 48 : index
    %c0_208 = arith.constant 0 : index
    %202 = vector.load %arg11[%c48_207, %c0_208] : memref<72x256xf32, #tpu.memory_space<vmem>>, vector<8x256xf32>
    tpu.vector_store %arg11[%c48_207, %c0_208], %201 {strides = array<i32>} : memref<72x256xf32, #tpu.memory_space<vmem>>, vector<8x256xf32>,
    %c240_i32_209 = arith.constant 240 : i32
    %203 = tpu.dynamic_rotate %171 by %c240_i32_209 dim 1 : vector<8x256xf32>, i32 -> vector<8x256xf32>
    %c7_210 = arith.constant 7 : index
    %c0_211 = arith.constant 0 : index
    %c0_212 = arith.constant 0 : index
    %204 = vector.load %arg5[%c7_210, %c0_211, %c0_212] : memref<18x8x256xf32, #tpu.memory_space<vmem>>, vector<1x8x256xf32>
    %205 = vector.shape_cast %204 : vector<1x8x256xf32> to vector<8x256xf32>
    %206 = arith.mulf %203, %205 : vector<8x256xf32>
    %c56_213 = arith.constant 56 : index
    %c0_214 = arith.constant 0 : index
    %207 = vector.load %arg11[%c56_213, %c0_214] : memref<72x256xf32, #tpu.memory_space<vmem>>, vector<8x256xf32>
    tpu.vector_store %arg11[%c56_213, %c0_214], %206 {strides = array<i32>} : memref<72x256xf32, #tpu.memory_space<vmem>>, vector<8x256xf32>,
    %c239_i32_215 = arith.constant 239 : i32
    %208 = tpu.dynamic_rotate %171 by %c239_i32_215 dim 1 : vector<8x256xf32>, i32 -> vector<8x256xf32>
    %c8_216 = arith.constant 8 : index
    %c0_217 = arith.constant 0 : index
    %c0_218 = arith.constant 0 : index
    %209 = vector.load %arg5[%c8_216, %c0_217, %c0_218] : memref<18x8x256xf32, #tpu.memory_space<vmem>>, vector<1x8x256xf32>
    %210 = vector.shape_cast %209 : vector<1x8x256xf32> to vector<8x256xf32>
    %211 = arith.mulf %208, %210 : vector<8x256xf32>
    %c64_219 = arith.constant 64 : index
    %c0_220 = arith.constant 0 : index
    %212 = vector.load %arg11[%c64_219, %c0_220] : memref<72x256xf32, #tpu.memory_space<vmem>>, vector<8x256xf32>
    tpu.vector_store %arg11[%c64_219, %c0_220], %211 {strides = array<i32>} : memref<72x256xf32, #tpu.memory_space<vmem>>, vector<8x256xf32>,
    %c3_221 = arith.constant 3 : index
    %c0_222 = arith.constant 0 : index
    %c0_223 = arith.constant 0 : index
    %213 = vector.load %arg2[%c3_221, %c0_222, %c0_223] : memref<9x8x72xf32, #tpu.memory_space<vmem>>, vector<1x8x72xf32>
    %214 = vector.shape_cast %213 : vector<1x8x72xf32> to vector<8x72xf32>
    %c0_224 = arith.constant 0 : index
    %c0_225 = arith.constant 0 : index
    %215 = vector.load %arg11[%c0_224, %c0_225] : memref<72x256xf32, #tpu.memory_space<vmem>>, vector<72x256xf32>
    %cst_226 = arith.constant dense<0.000000e+00> : vector<8x256xf32>
    %216 = tpu.matmul %214, %215, %cst_226 {dimension_numbers = #tpu.dot_dimension_numbers<[1], [0], [0], [1], [0, 0, 1, 1], [], []>} : vector<8x72xf32>, vector<72x256xf32>, vector<8x256xf32> -> vector<8x256xf32>
    %c3_227 = arith.constant 3 : index
    %c0_228 = arith.constant 0 : index
    %c0_229 = arith.constant 0 : index
    %217 = vector.load %arg4[%c3_227, %c0_228, %c0_229] : memref<14x8x1xf32, #tpu.memory_space<vmem>>, vector<1x8x1xf32>
    %218 = vector.shape_cast %217 : vector<1x8x1xf32> to vector<8x1xf32>
    %219 = vector.broadcast %218 : vector<8x1xf32> to vector<8x256xf32>
    %220 = arith.addf %216, %219 : vector<8x256xf32>
    %cst_230 = arith.constant 0.000000e+00 : f32
    %221 = vector.broadcast %cst_230 : f32 to vector<8x256xf32>
    %222 = arith.cmpf oge, %220, %221 : vector<8x256xf32>
    %cst_231 = arith.constant 2.000000e-01 : f32
    %223 = vector.broadcast %cst_231 : f32 to vector<8x256xf32>
    %224 = arith.mulf %223, %220 : vector<8x256xf32>
    %225 = arith.select %222, %220, %224 : vector<8x256xi1>, vector<8x256xf32>
    %c0_232 = arith.constant 0 : index
    %c0_233 = arith.constant 0 : index
    %c0_234 = arith.constant 0 : index
    %226 = vector.load %arg7[%c0_232, %c0_233, %c0_234] : memref<1x8x256xf32, #tpu.memory_space<vmem>>, vector<1x8x256xf32>
    %227 = vector.shape_cast %226 : vector<1x8x256xf32> to vector<8x256xf32>
    %228 = vector.shape_cast %109 : vector<8x256xf32> to vector<1x8x256xf32>
    tpu.vector_store %arg7[%c0_232, %c0_233, %c0_234], %228 {strides = array<i32>} : memref<1x8x256xf32, #tpu.memory_space<vmem>>, vector<1x8x256xf32>,
    %c0_235 = arith.constant 0 : index
    %c0_236 = arith.constant 0 : index
    %c0_237 = arith.constant 0 : index
    %229 = vector.load %arg8[%c0_235, %c0_236, %c0_237] : memref<1x8x256xf32, #tpu.memory_space<vmem>>, vector<1x8x256xf32>
    %230 = vector.shape_cast %229 : vector<1x8x256xf32> to vector<8x256xf32>
    %231 = vector.shape_cast %171 : vector<8x256xf32> to vector<1x8x256xf32>
    tpu.vector_store %arg8[%c0_235, %c0_236, %c0_237], %231 {strides = array<i32>} : memref<1x8x256xf32, #tpu.memory_space<vmem>>, vector<1x8x256xf32>,
    %c0_238 = arith.constant 0 : index
    %c0_239 = arith.constant 0 : index
    %c0_240 = arith.constant 0 : index
    %232 = vector.load %arg9[%c0_238, %c0_239, %c0_240] : memref<1x8x256xf32, #tpu.memory_space<vmem>>, vector<1x8x256xf32>
    %233 = vector.shape_cast %232 : vector<1x8x256xf32> to vector<8x256xf32>
    %234 = vector.shape_cast %225 : vector<8x256xf32> to vector<1x8x256xf32>
    tpu.vector_store %arg9[%c0_238, %c0_239, %c0_240], %234 {strides = array<i32>} : memref<1x8x256xf32, #tpu.memory_space<vmem>>, vector<1x8x256xf32>,
    %c0_241 = arith.constant 0 : index
    %c0_242 = arith.constant 0 : index
    %c0_243 = arith.constant 0 : index
    %235 = vector.load %arg10[%c0_241, %c0_242, %c0_243] : memref<1x8x256xf32, #tpu.memory_space<vmem>>, vector<1x8x256xf32>
    %236 = vector.shape_cast %235 : vector<1x8x256xf32> to vector<8x256xf32>
    %237 = vector.shape_cast %117 : vector<8x256xf32> to vector<1x8x256xf32>
    tpu.vector_store %arg10[%c0_241, %c0_242, %c0_243], %237 {strides = array<i32>} : memref<1x8x256xf32, #tpu.memory_space<vmem>>, vector<1x8x256xf32>,
    %c0_244 = arith.constant 0 : index
    %c0_245 = arith.constant 0 : index
    %238 = vector.load %arg11[%c0_244, %c0_245] : memref<72x256xf32, #tpu.memory_space<vmem>>, vector<8x256xf32>
    tpu.vector_store %arg11[%c0_244, %c0_245], %109 {strides = array<i32>} : memref<72x256xf32, #tpu.memory_space<vmem>>, vector<8x256xf32>,
    %c8_246 = arith.constant 8 : index
    %c0_247 = arith.constant 0 : index
    %239 = vector.load %arg11[%c8_246, %c0_247] : memref<72x256xf32, #tpu.memory_space<vmem>>, vector<8x256xf32>
    tpu.vector_store %arg11[%c8_246, %c0_247], %171 {strides = array<i32>} : memref<72x256xf32, #tpu.memory_space<vmem>>, vector<8x256xf32>,
    %c16_248 = arith.constant 16 : index
    %c0_249 = arith.constant 0 : index
    %240 = vector.load %arg11[%c16_248, %c0_249] : memref<72x256xf32, #tpu.memory_space<vmem>>, vector<8x256xf32>
    tpu.vector_store %arg11[%c16_248, %c0_249], %225 {strides = array<i32>} : memref<72x256xf32, #tpu.memory_space<vmem>>, vector<8x256xf32>,
    %c24_250 = arith.constant 24 : index
    %c0_251 = arith.constant 0 : index
    %241 = vector.load %arg11[%c24_250, %c0_251] : memref<72x256xf32, #tpu.memory_space<vmem>>, vector<8x256xf32>
    tpu.vector_store %arg11[%c24_250, %c0_251], %117 {strides = array<i32>} : memref<72x256xf32, #tpu.memory_space<vmem>>, vector<8x256xf32>,
    %c0_252 = arith.constant 0 : index
    %c0_253 = arith.constant 0 : index
    %c0_254 = arith.constant 0 : index
    %242 = vector.load %arg3[%c0_252, %c0_253, %c0_254] : memref<5x8x32xf32, #tpu.memory_space<vmem>>, vector<1x8x32xf32>
    %243 = vector.shape_cast %242 : vector<1x8x32xf32> to vector<8x32xf32>
    %c0_255 = arith.constant 0 : index
    %c0_256 = arith.constant 0 : index
    %244 = vector.load %arg11[%c0_255, %c0_256] : memref<72x256xf32, #tpu.memory_space<vmem>>, vector<32x256xf32>
    %cst_257 = arith.constant dense<0.000000e+00> : vector<8x256xf32>
    %245 = tpu.matmul %243, %244, %cst_257 {dimension_numbers = #tpu.dot_dimension_numbers<[1], [0], [0], [1], [0, 0, 1, 1], [], []>} : vector<8x32xf32>, vector<32x256xf32>, vector<8x256xf32> -> vector<8x256xf32>
    %c9 = arith.constant 9 : index
    %c0_258 = arith.constant 0 : index
    %c0_259 = arith.constant 0 : index
    %246 = vector.load %arg4[%c9, %c0_258, %c0_259] : memref<14x8x1xf32, #tpu.memory_space<vmem>>, vector<1x8x1xf32>
    %247 = vector.shape_cast %246 : vector<1x8x1xf32> to vector<8x1xf32>
    %248 = vector.broadcast %247 : vector<8x1xf32> to vector<8x256xf32>
    %249 = arith.addf %245, %248 : vector<8x256xf32>
    %cst_260 = arith.constant 0.000000e+00 : f32
    %250 = vector.broadcast %cst_260 : f32 to vector<8x256xf32>
    %251 = arith.cmpf oge, %249, %250 : vector<8x256xf32>
    %cst_261 = arith.constant 2.000000e-01 : f32
    %252 = vector.broadcast %cst_261 : f32 to vector<8x256xf32>
    %253 = arith.mulf %252, %249 : vector<8x256xf32>
    %254 = arith.select %251, %249, %253 : vector<8x256xi1>, vector<8x256xf32>
    %255 = arith.addf %254, %55 : vector<8x256xf32>
    %c0_262 = arith.constant 0 : index
    %c0_263 = arith.constant 0 : index
    %256 = vector.load %arg11[%c0_262, %c0_263] : memref<72x256xf32, #tpu.memory_space<vmem>>, vector<8x256xf32>
    tpu.vector_store %arg11[%c0_262, %c0_263], %55 {strides = array<i32>} : memref<72x256xf32, #tpu.memory_space<vmem>>, vector<8x256xf32>,
    %c8_264 = arith.constant 8 : index
    %c0_265 = arith.constant 0 : index
    %257 = vector.load %arg11[%c8_264, %c0_265] : memref<72x256xf32, #tpu.memory_space<vmem>>, vector<8x256xf32>
    tpu.vector_store %arg11[%c8_264, %c0_265], %255 {strides = array<i32>} : memref<72x256xf32, #tpu.memory_space<vmem>>, vector<8x256xf32>,
    %c1_266 = arith.constant 1 : index
    %c0_267 = arith.constant 0 : index
    %c0_268 = arith.constant 0 : index
    %258 = vector.load %arg3[%c1_266, %c0_267, %c0_268] : memref<5x8x32xf32, #tpu.memory_space<vmem>>, vector<1x8x32xf32>
    %259 = vector.shape_cast %258 : vector<1x8x32xf32> to vector<8x32xf32>
    %260 = vector.extract_strided_slice %259 {offsets = [0, 0], sizes = [8, 16], strides = [1, 1]} : vector<8x32xf32> to vector<8x16xf32>
    %c0_269 = arith.constant 0 : index
    %c0_270 = arith.constant 0 : index
    %261 = vector.load %arg11[%c0_269, %c0_270] : memref<72x256xf32, #tpu.memory_space<vmem>>, vector<16x256xf32>
    %cst_271 = arith.constant dense<0.000000e+00> : vector<8x256xf32>
    %262 = tpu.matmul %260, %261, %cst_271 {dimension_numbers = #tpu.dot_dimension_numbers<[1], [0], [0], [1], [0, 0, 1, 1], [], []>} : vector<8x16xf32>, vector<16x256xf32>, vector<8x256xf32> -> vector<8x256xf32>
    %c10 = arith.constant 10 : index
    %c0_272 = arith.constant 0 : index
    %c0_273 = arith.constant 0 : index
    %263 = vector.load %arg4[%c10, %c0_272, %c0_273] : memref<14x8x1xf32, #tpu.memory_space<vmem>>, vector<1x8x1xf32>
    %264 = vector.shape_cast %263 : vector<1x8x1xf32> to vector<8x1xf32>
    %265 = vector.broadcast %264 : vector<8x1xf32> to vector<8x256xf32>
    %266 = arith.addf %262, %265 : vector<8x256xf32>
    %c34_i32 = arith.constant 34 : i32
    %267 = tpu.dynamic_rotate %266 by %c34_i32 dim 1 : vector<8x256xf32>, i32 -> vector<8x256xf32>
    %c9_274 = arith.constant 9 : index
    %c0_275 = arith.constant 0 : index
    %c0_276 = arith.constant 0 : index
    %268 = vector.load %arg5[%c9_274, %c0_275, %c0_276] : memref<18x8x256xf32, #tpu.memory_space<vmem>>, vector<1x8x256xf32>
    %269 = vector.shape_cast %268 : vector<1x8x256xf32> to vector<8x256xf32>
    %270 = arith.mulf %267, %269 : vector<8x256xf32>
    %c0_277 = arith.constant 0 : index
    %c0_278 = arith.constant 0 : index
    %271 = vector.load %arg11[%c0_277, %c0_278] : memref<72x256xf32, #tpu.memory_space<vmem>>, vector<8x256xf32>
    tpu.vector_store %arg11[%c0_277, %c0_278], %270 {strides = array<i32>} : memref<72x256xf32, #tpu.memory_space<vmem>>, vector<8x256xf32>,
    %c32_i32 = arith.constant 32 : i32
    %272 = tpu.dynamic_rotate %266 by %c32_i32 dim 1 : vector<8x256xf32>, i32 -> vector<8x256xf32>
    %c10_279 = arith.constant 10 : index
    %c0_280 = arith.constant 0 : index
    %c0_281 = arith.constant 0 : index
    %273 = vector.load %arg5[%c10_279, %c0_280, %c0_281] : memref<18x8x256xf32, #tpu.memory_space<vmem>>, vector<1x8x256xf32>
    %274 = vector.shape_cast %273 : vector<1x8x256xf32> to vector<8x256xf32>
    %275 = arith.mulf %272, %274 : vector<8x256xf32>
    %c8_282 = arith.constant 8 : index
    %c0_283 = arith.constant 0 : index
    %276 = vector.load %arg11[%c8_282, %c0_283] : memref<72x256xf32, #tpu.memory_space<vmem>>, vector<8x256xf32>
    tpu.vector_store %arg11[%c8_282, %c0_283], %275 {strides = array<i32>} : memref<72x256xf32, #tpu.memory_space<vmem>>, vector<8x256xf32>,
    %c30_i32 = arith.constant 30 : i32
    %277 = tpu.dynamic_rotate %266 by %c30_i32 dim 1 : vector<8x256xf32>, i32 -> vector<8x256xf32>
    %c11 = arith.constant 11 : index
    %c0_284 = arith.constant 0 : index
    %c0_285 = arith.constant 0 : index
    %278 = vector.load %arg5[%c11, %c0_284, %c0_285] : memref<18x8x256xf32, #tpu.memory_space<vmem>>, vector<1x8x256xf32>
    %279 = vector.shape_cast %278 : vector<1x8x256xf32> to vector<8x256xf32>
    %280 = arith.mulf %277, %279 : vector<8x256xf32>
    %c16_286 = arith.constant 16 : index
    %c0_287 = arith.constant 0 : index
    %281 = vector.load %arg11[%c16_286, %c0_287] : memref<72x256xf32, #tpu.memory_space<vmem>>, vector<8x256xf32>
    tpu.vector_store %arg11[%c16_286, %c0_287], %280 {strides = array<i32>} : memref<72x256xf32, #tpu.memory_space<vmem>>, vector<8x256xf32>,
    %c2_i32 = arith.constant 2 : i32
    %282 = tpu.dynamic_rotate %266 by %c2_i32 dim 1 : vector<8x256xf32>, i32 -> vector<8x256xf32>
    %c12 = arith.constant 12 : index
    %c0_288 = arith.constant 0 : index
    %c0_289 = arith.constant 0 : index
    %283 = vector.load %arg5[%c12, %c0_288, %c0_289] : memref<18x8x256xf32, #tpu.memory_space<vmem>>, vector<1x8x256xf32>
    %284 = vector.shape_cast %283 : vector<1x8x256xf32> to vector<8x256xf32>
    %285 = arith.mulf %282, %284 : vector<8x256xf32>
    %c24_290 = arith.constant 24 : index
    %c0_291 = arith.constant 0 : index
    %286 = vector.load %arg11[%c24_290, %c0_291] : memref<72x256xf32, #tpu.memory_space<vmem>>, vector<8x256xf32>
    tpu.vector_store %arg11[%c24_290, %c0_291], %285 {strides = array<i32>} : memref<72x256xf32, #tpu.memory_space<vmem>>, vector<8x256xf32>,
    %c32_292 = arith.constant 32 : index
    %c0_293 = arith.constant 0 : index
    %287 = vector.load %arg11[%c32_292, %c0_293] : memref<72x256xf32, #tpu.memory_space<vmem>>, vector<8x256xf32>
    tpu.vector_store %arg11[%c32_292, %c0_293], %266 {strides = array<i32>} : memref<72x256xf32, #tpu.memory_space<vmem>>, vector<8x256xf32>,
    %c254_i32 = arith.constant 254 : i32
    %288 = tpu.dynamic_rotate %266 by %c254_i32 dim 1 : vector<8x256xf32>, i32 -> vector<8x256xf32>
    %c14 = arith.constant 14 : index
    %c0_294 = arith.constant 0 : index
    %c0_295 = arith.constant 0 : index
    %289 = vector.load %arg5[%c14, %c0_294, %c0_295] : memref<18x8x256xf32, #tpu.memory_space<vmem>>, vector<1x8x256xf32>
    %290 = vector.shape_cast %289 : vector<1x8x256xf32> to vector<8x256xf32>
    %291 = arith.mulf %288, %290 : vector<8x256xf32>
    %c40_296 = arith.constant 40 : index
    %c0_297 = arith.constant 0 : index
    %292 = vector.load %arg11[%c40_296, %c0_297] : memref<72x256xf32, #tpu.memory_space<vmem>>, vector<8x256xf32>
    tpu.vector_store %arg11[%c40_296, %c0_297], %291 {strides = array<i32>} : memref<72x256xf32, #tpu.memory_space<vmem>>, vector<8x256xf32>,
    %c226_i32 = arith.constant 226 : i32
    %293 = tpu.dynamic_rotate %266 by %c226_i32 dim 1 : vector<8x256xf32>, i32 -> vector<8x256xf32>
    %c15 = arith.constant 15 : index
    %c0_298 = arith.constant 0 : index
    %c0_299 = arith.constant 0 : index
    %294 = vector.load %arg5[%c15, %c0_298, %c0_299] : memref<18x8x256xf32, #tpu.memory_space<vmem>>, vector<1x8x256xf32>
    %295 = vector.shape_cast %294 : vector<1x8x256xf32> to vector<8x256xf32>
    %296 = arith.mulf %293, %295 : vector<8x256xf32>
    %c48_300 = arith.constant 48 : index
    %c0_301 = arith.constant 0 : index
    %297 = vector.load %arg11[%c48_300, %c0_301] : memref<72x256xf32, #tpu.memory_space<vmem>>, vector<8x256xf32>
    tpu.vector_store %arg11[%c48_300, %c0_301], %296 {strides = array<i32>} : memref<72x256xf32, #tpu.memory_space<vmem>>, vector<8x256xf32>,
    %c224_i32 = arith.constant 224 : i32
    %298 = tpu.dynamic_rotate %266 by %c224_i32 dim 1 : vector<8x256xf32>, i32 -> vector<8x256xf32>
    %c16_302 = arith.constant 16 : index
    %c0_303 = arith.constant 0 : index
    %c0_304 = arith.constant 0 : index
    %299 = vector.load %arg5[%c16_302, %c0_303, %c0_304] : memref<18x8x256xf32, #tpu.memory_space<vmem>>, vector<1x8x256xf32>
    %300 = vector.shape_cast %299 : vector<1x8x256xf32> to vector<8x256xf32>
    %301 = arith.mulf %298, %300 : vector<8x256xf32>
    %c56_305 = arith.constant 56 : index
    %c0_306 = arith.constant 0 : index
    %302 = vector.load %arg11[%c56_305, %c0_306] : memref<72x256xf32, #tpu.memory_space<vmem>>, vector<8x256xf32>
    tpu.vector_store %arg11[%c56_305, %c0_306], %301 {strides = array<i32>} : memref<72x256xf32, #tpu.memory_space<vmem>>, vector<8x256xf32>,
    %c222_i32 = arith.constant 222 : i32
    %303 = tpu.dynamic_rotate %266 by %c222_i32 dim 1 : vector<8x256xf32>, i32 -> vector<8x256xf32>
    %c17 = arith.constant 17 : index
    %c0_307 = arith.constant 0 : index
    %c0_308 = arith.constant 0 : index
    %304 = vector.load %arg5[%c17, %c0_307, %c0_308] : memref<18x8x256xf32, #tpu.memory_space<vmem>>, vector<1x8x256xf32>
    %305 = vector.shape_cast %304 : vector<1x8x256xf32> to vector<8x256xf32>
    %306 = arith.mulf %303, %305 : vector<8x256xf32>
    %c64_309 = arith.constant 64 : index
    %c0_310 = arith.constant 0 : index
    %307 = vector.load %arg11[%c64_309, %c0_310] : memref<72x256xf32, #tpu.memory_space<vmem>>, vector<8x256xf32>
    tpu.vector_store %arg11[%c64_309, %c0_310], %306 {strides = array<i32>} : memref<72x256xf32, #tpu.memory_space<vmem>>, vector<8x256xf32>,
    %c4 = arith.constant 4 : index
    %c0_311 = arith.constant 0 : index
    %c0_312 = arith.constant 0 : index
    %308 = vector.load %arg2[%c4, %c0_311, %c0_312] : memref<9x8x72xf32, #tpu.memory_space<vmem>>, vector<1x8x72xf32>
    %309 = vector.shape_cast %308 : vector<1x8x72xf32> to vector<8x72xf32>
    %c0_313 = arith.constant 0 : index
    %c0_314 = arith.constant 0 : index
    %310 = vector.load %arg11[%c0_313, %c0_314] : memref<72x256xf32, #tpu.memory_space<vmem>>, vector<72x256xf32>
    %cst_315 = arith.constant dense<0.000000e+00> : vector<8x256xf32>
    %311 = tpu.matmul %309, %310, %cst_315 {dimension_numbers = #tpu.dot_dimension_numbers<[1], [0], [0], [1], [0, 0, 1, 1], [], []>} : vector<8x72xf32>, vector<72x256xf32>, vector<8x256xf32> -> vector<8x256xf32>
    %c4_316 = arith.constant 4 : index
    %c0_317 = arith.constant 0 : index
    %c0_318 = arith.constant 0 : index
    %312 = vector.load %arg4[%c4_316, %c0_317, %c0_318] : memref<14x8x1xf32, #tpu.memory_space<vmem>>, vector<1x8x1xf32>
    %313 = vector.shape_cast %312 : vector<1x8x1xf32> to vector<8x1xf32>
    %314 = vector.broadcast %313 : vector<8x1xf32> to vector<8x256xf32>
    %315 = arith.addf %311, %314 : vector<8x256xf32>
    %cst_319 = arith.constant 0.000000e+00 : f32
    %316 = vector.broadcast %cst_319 : f32 to vector<8x256xf32>
    %317 = arith.cmpf oge, %315, %316 : vector<8x256xf32>
    %cst_320 = arith.constant 2.000000e-01 : f32
    %318 = vector.broadcast %cst_320 : f32 to vector<8x256xf32>
    %319 = arith.mulf %318, %315 : vector<8x256xf32>
    %320 = arith.select %317, %315, %319 : vector<8x256xi1>, vector<8x256xf32>
    %c34_i32_321 = arith.constant 34 : i32
    %321 = tpu.dynamic_rotate %320 by %c34_i32_321 dim 1 : vector<8x256xf32>, i32 -> vector<8x256xf32>
    %c9_322 = arith.constant 9 : index
    %c0_323 = arith.constant 0 : index
    %c0_324 = arith.constant 0 : index
    %322 = vector.load %arg5[%c9_322, %c0_323, %c0_324] : memref<18x8x256xf32, #tpu.memory_space<vmem>>, vector<1x8x256xf32>
    %323 = vector.shape_cast %322 : vector<1x8x256xf32> to vector<8x256xf32>
    %324 = arith.mulf %321, %323 : vector<8x256xf32>
    %c0_325 = arith.constant 0 : index
    %c0_326 = arith.constant 0 : index
    %325 = vector.load %arg11[%c0_325, %c0_326] : memref<72x256xf32, #tpu.memory_space<vmem>>, vector<8x256xf32>
    tpu.vector_store %arg11[%c0_325, %c0_326], %324 {strides = array<i32>} : memref<72x256xf32, #tpu.memory_space<vmem>>, vector<8x256xf32>,
    %c32_i32_327 = arith.constant 32 : i32
    %326 = tpu.dynamic_rotate %320 by %c32_i32_327 dim 1 : vector<8x256xf32>, i32 -> vector<8x256xf32>
    %c10_328 = arith.constant 10 : index
    %c0_329 = arith.constant 0 : index
    %c0_330 = arith.constant 0 : index
    %327 = vector.load %arg5[%c10_328, %c0_329, %c0_330] : memref<18x8x256xf32, #tpu.memory_space<vmem>>, vector<1x8x256xf32>
    %328 = vector.shape_cast %327 : vector<1x8x256xf32> to vector<8x256xf32>
    %329 = arith.mulf %326, %328 : vector<8x256xf32>
    %c8_331 = arith.constant 8 : index
    %c0_332 = arith.constant 0 : index
    %330 = vector.load %arg11[%c8_331, %c0_332] : memref<72x256xf32, #tpu.memory_space<vmem>>, vector<8x256xf32>
    tpu.vector_store %arg11[%c8_331, %c0_332], %329 {strides = array<i32>} : memref<72x256xf32, #tpu.memory_space<vmem>>, vector<8x256xf32>,
    %c30_i32_333 = arith.constant 30 : i32
    %331 = tpu.dynamic_rotate %320 by %c30_i32_333 dim 1 : vector<8x256xf32>, i32 -> vector<8x256xf32>
    %c11_334 = arith.constant 11 : index
    %c0_335 = arith.constant 0 : index
    %c0_336 = arith.constant 0 : index
    %332 = vector.load %arg5[%c11_334, %c0_335, %c0_336] : memref<18x8x256xf32, #tpu.memory_space<vmem>>, vector<1x8x256xf32>
    %333 = vector.shape_cast %332 : vector<1x8x256xf32> to vector<8x256xf32>
    %334 = arith.mulf %331, %333 : vector<8x256xf32>
    %c16_337 = arith.constant 16 : index
    %c0_338 = arith.constant 0 : index
    %335 = vector.load %arg11[%c16_337, %c0_338] : memref<72x256xf32, #tpu.memory_space<vmem>>, vector<8x256xf32>
    tpu.vector_store %arg11[%c16_337, %c0_338], %334 {strides = array<i32>} : memref<72x256xf32, #tpu.memory_space<vmem>>, vector<8x256xf32>,
    %c2_i32_339 = arith.constant 2 : i32
    %336 = tpu.dynamic_rotate %320 by %c2_i32_339 dim 1 : vector<8x256xf32>, i32 -> vector<8x256xf32>
    %c12_340 = arith.constant 12 : index
    %c0_341 = arith.constant 0 : index
    %c0_342 = arith.constant 0 : index
    %337 = vector.load %arg5[%c12_340, %c0_341, %c0_342] : memref<18x8x256xf32, #tpu.memory_space<vmem>>, vector<1x8x256xf32>
    %338 = vector.shape_cast %337 : vector<1x8x256xf32> to vector<8x256xf32>
    %339 = arith.mulf %336, %338 : vector<8x256xf32>
    %c24_343 = arith.constant 24 : index
    %c0_344 = arith.constant 0 : index
    %340 = vector.load %arg11[%c24_343, %c0_344] : memref<72x256xf32, #tpu.memory_space<vmem>>, vector<8x256xf32>
    tpu.vector_store %arg11[%c24_343, %c0_344], %339 {strides = array<i32>} : memref<72x256xf32, #tpu.memory_space<vmem>>, vector<8x256xf32>,
    %c32_345 = arith.constant 32 : index
    %c0_346 = arith.constant 0 : index
    %341 = vector.load %arg11[%c32_345, %c0_346] : memref<72x256xf32, #tpu.memory_space<vmem>>, vector<8x256xf32>
    tpu.vector_store %arg11[%c32_345, %c0_346], %320 {strides = array<i32>} : memref<72x256xf32, #tpu.memory_space<vmem>>, vector<8x256xf32>,
    %c254_i32_347 = arith.constant 254 : i32
    %342 = tpu.dynamic_rotate %320 by %c254_i32_347 dim 1 : vector<8x256xf32>, i32 -> vector<8x256xf32>
    %c14_348 = arith.constant 14 : index
    %c0_349 = arith.constant 0 : index
    %c0_350 = arith.constant 0 : index
    %343 = vector.load %arg5[%c14_348, %c0_349, %c0_350] : memref<18x8x256xf32, #tpu.memory_space<vmem>>, vector<1x8x256xf32>
    %344 = vector.shape_cast %343 : vector<1x8x256xf32> to vector<8x256xf32>
    %345 = arith.mulf %342, %344 : vector<8x256xf32>
    %c40_351 = arith.constant 40 : index
    %c0_352 = arith.constant 0 : index
    %346 = vector.load %arg11[%c40_351, %c0_352] : memref<72x256xf32, #tpu.memory_space<vmem>>, vector<8x256xf32>
    tpu.vector_store %arg11[%c40_351, %c0_352], %345 {strides = array<i32>} : memref<72x256xf32, #tpu.memory_space<vmem>>, vector<8x256xf32>,
    %c226_i32_353 = arith.constant 226 : i32
    %347 = tpu.dynamic_rotate %320 by %c226_i32_353 dim 1 : vector<8x256xf32>, i32 -> vector<8x256xf32>
    %c15_354 = arith.constant 15 : index
    %c0_355 = arith.constant 0 : index
    %c0_356 = arith.constant 0 : index
    %348 = vector.load %arg5[%c15_354, %c0_355, %c0_356] : memref<18x8x256xf32, #tpu.memory_space<vmem>>, vector<1x8x256xf32>
    %349 = vector.shape_cast %348 : vector<1x8x256xf32> to vector<8x256xf32>
    %350 = arith.mulf %347, %349 : vector<8x256xf32>
    %c48_357 = arith.constant 48 : index
    %c0_358 = arith.constant 0 : index
    %351 = vector.load %arg11[%c48_357, %c0_358] : memref<72x256xf32, #tpu.memory_space<vmem>>, vector<8x256xf32>
    tpu.vector_store %arg11[%c48_357, %c0_358], %350 {strides = array<i32>} : memref<72x256xf32, #tpu.memory_space<vmem>>, vector<8x256xf32>,
    %c224_i32_359 = arith.constant 224 : i32
    %352 = tpu.dynamic_rotate %320 by %c224_i32_359 dim 1 : vector<8x256xf32>, i32 -> vector<8x256xf32>
    %c16_360 = arith.constant 16 : index
    %c0_361 = arith.constant 0 : index
    %c0_362 = arith.constant 0 : index
    %353 = vector.load %arg5[%c16_360, %c0_361, %c0_362] : memref<18x8x256xf32, #tpu.memory_space<vmem>>, vector<1x8x256xf32>
    %354 = vector.shape_cast %353 : vector<1x8x256xf32> to vector<8x256xf32>
    %355 = arith.mulf %352, %354 : vector<8x256xf32>
    %c56_363 = arith.constant 56 : index
    %c0_364 = arith.constant 0 : index
    %356 = vector.load %arg11[%c56_363, %c0_364] : memref<72x256xf32, #tpu.memory_space<vmem>>, vector<8x256xf32>
    tpu.vector_store %arg11[%c56_363, %c0_364], %355 {strides = array<i32>} : memref<72x256xf32, #tpu.memory_space<vmem>>, vector<8x256xf32>,
    %c222_i32_365 = arith.constant 222 : i32
    %357 = tpu.dynamic_rotate %320 by %c222_i32_365 dim 1 : vector<8x256xf32>, i32 -> vector<8x256xf32>
    %c17_366 = arith.constant 17 : index
    %c0_367 = arith.constant 0 : index
    %c0_368 = arith.constant 0 : index
    %358 = vector.load %arg5[%c17_366, %c0_367, %c0_368] : memref<18x8x256xf32, #tpu.memory_space<vmem>>, vector<1x8x256xf32>
    %359 = vector.shape_cast %358 : vector<1x8x256xf32> to vector<8x256xf32>
    %360 = arith.mulf %357, %359 : vector<8x256xf32>
    %c64_369 = arith.constant 64 : index
    %c0_370 = arith.constant 0 : index
    %361 = vector.load %arg11[%c64_369, %c0_370] : memref<72x256xf32, #tpu.memory_space<vmem>>, vector<8x256xf32>
    tpu.vector_store %arg11[%c64_369, %c0_370], %360 {strides = array<i32>} : memref<72x256xf32, #tpu.memory_space<vmem>>, vector<8x256xf32>,
    %c5_371 = arith.constant 5 : index
    %c0_372 = arith.constant 0 : index
    %c0_373 = arith.constant 0 : index
    %362 = vector.load %arg2[%c5_371, %c0_372, %c0_373] : memref<9x8x72xf32, #tpu.memory_space<vmem>>, vector<1x8x72xf32>
    %363 = vector.shape_cast %362 : vector<1x8x72xf32> to vector<8x72xf32>
    %c0_374 = arith.constant 0 : index
    %c0_375 = arith.constant 0 : index
    %364 = vector.load %arg11[%c0_374, %c0_375] : memref<72x256xf32, #tpu.memory_space<vmem>>, vector<72x256xf32>
    %cst_376 = arith.constant dense<0.000000e+00> : vector<8x256xf32>
    %365 = tpu.matmul %363, %364, %cst_376 {dimension_numbers = #tpu.dot_dimension_numbers<[1], [0], [0], [1], [0, 0, 1, 1], [], []>} : vector<8x72xf32>, vector<72x256xf32>, vector<8x256xf32> -> vector<8x256xf32>
    %c5_377 = arith.constant 5 : index
    %c0_378 = arith.constant 0 : index
    %c0_379 = arith.constant 0 : index
    %366 = vector.load %arg4[%c5_377, %c0_378, %c0_379] : memref<14x8x1xf32, #tpu.memory_space<vmem>>, vector<1x8x1xf32>
    %367 = vector.shape_cast %366 : vector<1x8x1xf32> to vector<8x1xf32>
    %368 = vector.broadcast %367 : vector<8x1xf32> to vector<8x256xf32>
    %369 = arith.addf %365, %368 : vector<8x256xf32>
    %cst_380 = arith.constant 0.000000e+00 : f32
    %370 = vector.broadcast %cst_380 : f32 to vector<8x256xf32>
    %371 = arith.cmpf oge, %369, %370 : vector<8x256xf32>
    %cst_381 = arith.constant 2.000000e-01 : f32
    %372 = vector.broadcast %cst_381 : f32 to vector<8x256xf32>
    %373 = arith.mulf %372, %369 : vector<8x256xf32>
    %374 = arith.select %371, %369, %373 : vector<8x256xi1>, vector<8x256xf32>
    %c34_i32_382 = arith.constant 34 : i32
    %375 = tpu.dynamic_rotate %374 by %c34_i32_382 dim 1 : vector<8x256xf32>, i32 -> vector<8x256xf32>
    %c9_383 = arith.constant 9 : index
    %c0_384 = arith.constant 0 : index
    %c0_385 = arith.constant 0 : index
    %376 = vector.load %arg5[%c9_383, %c0_384, %c0_385] : memref<18x8x256xf32, #tpu.memory_space<vmem>>, vector<1x8x256xf32>
    %377 = vector.shape_cast %376 : vector<1x8x256xf32> to vector<8x256xf32>
    %378 = arith.mulf %375, %377 : vector<8x256xf32>
    %c0_386 = arith.constant 0 : index
    %c0_387 = arith.constant 0 : index
    %379 = vector.load %arg11[%c0_386, %c0_387] : memref<72x256xf32, #tpu.memory_space<vmem>>, vector<8x256xf32>
    tpu.vector_store %arg11[%c0_386, %c0_387], %378 {strides = array<i32>} : memref<72x256xf32, #tpu.memory_space<vmem>>, vector<8x256xf32>,
    %c32_i32_388 = arith.constant 32 : i32
    %380 = tpu.dynamic_rotate %374 by %c32_i32_388 dim 1 : vector<8x256xf32>, i32 -> vector<8x256xf32>
    %c10_389 = arith.constant 10 : index
    %c0_390 = arith.constant 0 : index
    %c0_391 = arith.constant 0 : index
    %381 = vector.load %arg5[%c10_389, %c0_390, %c0_391] : memref<18x8x256xf32, #tpu.memory_space<vmem>>, vector<1x8x256xf32>
    %382 = vector.shape_cast %381 : vector<1x8x256xf32> to vector<8x256xf32>
    %383 = arith.mulf %380, %382 : vector<8x256xf32>
    %c8_392 = arith.constant 8 : index
    %c0_393 = arith.constant 0 : index
    %384 = vector.load %arg11[%c8_392, %c0_393] : memref<72x256xf32, #tpu.memory_space<vmem>>, vector<8x256xf32>
    tpu.vector_store %arg11[%c8_392, %c0_393], %383 {strides = array<i32>} : memref<72x256xf32, #tpu.memory_space<vmem>>, vector<8x256xf32>,
    %c30_i32_394 = arith.constant 30 : i32
    %385 = tpu.dynamic_rotate %374 by %c30_i32_394 dim 1 : vector<8x256xf32>, i32 -> vector<8x256xf32>
    %c11_395 = arith.constant 11 : index
    %c0_396 = arith.constant 0 : index
    %c0_397 = arith.constant 0 : index
    %386 = vector.load %arg5[%c11_395, %c0_396, %c0_397] : memref<18x8x256xf32, #tpu.memory_space<vmem>>, vector<1x8x256xf32>
    %387 = vector.shape_cast %386 : vector<1x8x256xf32> to vector<8x256xf32>
    %388 = arith.mulf %385, %387 : vector<8x256xf32>
    %c16_398 = arith.constant 16 : index
    %c0_399 = arith.constant 0 : index
    %389 = vector.load %arg11[%c16_398, %c0_399] : memref<72x256xf32, #tpu.memory_space<vmem>>, vector<8x256xf32>
    tpu.vector_store %arg11[%c16_398, %c0_399], %388 {strides = array<i32>} : memref<72x256xf32, #tpu.memory_space<vmem>>, vector<8x256xf32>,
    %c2_i32_400 = arith.constant 2 : i32
    %390 = tpu.dynamic_rotate %374 by %c2_i32_400 dim 1 : vector<8x256xf32>, i32 -> vector<8x256xf32>
    %c12_401 = arith.constant 12 : index
    %c0_402 = arith.constant 0 : index
    %c0_403 = arith.constant 0 : index
    %391 = vector.load %arg5[%c12_401, %c0_402, %c0_403] : memref<18x8x256xf32, #tpu.memory_space<vmem>>, vector<1x8x256xf32>
    %392 = vector.shape_cast %391 : vector<1x8x256xf32> to vector<8x256xf32>
    %393 = arith.mulf %390, %392 : vector<8x256xf32>
    %c24_404 = arith.constant 24 : index
    %c0_405 = arith.constant 0 : index
    %394 = vector.load %arg11[%c24_404, %c0_405] : memref<72x256xf32, #tpu.memory_space<vmem>>, vector<8x256xf32>
    tpu.vector_store %arg11[%c24_404, %c0_405], %393 {strides = array<i32>} : memref<72x256xf32, #tpu.memory_space<vmem>>, vector<8x256xf32>,
    %c32_406 = arith.constant 32 : index
    %c0_407 = arith.constant 0 : index
    %395 = vector.load %arg11[%c32_406, %c0_407] : memref<72x256xf32, #tpu.memory_space<vmem>>, vector<8x256xf32>
    tpu.vector_store %arg11[%c32_406, %c0_407], %374 {strides = array<i32>} : memref<72x256xf32, #tpu.memory_space<vmem>>, vector<8x256xf32>,
    %c254_i32_408 = arith.constant 254 : i32
    %396 = tpu.dynamic_rotate %374 by %c254_i32_408 dim 1 : vector<8x256xf32>, i32 -> vector<8x256xf32>
    %c14_409 = arith.constant 14 : index
    %c0_410 = arith.constant 0 : index
    %c0_411 = arith.constant 0 : index
    %397 = vector.load %arg5[%c14_409, %c0_410, %c0_411] : memref<18x8x256xf32, #tpu.memory_space<vmem>>, vector<1x8x256xf32>
    %398 = vector.shape_cast %397 : vector<1x8x256xf32> to vector<8x256xf32>
    %399 = arith.mulf %396, %398 : vector<8x256xf32>
    %c40_412 = arith.constant 40 : index
    %c0_413 = arith.constant 0 : index
    %400 = vector.load %arg11[%c40_412, %c0_413] : memref<72x256xf32, #tpu.memory_space<vmem>>, vector<8x256xf32>
    tpu.vector_store %arg11[%c40_412, %c0_413], %399 {strides = array<i32>} : memref<72x256xf32, #tpu.memory_space<vmem>>, vector<8x256xf32>,
    %c226_i32_414 = arith.constant 226 : i32
    %401 = tpu.dynamic_rotate %374 by %c226_i32_414 dim 1 : vector<8x256xf32>, i32 -> vector<8x256xf32>
    %c15_415 = arith.constant 15 : index
    %c0_416 = arith.constant 0 : index
    %c0_417 = arith.constant 0 : index
    %402 = vector.load %arg5[%c15_415, %c0_416, %c0_417] : memref<18x8x256xf32, #tpu.memory_space<vmem>>, vector<1x8x256xf32>
    %403 = vector.shape_cast %402 : vector<1x8x256xf32> to vector<8x256xf32>
    %404 = arith.mulf %401, %403 : vector<8x256xf32>
    %c48_418 = arith.constant 48 : index
    %c0_419 = arith.constant 0 : index
    %405 = vector.load %arg11[%c48_418, %c0_419] : memref<72x256xf32, #tpu.memory_space<vmem>>, vector<8x256xf32>
    tpu.vector_store %arg11[%c48_418, %c0_419], %404 {strides = array<i32>} : memref<72x256xf32, #tpu.memory_space<vmem>>, vector<8x256xf32>,
    %c224_i32_420 = arith.constant 224 : i32
    %406 = tpu.dynamic_rotate %374 by %c224_i32_420 dim 1 : vector<8x256xf32>, i32 -> vector<8x256xf32>
    %c16_421 = arith.constant 16 : index
    %c0_422 = arith.constant 0 : index
    %c0_423 = arith.constant 0 : index
    %407 = vector.load %arg5[%c16_421, %c0_422, %c0_423] : memref<18x8x256xf32, #tpu.memory_space<vmem>>, vector<1x8x256xf32>
    %408 = vector.shape_cast %407 : vector<1x8x256xf32> to vector<8x256xf32>
    %409 = arith.mulf %406, %408 : vector<8x256xf32>
    %c56_424 = arith.constant 56 : index
    %c0_425 = arith.constant 0 : index
    %410 = vector.load %arg11[%c56_424, %c0_425] : memref<72x256xf32, #tpu.memory_space<vmem>>, vector<8x256xf32>
    tpu.vector_store %arg11[%c56_424, %c0_425], %409 {strides = array<i32>} : memref<72x256xf32, #tpu.memory_space<vmem>>, vector<8x256xf32>,
    %c222_i32_426 = arith.constant 222 : i32
    %411 = tpu.dynamic_rotate %374 by %c222_i32_426 dim 1 : vector<8x256xf32>, i32 -> vector<8x256xf32>
    %c17_427 = arith.constant 17 : index
    %c0_428 = arith.constant 0 : index
    %c0_429 = arith.constant 0 : index
    %412 = vector.load %arg5[%c17_427, %c0_428, %c0_429] : memref<18x8x256xf32, #tpu.memory_space<vmem>>, vector<1x8x256xf32>
    %413 = vector.shape_cast %412 : vector<1x8x256xf32> to vector<8x256xf32>
    %414 = arith.mulf %411, %413 : vector<8x256xf32>
    %c64_430 = arith.constant 64 : index
    %c0_431 = arith.constant 0 : index
    %415 = vector.load %arg11[%c64_430, %c0_431] : memref<72x256xf32, #tpu.memory_space<vmem>>, vector<8x256xf32>
    tpu.vector_store %arg11[%c64_430, %c0_431], %414 {strides = array<i32>} : memref<72x256xf32, #tpu.memory_space<vmem>>, vector<8x256xf32>,
    %c6_432 = arith.constant 6 : index
    %c0_433 = arith.constant 0 : index
    %c0_434 = arith.constant 0 : index
    %416 = vector.load %arg2[%c6_432, %c0_433, %c0_434] : memref<9x8x72xf32, #tpu.memory_space<vmem>>, vector<1x8x72xf32>
    %417 = vector.shape_cast %416 : vector<1x8x72xf32> to vector<8x72xf32>
    %c0_435 = arith.constant 0 : index
    %c0_436 = arith.constant 0 : index
    %418 = vector.load %arg11[%c0_435, %c0_436] : memref<72x256xf32, #tpu.memory_space<vmem>>, vector<72x256xf32>
    %cst_437 = arith.constant dense<0.000000e+00> : vector<8x256xf32>
    %419 = tpu.matmul %417, %418, %cst_437 {dimension_numbers = #tpu.dot_dimension_numbers<[1], [0], [0], [1], [0, 0, 1, 1], [], []>} : vector<8x72xf32>, vector<72x256xf32>, vector<8x256xf32> -> vector<8x256xf32>
    %c6_438 = arith.constant 6 : index
    %c0_439 = arith.constant 0 : index
    %c0_440 = arith.constant 0 : index
    %420 = vector.load %arg4[%c6_438, %c0_439, %c0_440] : memref<14x8x1xf32, #tpu.memory_space<vmem>>, vector<1x8x1xf32>
    %421 = vector.shape_cast %420 : vector<1x8x1xf32> to vector<8x1xf32>
    %422 = vector.broadcast %421 : vector<8x1xf32> to vector<8x256xf32>
    %423 = arith.addf %419, %422 : vector<8x256xf32>
    %cst_441 = arith.constant 0.000000e+00 : f32
    %424 = vector.broadcast %cst_441 : f32 to vector<8x256xf32>
    %425 = arith.cmpf oge, %423, %424 : vector<8x256xf32>
    %cst_442 = arith.constant 2.000000e-01 : f32
    %426 = vector.broadcast %cst_442 : f32 to vector<8x256xf32>
    %427 = arith.mulf %426, %423 : vector<8x256xf32>
    %428 = arith.select %425, %423, %427 : vector<8x256xi1>, vector<8x256xf32>
    %c17_i32_443 = arith.constant 17 : i32
    %429 = tpu.dynamic_rotate %266 by %c17_i32_443 dim 1 : vector<8x256xf32>, i32 -> vector<8x256xf32>
    %c0_444 = arith.constant 0 : index
    %c0_445 = arith.constant 0 : index
    %c0_446 = arith.constant 0 : index
    %430 = vector.load %arg5[%c0_444, %c0_445, %c0_446] : memref<18x8x256xf32, #tpu.memory_space<vmem>>, vector<1x8x256xf32>
    %431 = vector.shape_cast %430 : vector<1x8x256xf32> to vector<8x256xf32>
    %432 = arith.mulf %429, %431 : vector<8x256xf32>
    %c0_447 = arith.constant 0 : index
    %c0_448 = arith.constant 0 : index
    %433 = vector.load %arg11[%c0_447, %c0_448] : memref<72x256xf32, #tpu.memory_space<vmem>>, vector<8x256xf32>
    tpu.vector_store %arg11[%c0_447, %c0_448], %432 {strides = array<i32>} : memref<72x256xf32, #tpu.memory_space<vmem>>, vector<8x256xf32>,
    %c16_i32_449 = arith.constant 16 : i32
    %434 = tpu.dynamic_rotate %266 by %c16_i32_449 dim 1 : vector<8x256xf32>, i32 -> vector<8x256xf32>
    %c1_450 = arith.constant 1 : index
    %c0_451 = arith.constant 0 : index
    %c0_452 = arith.constant 0 : index
    %435 = vector.load %arg5[%c1_450, %c0_451, %c0_452] : memref<18x8x256xf32, #tpu.memory_space<vmem>>, vector<1x8x256xf32>
    %436 = vector.shape_cast %435 : vector<1x8x256xf32> to vector<8x256xf32>
    %437 = arith.mulf %434, %436 : vector<8x256xf32>
    %c8_453 = arith.constant 8 : index
    %c0_454 = arith.constant 0 : index
    %438 = vector.load %arg11[%c8_453, %c0_454] : memref<72x256xf32, #tpu.memory_space<vmem>>, vector<8x256xf32>
    tpu.vector_store %arg11[%c8_453, %c0_454], %437 {strides = array<i32>} : memref<72x256xf32, #tpu.memory_space<vmem>>, vector<8x256xf32>,
    %c15_i32_455 = arith.constant 15 : i32
    %439 = tpu.dynamic_rotate %266 by %c15_i32_455 dim 1 : vector<8x256xf32>, i32 -> vector<8x256xf32>
    %c2_456 = arith.constant 2 : index
    %c0_457 = arith.constant 0 : index
    %c0_458 = arith.constant 0 : index
    %440 = vector.load %arg5[%c2_456, %c0_457, %c0_458] : memref<18x8x256xf32, #tpu.memory_space<vmem>>, vector<1x8x256xf32>
    %441 = vector.shape_cast %440 : vector<1x8x256xf32> to vector<8x256xf32>
    %442 = arith.mulf %439, %441 : vector<8x256xf32>
    %c16_459 = arith.constant 16 : index
    %c0_460 = arith.constant 0 : index
    %443 = vector.load %arg11[%c16_459, %c0_460] : memref<72x256xf32, #tpu.memory_space<vmem>>, vector<8x256xf32>
    tpu.vector_store %arg11[%c16_459, %c0_460], %442 {strides = array<i32>} : memref<72x256xf32, #tpu.memory_space<vmem>>, vector<8x256xf32>,
    %c1_i32_461 = arith.constant 1 : i32
    %444 = tpu.dynamic_rotate %266 by %c1_i32_461 dim 1 : vector<8x256xf32>, i32 -> vector<8x256xf32>
    %c3_462 = arith.constant 3 : index
    %c0_463 = arith.constant 0 : index
    %c0_464 = arith.constant 0 : index
    %445 = vector.load %arg5[%c3_462, %c0_463, %c0_464] : memref<18x8x256xf32, #tpu.memory_space<vmem>>, vector<1x8x256xf32>
    %446 = vector.shape_cast %445 : vector<1x8x256xf32> to vector<8x256xf32>
    %447 = arith.mulf %444, %446 : vector<8x256xf32>
    %c24_465 = arith.constant 24 : index
    %c0_466 = arith.constant 0 : index
    %448 = vector.load %arg11[%c24_465, %c0_466] : memref<72x256xf32, #tpu.memory_space<vmem>>, vector<8x256xf32>
    tpu.vector_store %arg11[%c24_465, %c0_466], %447 {strides = array<i32>} : memref<72x256xf32, #tpu.memory_space<vmem>>, vector<8x256xf32>,
    %c32_467 = arith.constant 32 : index
    %c0_468 = arith.constant 0 : index
    %449 = vector.load %arg11[%c32_467, %c0_468] : memref<72x256xf32, #tpu.memory_space<vmem>>, vector<8x256xf32>
    tpu.vector_store %arg11[%c32_467, %c0_468], %266 {strides = array<i32>} : memref<72x256xf32, #tpu.memory_space<vmem>>, vector<8x256xf32>,
    %c255_i32_469 = arith.constant 255 : i32
    %450 = tpu.dynamic_rotate %266 by %c255_i32_469 dim 1 : vector<8x256xf32>, i32 -> vector<8x256xf32>
    %c5_470 = arith.constant 5 : index
    %c0_471 = arith.constant 0 : index
    %c0_472 = arith.constant 0 : index
    %451 = vector.load %arg5[%c5_470, %c0_471, %c0_472] : memref<18x8x256xf32, #tpu.memory_space<vmem>>, vector<1x8x256xf32>
    %452 = vector.shape_cast %451 : vector<1x8x256xf32> to vector<8x256xf32>
    %453 = arith.mulf %450, %452 : vector<8x256xf32>
    %c40_473 = arith.constant 40 : index
    %c0_474 = arith.constant 0 : index
    %454 = vector.load %arg11[%c40_473, %c0_474] : memref<72x256xf32, #tpu.memory_space<vmem>>, vector<8x256xf32>
    tpu.vector_store %arg11[%c40_473, %c0_474], %453 {strides = array<i32>} : memref<72x256xf32, #tpu.memory_space<vmem>>, vector<8x256xf32>,
    %c241_i32_475 = arith.constant 241 : i32
    %455 = tpu.dynamic_rotate %266 by %c241_i32_475 dim 1 : vector<8x256xf32>, i32 -> vector<8x256xf32>
    %c6_476 = arith.constant 6 : index
    %c0_477 = arith.constant 0 : index
    %c0_478 = arith.constant 0 : index
    %456 = vector.load %arg5[%c6_476, %c0_477, %c0_478] : memref<18x8x256xf32, #tpu.memory_space<vmem>>, vector<1x8x256xf32>
    %457 = vector.shape_cast %456 : vector<1x8x256xf32> to vector<8x256xf32>
    %458 = arith.mulf %455, %457 : vector<8x256xf32>
    %c48_479 = arith.constant 48 : index
    %c0_480 = arith.constant 0 : index
    %459 = vector.load %arg11[%c48_479, %c0_480] : memref<72x256xf32, #tpu.memory_space<vmem>>, vector<8x256xf32>
    tpu.vector_store %arg11[%c48_479, %c0_480], %458 {strides = array<i32>} : memref<72x256xf32, #tpu.memory_space<vmem>>, vector<8x256xf32>,
    %c240_i32_481 = arith.constant 240 : i32
    %460 = tpu.dynamic_rotate %266 by %c240_i32_481 dim 1 : vector<8x256xf32>, i32 -> vector<8x256xf32>
    %c7_482 = arith.constant 7 : index
    %c0_483 = arith.constant 0 : index
    %c0_484 = arith.constant 0 : index
    %461 = vector.load %arg5[%c7_482, %c0_483, %c0_484] : memref<18x8x256xf32, #tpu.memory_space<vmem>>, vector<1x8x256xf32>
    %462 = vector.shape_cast %461 : vector<1x8x256xf32> to vector<8x256xf32>
    %463 = arith.mulf %460, %462 : vector<8x256xf32>
    %c56_485 = arith.constant 56 : index
    %c0_486 = arith.constant 0 : index
    %464 = vector.load %arg11[%c56_485, %c0_486] : memref<72x256xf32, #tpu.memory_space<vmem>>, vector<8x256xf32>
    tpu.vector_store %arg11[%c56_485, %c0_486], %463 {strides = array<i32>} : memref<72x256xf32, #tpu.memory_space<vmem>>, vector<8x256xf32>,
    %c239_i32_487 = arith.constant 239 : i32
    %465 = tpu.dynamic_rotate %266 by %c239_i32_487 dim 1 : vector<8x256xf32>, i32 -> vector<8x256xf32>
    %c8_488 = arith.constant 8 : index
    %c0_489 = arith.constant 0 : index
    %c0_490 = arith.constant 0 : index
    %466 = vector.load %arg5[%c8_488, %c0_489, %c0_490] : memref<18x8x256xf32, #tpu.memory_space<vmem>>, vector<1x8x256xf32>
    %467 = vector.shape_cast %466 : vector<1x8x256xf32> to vector<8x256xf32>
    %468 = arith.mulf %465, %467 : vector<8x256xf32>
    %c64_491 = arith.constant 64 : index
    %c0_492 = arith.constant 0 : index
    %469 = vector.load %arg11[%c64_491, %c0_492] : memref<72x256xf32, #tpu.memory_space<vmem>>, vector<8x256xf32>
    tpu.vector_store %arg11[%c64_491, %c0_492], %468 {strides = array<i32>} : memref<72x256xf32, #tpu.memory_space<vmem>>, vector<8x256xf32>,
    %c8_493 = arith.constant 8 : index
    %c0_494 = arith.constant 0 : index
    %c0_495 = arith.constant 0 : index
    %470 = vector.load %arg2[%c8_493, %c0_494, %c0_495] : memref<9x8x72xf32, #tpu.memory_space<vmem>>, vector<1x8x72xf32>
    %471 = vector.shape_cast %470 : vector<1x8x72xf32> to vector<8x72xf32>
    %c0_496 = arith.constant 0 : index
    %c0_497 = arith.constant 0 : index
    %472 = vector.load %arg11[%c0_496, %c0_497] : memref<72x256xf32, #tpu.memory_space<vmem>>, vector<72x256xf32>
    %cst_498 = arith.constant dense<0.000000e+00> : vector<8x256xf32>
    %473 = tpu.matmul %471, %472, %cst_498 {dimension_numbers = #tpu.dot_dimension_numbers<[1], [0], [0], [1], [0, 0, 1, 1], [], []>} : vector<8x72xf32>, vector<72x256xf32>, vector<8x256xf32> -> vector<8x256xf32>
    %c8_499 = arith.constant 8 : index
    %c0_500 = arith.constant 0 : index
    %c0_501 = arith.constant 0 : index
    %474 = vector.load %arg4[%c8_499, %c0_500, %c0_501] : memref<14x8x1xf32, #tpu.memory_space<vmem>>, vector<1x8x1xf32>
    %475 = vector.shape_cast %474 : vector<1x8x1xf32> to vector<8x1xf32>
    %476 = vector.broadcast %475 : vector<8x1xf32> to vector<8x256xf32>
    %477 = arith.addf %473, %476 : vector<8x256xf32>
    %c0_502 = arith.constant 0 : index
    %c0_503 = arith.constant 0 : index
    %478 = vector.load %arg11[%c0_502, %c0_503] : memref<72x256xf32, #tpu.memory_space<vmem>>, vector<8x256xf32>
    tpu.vector_store %arg11[%c0_502, %c0_503], %320 {strides = array<i32>} : memref<72x256xf32, #tpu.memory_space<vmem>>, vector<8x256xf32>,
    %c8_504 = arith.constant 8 : index
    %c0_505 = arith.constant 0 : index
    %479 = vector.load %arg11[%c8_504, %c0_505] : memref<72x256xf32, #tpu.memory_space<vmem>>, vector<8x256xf32>
    tpu.vector_store %arg11[%c8_504, %c0_505], %374 {strides = array<i32>} : memref<72x256xf32, #tpu.memory_space<vmem>>, vector<8x256xf32>,
    %c16_506 = arith.constant 16 : index
    %c0_507 = arith.constant 0 : index
    %480 = vector.load %arg11[%c16_506, %c0_507] : memref<72x256xf32, #tpu.memory_space<vmem>>, vector<8x256xf32>
    tpu.vector_store %arg11[%c16_506, %c0_507], %428 {strides = array<i32>} : memref<72x256xf32, #tpu.memory_space<vmem>>, vector<8x256xf32>,
    %c24_508 = arith.constant 24 : index
    %c0_509 = arith.constant 0 : index
    %481 = vector.load %arg11[%c24_508, %c0_509] : memref<72x256xf32, #tpu.memory_space<vmem>>, vector<8x256xf32>
    tpu.vector_store %arg11[%c24_508, %c0_509], %477 {strides = array<i32>} : memref<72x256xf32, #tpu.memory_space<vmem>>, vector<8x256xf32>,
    %c2_510 = arith.constant 2 : index
    %c0_511 = arith.constant 0 : index
    %c0_512 = arith.constant 0 : index
    %482 = vector.load %arg3[%c2_510, %c0_511, %c0_512] : memref<5x8x32xf32, #tpu.memory_space<vmem>>, vector<1x8x32xf32>
    %483 = vector.shape_cast %482 : vector<1x8x32xf32> to vector<8x32xf32>
    %c0_513 = arith.constant 0 : index
    %c0_514 = arith.constant 0 : index
    %484 = vector.load %arg11[%c0_513, %c0_514] : memref<72x256xf32, #tpu.memory_space<vmem>>, vector<32x256xf32>
    %cst_515 = arith.constant dense<0.000000e+00> : vector<8x256xf32>
    %485 = tpu.matmul %483, %484, %cst_515 {dimension_numbers = #tpu.dot_dimension_numbers<[1], [0], [0], [1], [0, 0, 1, 1], [], []>} : vector<8x32xf32>, vector<32x256xf32>, vector<8x256xf32> -> vector<8x256xf32>
    %c11_516 = arith.constant 11 : index
    %c0_517 = arith.constant 0 : index
    %c0_518 = arith.constant 0 : index
    %486 = vector.load %arg4[%c11_516, %c0_517, %c0_518] : memref<14x8x1xf32, #tpu.memory_space<vmem>>, vector<1x8x1xf32>
    %487 = vector.shape_cast %486 : vector<1x8x1xf32> to vector<8x1xf32>
    %488 = vector.broadcast %487 : vector<8x1xf32> to vector<8x256xf32>
    %489 = arith.addf %485, %488 : vector<8x256xf32>
    %cst_519 = arith.constant 0.000000e+00 : f32
    %490 = vector.broadcast %cst_519 : f32 to vector<8x256xf32>
    %491 = arith.cmpf oge, %489, %490 : vector<8x256xf32>
    %cst_520 = arith.constant 2.000000e-01 : f32
    %492 = vector.broadcast %cst_520 : f32 to vector<8x256xf32>
    %493 = arith.mulf %492, %489 : vector<8x256xf32>
    %494 = arith.select %491, %489, %493 : vector<8x256xi1>, vector<8x256xf32>
    %495 = arith.addf %494, %266 : vector<8x256xf32>
    %c0_521 = arith.constant 0 : index
    %c0_522 = arith.constant 0 : index
    %496 = vector.load %arg11[%c0_521, %c0_522] : memref<72x256xf32, #tpu.memory_space<vmem>>, vector<8x256xf32>
    tpu.vector_store %arg11[%c0_521, %c0_522], %55 {strides = array<i32>} : memref<72x256xf32, #tpu.memory_space<vmem>>, vector<8x256xf32>,
    %c8_523 = arith.constant 8 : index
    %c0_524 = arith.constant 0 : index
    %497 = vector.load %arg11[%c8_523, %c0_524] : memref<72x256xf32, #tpu.memory_space<vmem>>, vector<8x256xf32>
    tpu.vector_store %arg11[%c8_523, %c0_524], %255 {strides = array<i32>} : memref<72x256xf32, #tpu.memory_space<vmem>>, vector<8x256xf32>,
    %c16_525 = arith.constant 16 : index
    %c0_526 = arith.constant 0 : index
    %498 = vector.load %arg11[%c16_525, %c0_526] : memref<72x256xf32, #tpu.memory_space<vmem>>, vector<8x256xf32>
    tpu.vector_store %arg11[%c16_525, %c0_526], %495 {strides = array<i32>} : memref<72x256xf32, #tpu.memory_space<vmem>>, vector<8x256xf32>,
    %c3_527 = arith.constant 3 : index
    %c0_528 = arith.constant 0 : index
    %c0_529 = arith.constant 0 : index
    %499 = vector.load %arg3[%c3_527, %c0_528, %c0_529] : memref<5x8x32xf32, #tpu.memory_space<vmem>>, vector<1x8x32xf32>
    %500 = vector.shape_cast %499 : vector<1x8x32xf32> to vector<8x32xf32>
    %501 = vector.extract_strided_slice %500 {offsets = [0, 0], sizes = [8, 24], strides = [1, 1]} : vector<8x32xf32> to vector<8x24xf32>
    %c0_530 = arith.constant 0 : index
    %c0_531 = arith.constant 0 : index
    %502 = vector.load %arg11[%c0_530, %c0_531] : memref<72x256xf32, #tpu.memory_space<vmem>>, vector<24x256xf32>
    %cst_532 = arith.constant dense<0.000000e+00> : vector<8x256xf32>
    %503 = tpu.matmul %501, %502, %cst_532 {dimension_numbers = #tpu.dot_dimension_numbers<[1], [0], [0], [1], [0, 0, 1, 1], [], []>} : vector<8x24xf32>, vector<24x256xf32>, vector<8x256xf32> -> vector<8x256xf32>
    %c12_533 = arith.constant 12 : index
    %c0_534 = arith.constant 0 : index
    %c0_535 = arith.constant 0 : index
    %504 = vector.load %arg4[%c12_533, %c0_534, %c0_535] : memref<14x8x1xf32, #tpu.memory_space<vmem>>, vector<1x8x1xf32>
    %505 = vector.shape_cast %504 : vector<1x8x1xf32> to vector<8x1xf32>
    %506 = vector.broadcast %505 : vector<8x1xf32> to vector<8x256xf32>
    %507 = arith.addf %503, %506 : vector<8x256xf32>
    %c17_i32_536 = arith.constant 17 : i32
    %508 = tpu.dynamic_rotate %507 by %c17_i32_536 dim 1 : vector<8x256xf32>, i32 -> vector<8x256xf32>
    %c0_537 = arith.constant 0 : index
    %c0_538 = arith.constant 0 : index
    %c0_539 = arith.constant 0 : index
    %509 = vector.load %arg5[%c0_537, %c0_538, %c0_539] : memref<18x8x256xf32, #tpu.memory_space<vmem>>, vector<1x8x256xf32>
    %510 = vector.shape_cast %509 : vector<1x8x256xf32> to vector<8x256xf32>
    %511 = arith.mulf %508, %510 : vector<8x256xf32>
    %c0_540 = arith.constant 0 : index
    %c0_541 = arith.constant 0 : index
    %512 = vector.load %arg11[%c0_540, %c0_541] : memref<72x256xf32, #tpu.memory_space<vmem>>, vector<8x256xf32>
    tpu.vector_store %arg11[%c0_540, %c0_541], %511 {strides = array<i32>} : memref<72x256xf32, #tpu.memory_space<vmem>>, vector<8x256xf32>,
    %c16_i32_542 = arith.constant 16 : i32
    %513 = tpu.dynamic_rotate %507 by %c16_i32_542 dim 1 : vector<8x256xf32>, i32 -> vector<8x256xf32>
    %c1_543 = arith.constant 1 : index
    %c0_544 = arith.constant 0 : index
    %c0_545 = arith.constant 0 : index
    %514 = vector.load %arg5[%c1_543, %c0_544, %c0_545] : memref<18x8x256xf32, #tpu.memory_space<vmem>>, vector<1x8x256xf32>
    %515 = vector.shape_cast %514 : vector<1x8x256xf32> to vector<8x256xf32>
    %516 = arith.mulf %513, %515 : vector<8x256xf32>
    %c8_546 = arith.constant 8 : index
    %c0_547 = arith.constant 0 : index
    %517 = vector.load %arg11[%c8_546, %c0_547] : memref<72x256xf32, #tpu.memory_space<vmem>>, vector<8x256xf32>
    tpu.vector_store %arg11[%c8_546, %c0_547], %516 {strides = array<i32>} : memref<72x256xf32, #tpu.memory_space<vmem>>, vector<8x256xf32>,
    %c15_i32_548 = arith.constant 15 : i32
    %518 = tpu.dynamic_rotate %507 by %c15_i32_548 dim 1 : vector<8x256xf32>, i32 -> vector<8x256xf32>
    %c2_549 = arith.constant 2 : index
    %c0_550 = arith.constant 0 : index
    %c0_551 = arith.constant 0 : index
    %519 = vector.load %arg5[%c2_549, %c0_550, %c0_551] : memref<18x8x256xf32, #tpu.memory_space<vmem>>, vector<1x8x256xf32>
    %520 = vector.shape_cast %519 : vector<1x8x256xf32> to vector<8x256xf32>
    %521 = arith.mulf %518, %520 : vector<8x256xf32>
    %c16_552 = arith.constant 16 : index
    %c0_553 = arith.constant 0 : index
    %522 = vector.load %arg11[%c16_552, %c0_553] : memref<72x256xf32, #tpu.memory_space<vmem>>, vector<8x256xf32>
    tpu.vector_store %arg11[%c16_552, %c0_553], %521 {strides = array<i32>} : memref<72x256xf32, #tpu.memory_space<vmem>>, vector<8x256xf32>,
    %c1_i32_554 = arith.constant 1 : i32
    %523 = tpu.dynamic_rotate %507 by %c1_i32_554 dim 1 : vector<8x256xf32>, i32 -> vector<8x256xf32>
    %c3_555 = arith.constant 3 : index
    %c0_556 = arith.constant 0 : index
    %c0_557 = arith.constant 0 : index
    %524 = vector.load %arg5[%c3_555, %c0_556, %c0_557] : memref<18x8x256xf32, #tpu.memory_space<vmem>>, vector<1x8x256xf32>
    %525 = vector.shape_cast %524 : vector<1x8x256xf32> to vector<8x256xf32>
    %526 = arith.mulf %523, %525 : vector<8x256xf32>
    %c24_558 = arith.constant 24 : index
    %c0_559 = arith.constant 0 : index
    %527 = vector.load %arg11[%c24_558, %c0_559] : memref<72x256xf32, #tpu.memory_space<vmem>>, vector<8x256xf32>
    tpu.vector_store %arg11[%c24_558, %c0_559], %526 {strides = array<i32>} : memref<72x256xf32, #tpu.memory_space<vmem>>, vector<8x256xf32>,
    %c32_560 = arith.constant 32 : index
    %c0_561 = arith.constant 0 : index
    %528 = vector.load %arg11[%c32_560, %c0_561] : memref<72x256xf32, #tpu.memory_space<vmem>>, vector<8x256xf32>
    tpu.vector_store %arg11[%c32_560, %c0_561], %507 {strides = array<i32>} : memref<72x256xf32, #tpu.memory_space<vmem>>, vector<8x256xf32>,
    %c255_i32_562 = arith.constant 255 : i32
    %529 = tpu.dynamic_rotate %507 by %c255_i32_562 dim 1 : vector<8x256xf32>, i32 -> vector<8x256xf32>
    %c5_563 = arith.constant 5 : index
    %c0_564 = arith.constant 0 : index
    %c0_565 = arith.constant 0 : index
    %530 = vector.load %arg5[%c5_563, %c0_564, %c0_565] : memref<18x8x256xf32, #tpu.memory_space<vmem>>, vector<1x8x256xf32>
    %531 = vector.shape_cast %530 : vector<1x8x256xf32> to vector<8x256xf32>
    %532 = arith.mulf %529, %531 : vector<8x256xf32>
    %c40_566 = arith.constant 40 : index
    %c0_567 = arith.constant 0 : index
    %533 = vector.load %arg11[%c40_566, %c0_567] : memref<72x256xf32, #tpu.memory_space<vmem>>, vector<8x256xf32>
    tpu.vector_store %arg11[%c40_566, %c0_567], %532 {strides = array<i32>} : memref<72x256xf32, #tpu.memory_space<vmem>>, vector<8x256xf32>,
    %c241_i32_568 = arith.constant 241 : i32
    %534 = tpu.dynamic_rotate %507 by %c241_i32_568 dim 1 : vector<8x256xf32>, i32 -> vector<8x256xf32>
    %c6_569 = arith.constant 6 : index
    %c0_570 = arith.constant 0 : index
    %c0_571 = arith.constant 0 : index
    %535 = vector.load %arg5[%c6_569, %c0_570, %c0_571] : memref<18x8x256xf32, #tpu.memory_space<vmem>>, vector<1x8x256xf32>
    %536 = vector.shape_cast %535 : vector<1x8x256xf32> to vector<8x256xf32>
    %537 = arith.mulf %534, %536 : vector<8x256xf32>
    %c48_572 = arith.constant 48 : index
    %c0_573 = arith.constant 0 : index
    %538 = vector.load %arg11[%c48_572, %c0_573] : memref<72x256xf32, #tpu.memory_space<vmem>>, vector<8x256xf32>
    tpu.vector_store %arg11[%c48_572, %c0_573], %537 {strides = array<i32>} : memref<72x256xf32, #tpu.memory_space<vmem>>, vector<8x256xf32>,
    %c240_i32_574 = arith.constant 240 : i32
    %539 = tpu.dynamic_rotate %507 by %c240_i32_574 dim 1 : vector<8x256xf32>, i32 -> vector<8x256xf32>
    %c7_575 = arith.constant 7 : index
    %c0_576 = arith.constant 0 : index
    %c0_577 = arith.constant 0 : index
    %540 = vector.load %arg5[%c7_575, %c0_576, %c0_577] : memref<18x8x256xf32, #tpu.memory_space<vmem>>, vector<1x8x256xf32>
    %541 = vector.shape_cast %540 : vector<1x8x256xf32> to vector<8x256xf32>
    %542 = arith.mulf %539, %541 : vector<8x256xf32>
    %c56_578 = arith.constant 56 : index
    %c0_579 = arith.constant 0 : index
    %543 = vector.load %arg11[%c56_578, %c0_579] : memref<72x256xf32, #tpu.memory_space<vmem>>, vector<8x256xf32>
    tpu.vector_store %arg11[%c56_578, %c0_579], %542 {strides = array<i32>} : memref<72x256xf32, #tpu.memory_space<vmem>>, vector<8x256xf32>,
    %c239_i32_580 = arith.constant 239 : i32
    %544 = tpu.dynamic_rotate %507 by %c239_i32_580 dim 1 : vector<8x256xf32>, i32 -> vector<8x256xf32>
    %c8_581 = arith.constant 8 : index
    %c0_582 = arith.constant 0 : index
    %c0_583 = arith.constant 0 : index
    %545 = vector.load %arg5[%c8_581, %c0_582, %c0_583] : memref<18x8x256xf32, #tpu.memory_space<vmem>>, vector<1x8x256xf32>
    %546 = vector.shape_cast %545 : vector<1x8x256xf32> to vector<8x256xf32>
    %547 = arith.mulf %544, %546 : vector<8x256xf32>
    %c64_584 = arith.constant 64 : index
    %c0_585 = arith.constant 0 : index
    %548 = vector.load %arg11[%c64_584, %c0_585] : memref<72x256xf32, #tpu.memory_space<vmem>>, vector<8x256xf32>
    tpu.vector_store %arg11[%c64_584, %c0_585], %547 {strides = array<i32>} : memref<72x256xf32, #tpu.memory_space<vmem>>, vector<8x256xf32>,
    %c7_586 = arith.constant 7 : index
    %c0_587 = arith.constant 0 : index
    %c0_588 = arith.constant 0 : index
    %549 = vector.load %arg2[%c7_586, %c0_587, %c0_588] : memref<9x8x72xf32, #tpu.memory_space<vmem>>, vector<1x8x72xf32>
    %550 = vector.shape_cast %549 : vector<1x8x72xf32> to vector<8x72xf32>
    %c0_589 = arith.constant 0 : index
    %c0_590 = arith.constant 0 : index
    %551 = vector.load %arg11[%c0_589, %c0_590] : memref<72x256xf32, #tpu.memory_space<vmem>>, vector<72x256xf32>
    %cst_591 = arith.constant dense<0.000000e+00> : vector<8x256xf32>
    %552 = tpu.matmul %550, %551, %cst_591 {dimension_numbers = #tpu.dot_dimension_numbers<[1], [0], [0], [1], [0, 0, 1, 1], [], []>} : vector<8x72xf32>, vector<72x256xf32>, vector<8x256xf32> -> vector<8x256xf32>
    %c7_592 = arith.constant 7 : index
    %c0_593 = arith.constant 0 : index
    %c0_594 = arith.constant 0 : index
    %553 = vector.load %arg4[%c7_592, %c0_593, %c0_594] : memref<14x8x1xf32, #tpu.memory_space<vmem>>, vector<1x8x1xf32>
    %554 = vector.shape_cast %553 : vector<1x8x1xf32> to vector<8x1xf32>
    %555 = vector.broadcast %554 : vector<8x1xf32> to vector<8x256xf32>
    %556 = arith.addf %552, %555 : vector<8x256xf32>
    %cst_595 = arith.constant 0.000000e+00 : f32
    %557 = vector.broadcast %cst_595 : f32 to vector<8x256xf32>
    %558 = arith.cmpf oge, %556, %557 : vector<8x256xf32>
    %cst_596 = arith.constant 2.000000e-01 : f32
    %559 = vector.broadcast %cst_596 : f32 to vector<8x256xf32>
    %560 = arith.mulf %559, %556 : vector<8x256xf32>
    %561 = arith.select %558, %556, %560 : vector<8x256xi1>, vector<8x256xf32>
    %c0_597 = arith.constant 0 : index
    %c0_598 = arith.constant 0 : index
    %562 = vector.load %arg11[%c0_597, %c0_598] : memref<72x256xf32, #tpu.memory_space<vmem>>, vector<8x256xf32>
    tpu.vector_store %arg11[%c0_597, %c0_598], %561 {strides = array<i32>} : memref<72x256xf32, #tpu.memory_space<vmem>>, vector<8x256xf32>,
    %c4_599 = arith.constant 4 : index
    %c0_600 = arith.constant 0 : index
    %c0_601 = arith.constant 0 : index
    %563 = vector.load %arg3[%c4_599, %c0_600, %c0_601] : memref<5x8x32xf32, #tpu.memory_space<vmem>>, vector<1x8x32xf32>
    %564 = vector.shape_cast %563 : vector<1x8x32xf32> to vector<8x32xf32>
    %565 = vector.extract_strided_slice %564 {offsets = [0, 0], sizes = [8, 8], strides = [1, 1]} : vector<8x32xf32> to vector<8x8xf32>
    %c0_602 = arith.constant 0 : index
    %c0_603 = arith.constant 0 : index
    %566 = vector.load %arg11[%c0_602, %c0_603] : memref<72x256xf32, #tpu.memory_space<vmem>>, vector<8x256xf32>
    %cst_604 = arith.constant dense<0.000000e+00> : vector<8x256xf32>
    %567 = tpu.matmul %565, %566, %cst_604 {dimension_numbers = #tpu.dot_dimension_numbers<[1], [0], [0], [1], [0, 0, 1, 1], [], []>} : vector<8x8xf32>, vector<8x256xf32>, vector<8x256xf32> -> vector<8x256xf32>
    %c13 = arith.constant 13 : index
    %c0_605 = arith.constant 0 : index
    %c0_606 = arith.constant 0 : index
    %568 = vector.load %arg4[%c13, %c0_605, %c0_606] : memref<14x8x1xf32, #tpu.memory_space<vmem>>, vector<1x8x1xf32>
    %569 = vector.shape_cast %568 : vector<1x8x1xf32> to vector<8x1xf32>
    %570 = vector.broadcast %569 : vector<8x1xf32> to vector<8x256xf32>
    %571 = arith.addf %567, %570 : vector<8x256xf32>
    %572 = arith.subf %1, %571 : vector<8x256xf32>
    %c0_607 = arith.constant 0 : index
    %c0_608 = arith.constant 0 : index
    %c0_609 = arith.constant 0 : index
    %573 = vector.load %arg6[%c0_607, %c0_608, %c0_609] : memref<1x8x256xf32, #tpu.memory_space<vmem>>, vector<1x8x256xf32>
    %574 = vector.shape_cast %573 : vector<1x8x256xf32> to vector<8x256xf32>
    %575 = vector.shape_cast %572 : vector<8x256xf32> to vector<1x8x256xf32>
    tpu.vector_store %arg6[%c0_607, %c0_608, %c0_609], %575 {strides = array<i32>} : memref<1x8x256xf32, #tpu.memory_space<vmem>>, vector<1x8x256xf32>,
    return
  }
  func.func @transform_0(%arg0: i32) -> (i32, i32, i32) {
    %c0_i32 = arith.constant 0 : i32
    %c0_i32_0 = arith.constant 0 : i32
    %c0_i32_1 = arith.constant 0 : i32
    return %arg0, %c0_i32, %c0_i32_0 : i32, i32, i32
  }
  func.func @transform_1(%arg0: i32) -> (i32, i32, i32) {
    %c0_i32 = arith.constant 0 : i32
    %c0_i32_0 = arith.constant 0 : i32
    %c0_i32_1 = arith.constant 0 : i32
    %c0_i32_2 = arith.constant 0 : i32
    return %c0_i32, %c0_i32_0, %c0_i32_1 : i32, i32, i32
  }
  func.func @transform_2(%arg0: i32) -> (i32, i32, i32) {
    %c0_i32 = arith.constant 0 : i32
    %c0_i32_0 = arith.constant 0 : i32
    %c0_i32_1 = arith.constant 0 : i32
    %c0_i32_2 = arith.constant 0 : i32
    return %c0_i32, %c0_i32_0, %c0_i32_1 : i32, i32, i32
  }
  func.func @transform_3(%arg0: i32) -> (i32, i32, i32) {
    %c0_i32 = arith.constant 0 : i32
    %c0_i32_0 = arith.constant 0 : i32
    %c0_i32_1 = arith.constant 0 : i32
    %c0_i32_2 = arith.constant 0 : i32
    return %c0_i32, %c0_i32_0, %c0_i32_1 : i32, i32, i32
  }
  func.func @transform_4(%arg0: i32) -> (i32, i32, i32) {
    %c0_i32 = arith.constant 0 : i32
    %c0_i32_0 = arith.constant 0 : i32
    %c0_i32_1 = arith.constant 0 : i32
    %c0_i32_2 = arith.constant 0 : i32
    return %c0_i32, %c0_i32_0, %c0_i32_1 : i32, i32, i32
  }
  func.func @transform_5(%arg0: i32) -> (i32, i32, i32) {
    %c0_i32 = arith.constant 0 : i32
    %c0_i32_0 = arith.constant 0 : i32
    %c0_i32_1 = arith.constant 0 : i32
    return %arg0, %c0_i32, %c0_i32_0 : i32, i32, i32
  }
  func.func @transform_6(%arg0: i32) -> (i32, i32, i32) {
    %c0_i32 = arith.constant 0 : i32
    %c0_i32_0 = arith.constant 0 : i32
    %c0_i32_1 = arith.constant 0 : i32
    return %arg0, %c0_i32, %c0_i32_0 : i32, i32, i32
  }
  func.func @transform_7(%arg0: i32) -> (i32, i32, i32) {
    %c0_i32 = arith.constant 0 : i32
    %c0_i32_0 = arith.constant 0 : i32
    %c0_i32_1 = arith.constant 0 : i32
    return %arg0, %c0_i32, %c0_i32_0 : i32, i32, i32
  }
  func.func @transform_8(%arg0: i32) -> (i32, i32, i32) {
    %c0_i32 = arith.constant 0 : i32
    %c0_i32_0 = arith.constant 0 : i32
    %c0_i32_1 = arith.constant 0 : i32
    return %arg0, %c0_i32, %c0_i32_0 : i32, i32, i32
  }
  func.func @transform_9(%arg0: i32) -> (i32, i32, i32) {
    %c0_i32 = arith.constant 0 : i32
    %c0_i32_0 = arith.constant 0 : i32
    %c0_i32_1 = arith.constant 0 : i32
    return %arg0, %c0_i32, %c0_i32_0 : i32, i32, i32
  }
}

</mosaic_0001>

<bundles_post_ra>
// kernel: _rescan_forward_impl.1
= control target key start
LH: loop header
LB: loop body
LE: loop exit
PB: predicated region body
PF: predicated region fallthrough
CT: control target
= control target key end

     0   :  { %15 = vsyncpa [#allocation4], 0  ;;  %s4661_s0 = inlined_call_operand.vmem [shape: f32[2,8,256], index: 0, kind: input, shape index: {}]   ;;  %s4662_s1 = inlined_call_operand.hbm [shape: f32[9,8,72], index: 1, kind: input, shape index: {}]   ;;  %s4663_s2 = inlined_call_operand.hbm [shape: f32[5,8,32], index: 2, kind: input, shape index: {}]   ;;  %s4664_s3 = inlined_call_operand.vmem [shape: f32[14,8,1], index: 3, kind: input, shape index: {}]   ;;  %s4665_s4 = inlined_call_operand.vmem [shape: f32[18,8,256], index: 4, kind: input, shape index: {}]   ;;  %s4666_s5 = inlined_call_operand.vmem [shape: f32[2,8,256], index: 5, kind: output, shape index: {0}]   ;;  %s4667_s6 = inlined_call_operand.vmem [shape: f32[2,8,256], index: 6, kind: output, shape index: {1}]   ;;  %s4668_s7 = inlined_call_operand.vmem [shape: f32[2,8,256], index: 7, kind: output, shape index: {2}]   ;;  %s4669_s8 = inlined_call_operand.vmem [shape: f32[2,8,256], index: 8, kind: output, shape index: {3}]   ;;  %s4670_s9 = inlined_call_operand.vmem [shape: f32[2,8,256], index: 9, kind: output, shape index: {4}]  }
   0x1   :  { %16 = vsyncpa [#allocation6], 0  ;;  %s3460_s30 = smov 0  }
   0x2 LB: > { %s3466_s10 = sadd.s32 4294967295, %s3386_s30   ;;  %p3079_p0 = scmp.ge.s32.totalorder %s3386_s30, 1  ;;  %s3386_s30 = sphi %s3460_s30, %s22_s30  }
   0x3   : > { %p267_p1 = scmp.lt.s32.totalorder %s3386_s30, 3  ;;  %s3388_s11 = smov [#allocation3]  }
   0x4   : > { %s279_s12 = sshll.u32 %s3388_s11, 4  ;;  %p3282_p3 = scmp.eq.s32.totalorder %s3466_s10, 0  ;;  %s280_s12 = int_to_ptr.vmem [resolvable:$true] %s279_s12 }
   0x5   : > { %p3470_p2 = pnand %p3079_p0, %p267_p1  ;;  %s3389_s14 = smov [#allocation5]  }
   0x6   : > { %s292_s15 = sshll.u32 %s3389_s14, 4  ;;  %s3331_s17 = scalar_lea.vmem %s280_s12, 1152  ;;  %s293_s15 = int_to_ptr.vmem [resolvable:$true] %s292_s15 }
   0x7   : > { %p3275_p4 = pneg %p3470_p2  ;;  %p3332_p7 = scmp.ne.s32.totalorder %s280_s12, %s3331_s17 }
   0x8   : > { %p3339_p10 = scmp.lt.s32.totalorder %s280_s12, %s280_s12  ;;  %p3340_p11 = scmp.lt.s32.totalorder %s3331_s17, %s3331_s17 }
   0x9   : > { %p3479_p5 = pnand %p3282_p3, %p3275_p4 }
   0xa   : > { %p3341_p12 = por %p3340_p11, %p3339_p10 }
   0xb   : > { %p3322_p6 = pneg %p3479_p5 }
   0xd   : > { %p3334_p8 = pnand %p3332_p7, %p3322_p6 }
   0xf   : > { %p3335_p9 = pneg %p3334_p8 }
  0x11   : > { %p3342_p13 = pnand %p3341_p12, %p3335_p9 }
  0x13   : > { %3345 = shalt.err (!%p3342_p13)
}
  0x14   : > { %s3390_s18 = smov 128   ;;  %s3391_s19 = smov 8  }
  0x15   : > { %3278 = dma.hbm_to_vmem [thread:$0]  (!%p3479_p5), %s4662_s1, 1152, %s280_s12, [#allocation4], %s3390_s18, %s3390_s18, %s3391_s19  }
  0x16   : > { %s3357_s22 = scalar_lea.vmem %s293_s15, 640  ;;  %p3365_p7 = scmp.lt.s32.totalorder %s293_s15, %s293_s15 }
  0x17   : > { %p3358_p0 = scmp.ne.s32.totalorder %s293_s15, %s3357_s22  ;;  %p3366_p8 = scmp.lt.s32.totalorder %s3357_s22, %s3357_s22 }
  0x19   : > { %p3360_p1 = pnand %p3358_p0, %p3322_p6  ;;  %p3367_p10 = por %p3366_p8, %p3365_p7 }
  0x1b   : > { %p3361_p4 = pneg %p3360_p1 }
  0x1d   : > { %p3368_p9 = pnand %p3367_p10, %p3361_p4 }
  0x1f   : > { %3371 = shalt.err (!%p3368_p9)
}
  0x20   : > { %3281 = dma.hbm_to_vmem [thread:$0]  (!%p3479_p5), %s4663_s2, 640, %s293_s15, [#allocation6], %s3390_s18, %s3390_s18, %s3391_s19  }
  0x21   : > { %322 = sbr.rel (%p3470_p2) target bundleno = 3858 (0xf12), region = 40 }
  0x26   : > { %3377 = dma.done.wait (%p3282_p3), [#allocation4], 1152  }
  0x27   : > { %3379 = vsyncadd (%p3282_p3), [#allocation4], 4294966144 }
  0x28   : > { %3381 = dma.done.wait (%p3282_p3), [#allocation6], 640  }
  0x29   : > { %3383 = vsyncadd (%p3282_p3), [#allocation6], 4294966656  ;;  %p382_p6 = scmp.lt.s32.totalorder %s3466_s10, 1  ;;  %s3392_s29 = smov 112   ;;  %v3397_v2 = vmov 0.0   ;;  %v3399_v3 = vmov 0   ;;  %v418_v5 = vlaneseq }
  0x2a   : > { %s3393_s11 = smov 111   ;;  %s4683_s12 = smov 127   ;;  %622 = vmatprep.mubr.f32.mxu0 %v3397_v2  ;;  %827 = vmatprep.mubr.f32.mxu1 %v3397_v2  ;;  %v548_v4 = vld [vmem:[%s4664_s3] sm:$0xff]  ;;  %v3571_v9 = vld [vmem:[%s4665_s4 + $0x88] sm:$0xff]  ;;  %v3587_v16 = vld [vmem:[%s4665_s4 + $0x78] sm:$0xff]  ;;  %vm554_vm8 = vcmask 588800  }
  0x2b   : > { %s4707_s10 = smov (!%p382_p6, %s3466_s10), 1  ;;  %s4677_s13 = smov 1   ;;  %3316 = vset.pattern.permute.xlu0 %v3399_v3  ;;  %3317 = vset.pattern.permute.xlu1 %v3399_v3  ;;  %v3564_v6 = vand.u32 127, %v418_v5  ;;  %v3576_v10 = vld [vmem:[%s4665_s4 + $0x80] sm:$0xff]  ;;  %v3597_v20 = vld [vmem:[%s4665_s4 + $0x70] sm:$0xff]  ;;  %v3602_v21 = vld [vmem:[%s4665_s4 + $0x68] sm:$0xff] }
  0x2c   : > { %s3513_s25 = sshll.u32 %s4707_s10, 4  ;;  %s3394_s10 = smov 113   ;;  %v3607_v22 = vld [vmem:[%s4665_s4 + $0x60] sm:$0xff]  ;;  %v3621_v31 = vld [vmem:[%s4665_s4 + $0x58] sm:$0xff]  ;;  %v3626_v32 = vld [vmem:[%s4665_s4 + $0x50] sm:$0xff] }
  0x2d   : > { %s3519_s28 = scalar_lea.vmem %s4661_s0, %s3513_s25  ;;  %s4675_s14 = smov 15   ;;  %vm505_vm0 = vcmp.lt.s32.totalorder %v3564_v6, 112  ;;  %vm519_vm1 = vcmp.lt.s32.totalorder %v3564_v6, 111  ;;  %vm491_vm2 = vcmp.lt.s32.totalorder %v3564_v6, 113  ;;  %vm477_vm3 = vcmp.lt.s32.totalorder %v3564_v6, 127  ;;  %v3638_v39 = vld [vmem:[%s4665_s4 + $0x38] sm:$0xff] }
  0x2e   : > { %v3522_v0 = vld [vmem:[%s3519_s28] sm:$0xff]  ;;  %v3529_v1 = vld [vmem:[%s3519_s28 + $0x8] sm:$0xff]  ;;  %s4673_s15 = smov 16   ;;  %s4671_s16 = smov 17   ;;  %vm4685_vm4 = vcmp.lt.s32.totalorder %v3564_v6, 1  ;;  %v3643_v40 = vld [vmem:[%s4665_s4 + $0x30] sm:$0xff] }
  0x2f   : > { %501 = vrot.lane.b32.xlu1 %v3522_v0, %s3392_s29  ;;  %515 = vrot.lane.b32.xlu0 %v3522_v0, %s3393_s11  ;;  %vm4682_vm5 = vcmp.lt.s32.totalorder %v3564_v6, 15  ;;  %v3657_v47 = vld [vmem:[%s4665_s4 + $0x28] sm:$0xff]  ;;  %v3662_v48 = vld [vmem:[%s4665_s4 + $0x20] sm:$0xff]  ;;  %vm4681_vm6 = vcmp.lt.s32.totalorder %v3564_v6, 16  ;;  %vm4680_vm7 = vcmp.lt.s32.totalorder %v3564_v6, 17  ;;  %s396_s26 = scalar_lea.vmem %s4667_s6, %s3513_s25  ;;  %s401_s20 = scalar_lea.vmem %s4668_s7, %s3513_s25 }
  0x30   : > { %v3674_v55 = vld [vmem:[%s4665_s4 + $0x18] sm:$0xff]  ;;  %v3679_v56 = vld [vmem:[%s4665_s4 + $0x10] sm:$0xff]  ;;  %v3691_v63 = vld [vmem:[%s4665_s4 + $0x8] sm:$0xff]  ;;  %s411_s21 = scalar_lea.vmem %s4670_s9, %s3513_s25  ;;  %s406_s24 = scalar_lea.vmem %s4669_s8, %s3513_s25 }
  0x31   : > { %s3403_s27 = smov 96   ;;  %s3404_s17 = smov 98  }
  0x32   : > { %s3405_s18 = smov 126   ;;  %s3406_s19 = smov 2  }
  0x33   : > { %503 = vrot.lane.b32.xlu1 %v3529_v1, %s3392_s29  ;;  %517 = vrot.lane.b32.xlu0 %v3529_v1, %s3393_s11  ;;  %s3409_s22 = smov 34  }
  0x37   : > { %489 = vrot.lane.b32.xlu1 %v3529_v1, %s3394_s10  ;;  %487 = vrot.lane.b32.xlu0 %v3522_v0, %s3394_s10 }
  0x3b   : > { %475 = vrot.lane.b32.xlu1 %v3529_v1, %s4683_s12  ;;  %473 = vrot.lane.b32.xlu0 %v3522_v0, %s4683_s12 }
  0x3f   : > { %459 = vrot.lane.b32.xlu1 %v3529_v1, %s4677_s13  ;;  %457 = vrot.lane.b32.xlu0 %v3522_v0, %s4677_s13 }
  0x43   : > { %445 = vrot.lane.b32.xlu1 %v3529_v1, %s4675_s14  ;;  %443 = vrot.lane.b32.xlu0 %v3522_v0, %s4675_s14 }
  0x47   : > { %431 = vrot.lane.b32.xlu1 %v3529_v1, %s4673_s15  ;;  %429 = vrot.lane.b32.xlu0 %v3522_v0, %s4673_s15 }
  0x4b   : > { %416 = vrot.lane.b32.xlu1 %v3529_v1, %s4671_s16  ;;  %414 = vrot.lane.b32.xlu0 %v3522_v0, %s4671_s16 }
  0x4f   : > { %551 = vperm.xlu0 %3316, %v548_v4  }
  0xa1   : > { %v502_v7 = vpop.permute.xlu1 %501  ;;  %v516_v8 = vpop.permute.xlu0 %515 }
  0xa5   : > { %v504_v11 = vpop.permute.xlu1 %503  ;;  %v518_v12 = vpop.permute.xlu0 %517 }
  0xa6   : > { %v507_v13 = vsel %vm505_vm0, %v504_v11, %v502_v7  ;;  %v521_v14 = vsel %vm519_vm1, %v518_v12, %v516_v8  ;;  %v520_v15 = vsel %vm519_vm1, %v516_v8, %v518_v12  ;;  %v506_v17 = vsel %vm505_vm0, %v502_v7, %v504_v11  ;;  %v529_v11 = vld [vmem:[#allocation3] sm:$0xff] }
  0xa7   : > { %v526_v18 = vmul.f32 %v3571_v9, %v521_v14  ;;  %v525_v19 = vmul.f32 %v3576_v10, %v520_v15  ;;  %v512_v25 = vmul.f32 %v3587_v16, %v507_v13  ;;  %v511_v28 = vmul.f32 %v3597_v20, %v506_v17 }
  0xa9   : > { %v490_v23 = vpop.permute.xlu1 %489  ;;  %572 = vmatprep.subr.mxu0 %v526_v18  ;;  %v488_v24 = vpop.permute.xlu0 %487 }
  0xaa   : > { %v492_v26 = vsel %vm491_vm2, %v488_v24, %v490_v23  ;;  %v493_v27 = vsel %vm491_vm2, %v490_v23, %v488_v24  ;;  %573 = vmatpush1.msra.mxu0 %v525_v19 }
  0xab   : > { %574 = vmatprep.subr.mxu0 %v512_v25  ;;  %v498_v29 = vmul.f32 %v3602_v21, %v493_v27  ;;  %v497_v30 = vmul.f32 %v3607_v22, %v492_v26  ;;  %v3127_v25 = vld [vmem:[%s4664_s3 + $0x8] sm:$0xff] }
  0xac   : > { %575 = vmatpush1.msra.mxu0 %v511_v28 }
  0xad   : > { %v476_v33 = vpop.permute.xlu1 %475  ;;  %576 = vmatprep.subr.mxu0 %v498_v29  ;;  %v474_v34 = vpop.permute.xlu0 %473 }
  0xae   : > { %v478_v35 = vsel %vm477_vm3, %v474_v34, %v476_v33  ;;  %v479_v36 = vsel %vm477_vm3, %v476_v33, %v474_v34  ;;  %577 = vmatpush1.msra.mxu0 %v497_v30 }
  0xaf   : > { %v484_v37 = vmul.f32 %v3621_v31, %v479_v36  ;;  %v483_v38 = vmul.f32 %v3626_v32, %v478_v35 }
  0xb1   : > { %v460_v41 = vpop.permute.xlu1 %459  ;;  %578 = vmatprep.subr.mxu0 %v484_v37  ;;  %v458_v42 = vpop.permute.xlu0 %457 }
  0xb2   : > { %v462_v43 = vsel %vm4685_vm4, %v458_v42, %v460_v41  ;;  %v463_v44 = vsel %vm4685_vm4, %v460_v41, %v458_v42  ;;  %579 = vmatpush1.msra.mxu0 %v483_v38 }
  0xb3   : > { %580 = vmatprep.subr.mxu0 %v3529_v1  ;;  %v468_v45 = vmul.f32 %v3638_v39, %v462_v43  ;;  %v467_v46 = vmul.f32 %v3643_v40, %v463_v44 }
  0xb4   : > { %581 = vmatpush1.msra.mxu0 %v3522_v0  ;;  %v3696_v0 = vld [vmem:[%s4665_s4] sm:$0xff] }
  0xb5   : > { %v446_v49 = vpop.permute.xlu1 %445  ;;  %582 = vmatprep.subr.mxu0 %v468_v45  ;;  %v444_v50 = vpop.permute.xlu0 %443 }
  0xb6   : > { %v448_v51 = vsel %vm4682_vm5, %v444_v50, %v446_v49  ;;  %v449_v52 = vsel %vm4682_vm5, %v446_v49, %v444_v50  ;;  %583 = vmatpush1.msra.mxu0 %v467_v46 }
  0xb7   : > { %v454_v53 = vmul.f32 %v3657_v47, %v448_v51  ;;  %v453_v54 = vmul.f32 %v3662_v48, %v449_v52 }
  0xb9   : > { %v432_v57 = vpop.permute.xlu1 %431  ;;  %584 = vmatprep.subr.mxu0 %v454_v53  ;;  %v430_v58 = vpop.permute.xlu0 %429 }
  0xba   : > { %v434_v59 = vsel %vm4681_vm6, %v430_v58, %v432_v57  ;;  %v435_v60 = vsel %vm4681_vm6, %v432_v57, %v430_v58  ;;  %585 = vmatpush1.msra.mxu0 %v453_v54 }
  0xbb   : > { %v440_v61 = vmul.f32 %v3674_v55, %v434_v59  ;;  %v439_v62 = vmul.f32 %v3679_v56, %v435_v60 }
  0xbd   : > { %v417_v1 = vpop.permute.xlu1 %416  ;;  %586 = vmatprep.subr.mxu0 %v440_v61  ;;  %v415_v3 = vpop.permute.xlu0 %414 }
  0xbe   : > { %v421_v4 = vsel %vm4680_vm7, %v415_v3, %v417_v1  ;;  %v422_v5 = vsel %vm4680_vm7, %v417_v1, %v415_v3  ;;  %587 = vmatpush1.msra.mxu0 %v439_v62 }
  0xbf   : > { %v426_v7 = vmul.f32 %v3691_v63, %v421_v4  ;;  %v425_v8 = vmul.f32 %v3696_v0, %v422_v5 }
  0xc1   : > { %588 = vmatprep.subr.mxu0 %v426_v7 }
  0xc2   : > { %589 = vmatpush1.msra.mxu0 %v425_v8 }
  0xc3   : > { %3112 = vmatmul.mubr.msk.f32.vlgmr.msra.gmra.mxu0 %vm554_vm8, %v529_v11 }
  0xc4   : > { %916 = vmatprep.mubr.f32.mxu0 %v3397_v2 }
  0xca   : > { %v552_v12 = vpop.permute.xlu0 %551 }
 0x183   : > { %v624_v13 = vpop.f32.mrf.mxu0 }
 0x184   : > { %v625_v14 = vadd.f32 %v624_v13, %v552_v12 }
 0x185   : > { %v626_v15 = vpop.f32.mrf.mxu0 }
 0x186   : > { %vm629_vm9 = vcmp.ge.f32.partialorder %v625_v14, 0.0  ;;  %v631_v17 = vmul.f32 0.2, %v625_v14  ;;  %v627_v18 = vadd.f32 %v626_v15, %v552_v12 }
 0x188   : > { %v3706_v19 = vsel %vm629_vm9, %v625_v14, %v631_v17  ;;  %v632_v23 = vmul.f32 0.2, %v627_v18  ;;  %vm630_vm10 = vcmp.ge.f32.partialorder %v627_v18, 0.0 }
 0x189   : > { %709 = vrot.lane.b32.xlu0 %v3706_v19, %s3392_s29  ;;  %721 = vrot.lane.b32.xlu1 %v3706_v19, %s3393_s11 }
 0x18a   : > { %v3712_v24 = vsel %vm630_vm10, %v627_v18, %v632_v23  ;;  %vm4679_vm10 = vcmask 261120  }
 0x18d   : > { %697 = vrot.lane.b32.xlu0 %v3706_v19, %s3394_s10  ;;  %723 = vrot.lane.b32.xlu1 %v3712_v24, %s3393_s11 }
 0x191   : > { %685 = vrot.lane.b32.xlu0 %v3706_v19, %s4683_s12  ;;  %711 = vrot.lane.b32.xlu1 %v3712_v24, %s3392_s29 }
 0x195   : > { %671 = vrot.lane.b32.xlu0 %v3706_v19, %s4677_s13  ;;  %699 = vrot.lane.b32.xlu1 %v3712_v24, %s3394_s10 }
 0x199   : > { %659 = vrot.lane.b32.xlu0 %v3706_v19, %s4675_s14  ;;  %687 = vrot.lane.b32.xlu1 %v3712_v24, %s4683_s12 }
 0x19d   : > { %647 = vrot.lane.b32.xlu0 %v3706_v19, %s4673_s15  ;;  %673 = vrot.lane.b32.xlu1 %v3712_v24, %s4677_s13 }
 0x1a1   : > { %635 = vrot.lane.b32.xlu0 %v3706_v19, %s4671_s16  ;;  %661 = vrot.lane.b32.xlu1 %v3712_v24, %s4675_s14 }
 0x1a5   : > { %757 = vperm.xlu0 %3316, %v3127_v25   ;;  %649 = vrot.lane.b32.xlu1 %v3712_v24, %s4673_s15 }
 0x1a9   : > { %637 = vrot.lane.b32.xlu1 %v3712_v24, %s4671_s16 }
 0x1fb   : > { %v710_v26 = vpop.permute.xlu0 %709  ;;  %v722_v27 = vpop.permute.xlu1 %721 }
 0x1ff   : > { %v698_v28 = vpop.permute.xlu0 %697  ;;  %v724_v29 = vpop.permute.xlu1 %723 }
 0x200   : > { %v726_v30 = vsel %vm519_vm1, %v724_v29, %v722_v27  ;;  %v725_v33 = vsel %vm519_vm1, %v722_v27, %v724_v29 }
 0x201   : > { %v730_v34 = vmul.f32 %v3571_v9, %v726_v30  ;;  %v729_v35 = vmul.f32 %v3576_v10, %v725_v33  ;;  %v734_v30 = vld [vmem:[#allocation3 + $0x8] sm:$0xff] }
 0x203   : > { %v686_v36 = vpop.permute.xlu0 %685  ;;  %777 = vmatprep.subr.mxu1 %v730_v34  ;;  %866 = vmatprep.subr.mxu0 %v730_v34  ;;  %v712_v37 = vpop.permute.xlu1 %711 }
 0x204   : > { %v713_v38 = vsel %vm505_vm0, %v710_v26, %v712_v37  ;;  %v714_v41 = vsel %vm505_vm0, %v712_v37, %v710_v26  ;;  %778 = vmatpush1.msra.mxu1 %v729_v35  ;;  %867 = vmatpush1.msra.mxu0 %v729_v35 }
 0x205   : > { %v718_v42 = vmul.f32 %v3587_v16, %v714_v41  ;;  %v717_v43 = vmul.f32 %v3597_v20, %v713_v38 }
 0x207   : > { %779 = vmatprep.subr.mxu1 %v718_v42  ;;  %868 = vmatprep.subr.mxu0 %v718_v42  ;;  %v700_v44 = vpop.permute.xlu1 %699  ;;  %v672_v49 = vpop.permute.xlu0 %671 }
 0x208   : > { %v701_v45 = vsel %vm491_vm2, %v698_v28, %v700_v44  ;;  %v702_v46 = vsel %vm491_vm2, %v700_v44, %v698_v28  ;;  %780 = vmatpush1.msra.mxu1 %v717_v43  ;;  %869 = vmatpush1.msra.mxu0 %v717_v43  ;;  %v841_v44 = vld [vmem:[#allocation3 + $0x40] sm:$0xff] }
 0x209   : > { %v706_v50 = vmul.f32 %v3602_v21, %v702_v46  ;;  %v705_v51 = vmul.f32 %v3607_v22, %v701_v45  ;;  %v3145_v45 = vld [vmem:[%s4664_s3 + $0x10] sm:$0xff] }
 0x20b   : > { %781 = vmatprep.subr.mxu1 %v706_v50  ;;  %870 = vmatprep.subr.mxu0 %v706_v50  ;;  %v688_v52 = vpop.permute.xlu1 %687  ;;  %v660_v59 = vpop.permute.xlu0 %659 }
 0x20c   : > { %v689_v53 = vsel %vm477_vm3, %v686_v36, %v688_v52  ;;  %v690_v54 = vsel %vm477_vm3, %v688_v52, %v686_v36  ;;  %782 = vmatpush1.msra.mxu1 %v705_v51  ;;  %871 = vmatpush1.msra.mxu0 %v705_v51 }
 0x20d   : > { %v694_v57 = vmul.f32 %v3621_v31, %v690_v54  ;;  %v693_v58 = vmul.f32 %v3626_v32, %v689_v53 }
 0x20f   : > { %783 = vmatprep.subr.mxu1 %v694_v57  ;;  %872 = vmatprep.subr.mxu0 %v694_v57  ;;  %v674_v60 = vpop.permute.xlu1 %673  ;;  %v648_v8 = vpop.permute.xlu0 %647 }
 0x210   : > { %v675_v61 = vsel %vm4685_vm4, %v672_v49, %v674_v60  ;;  %v676_v62 = vsel %vm4685_vm4, %v674_v60, %v672_v49  ;;  %784 = vmatpush1.msra.mxu1 %v693_v58  ;;  %873 = vmatpush1.msra.mxu0 %v693_v58 }
 0x211   : > { %785 = vmatprep.subr.mxu1 %v3712_v24  ;;  %874 = vmatprep.subr.mxu0 %v3712_v24  ;;  %v680_v1 = vmul.f32 %v3638_v39, %v675_v61  ;;  %v679_v3 = vmul.f32 %v3643_v40, %v676_v62 }
 0x212   : > { %786 = vmatpush1.msra.mxu1 %v3706_v19  ;;  %875 = vmatpush1.msra.mxu0 %v3706_v19 }
 0x213   : > { %787 = vmatprep.subr.mxu1 %v680_v1  ;;  %876 = vmatprep.subr.mxu0 %v680_v1  ;;  %v662_v4 = vpop.permute.xlu1 %661  ;;  %v636_v23 = vpop.permute.xlu0 %635 }
 0x214   : > { %v663_v5 = vsel %vm4682_vm5, %v660_v59, %v662_v4  ;;  %v664_v7 = vsel %vm4682_vm5, %v662_v4, %v660_v59  ;;  %788 = vmatpush1.msra.mxu1 %v679_v3  ;;  %877 = vmatpush1.msra.mxu0 %v679_v3 }
 0x215   : > { %v668_v11 = vmul.f32 %v3657_v47, %v663_v5  ;;  %v667_v12 = vmul.f32 %v3662_v48, %v664_v7 }
 0x217   : > { %789 = vmatprep.subr.mxu1 %v668_v11  ;;  %878 = vmatprep.subr.mxu0 %v668_v11  ;;  %v650_v13 = vpop.permute.xlu1 %649 }
 0x218   : > { %v651_v14 = vsel %vm4681_vm6, %v648_v8, %v650_v13  ;;  %v652_v15 = vsel %vm4681_vm6, %v650_v13, %v648_v8  ;;  %790 = vmatpush1.msra.mxu1 %v667_v12  ;;  %879 = vmatpush1.msra.mxu0 %v667_v12 }
 0x219   : > { %v656_v17 = vmul.f32 %v3674_v55, %v651_v14  ;;  %v655_v18 = vmul.f32 %v3679_v56, %v652_v15 }
 0x21b   : > { %791 = vmatprep.subr.mxu1 %v656_v17  ;;  %880 = vmatprep.subr.mxu0 %v656_v17  ;;  %v638_v25 = vpop.permute.xlu1 %637 }
 0x21c   : > { %v639_v26 = vsel %vm4680_vm7, %v636_v23, %v638_v25  ;;  %v640_v27 = vsel %vm4680_vm7, %v638_v25, %v636_v23  ;;  %792 = vmatpush1.msra.mxu1 %v655_v18  ;;  %881 = vmatpush1.msra.mxu0 %v655_v18 }
 0x21d   : > { %v644_v28 = vmul.f32 %v639_v26, %v3691_v63  ;;  %v643_v29 = vmul.f32 %v640_v27, %v3696_v0 }
 0x21f   : > { %793 = vmatprep.subr.mxu1 %v644_v28  ;;  %882 = vmatprep.subr.mxu0 %v644_v28 }
 0x220   : > { %794 = vmatpush1.msra.mxu1 %v643_v29  ;;  %883 = vmatpush1.msra.mxu0 %v643_v29  ;;  %v758_v33 = vpop.permute.xlu0 %757 }
 0x221   : > { %3128 = vmatmul.mubr.msk.f32.vlgmr.msra.gmra.mxu1 %vm554_vm8, %v734_v30  ;;  %3130 = vmatmul.mubr.msk.f32.vlgmr.msra.gmra.mxu0 %vm554_vm8, %v841_v44 }
 0x222   : > { %1115 = vmatprep.mubr.f32.mxu1 %v3397_v2  ;;  %1320 = vmatprep.mubr.f32.mxu0 %v3397_v2 }
 0x2e1   : > { %v829_v34 = vpop.f32.mrf.mxu1 }
 0x2e2   : > { %v830_v35 = vadd.f32 %v829_v34, %v758_v33 }
 0x2e3   : > { %v831_v36 = vpop.f32.mrf.mxu1 }
 0x2e4   : > { %vm834_vm11 = vcmp.ge.f32.partialorder %v830_v35, 0.0  ;;  %v836_v37 = vmul.f32 0.2, %v830_v35  ;;  %v832_v38 = vadd.f32 %v831_v36, %v758_v33 }
 0x2e6   : > { %v3803_v41 = vsel %vm834_vm11, %v830_v35, %v836_v37  ;;  %vm835_vm12 = vcmp.ge.f32.partialorder %v832_v38, 0.0  ;;  %v837_v42 = vmul.f32 0.2, %v832_v38 }
 0x2e7   : > { %1333 = vst [vmem:[%s396_s26] sm:$0xff] %v3803_v41  ;;  %1009 = vrot.lane.b32.xlu1 %v3803_v41, %s3393_s11 }
 0x2e8   : > { %v3808_v43 = vsel %vm835_vm12, %v832_v38, %v837_v42 }
 0x2e9   : > { %1334 = vst [vmem:[%s396_s26 + $0x8] sm:$0xff] %v3808_v43  ;;  %1011 = vrot.lane.b32.xlu0 %v3808_v43, %s3393_s11  ;;  %s3402_s26 = smov 94  }
 0x2eb   : > { %997 = vrot.lane.b32.xlu1 %v3803_v41, %s3392_s29 }
 0x2ed   : > { %999 = vrot.lane.b32.xlu0 %v3808_v43, %s3392_s29 }
 0x2ef   : > { %985 = vrot.lane.b32.xlu1 %v3803_v41, %s3394_s10 }
 0x2f1   : > { %987 = vrot.lane.b32.xlu0 %v3808_v43, %s3394_s10 }
 0x2f3   : > { %973 = vrot.lane.b32.xlu1 %v3803_v41, %s4683_s12 }
 0x2f5   : > { %975 = vrot.lane.b32.xlu0 %v3808_v43, %s4683_s12 }
 0x2f7   : > { %959 = vrot.lane.b32.xlu1 %v3803_v41, %s4677_s13 }
 0x2f9   : > { %961 = vrot.lane.b32.xlu0 %v3808_v43, %s4677_s13 }
 0x2fb   : > { %947 = vrot.lane.b32.xlu1 %v3803_v41, %s4675_s14 }
 0x2fd   : > { %949 = vrot.lane.b32.xlu0 %v3808_v43, %s4675_s14 }
 0x2ff   : > { %935 = vrot.lane.b32.xlu1 %v3803_v41, %s4673_s15 }
 0x301   : > { %937 = vrot.lane.b32.xlu0 %v3808_v43, %s4673_s15 }
 0x303   : > { %923 = vrot.lane.b32.xlu1 %v3803_v41, %s4671_s16 }
 0x305   : > { %925 = vrot.lane.b32.xlu0 %v3808_v43, %s4671_s16 }
 0x307   : > { %1045 = vperm.xlu1 %3317, %v3145_v45  }
 0x359   : > { %v1010_v46 = vpop.permute.xlu1 %1009 }
 0x35b   : > { %v1012_v49 = vpop.permute.xlu0 %1011 }
 0x35c   : > { %v1013_v50 = vsel %vm519_vm1, %v1010_v46, %v1012_v49  ;;  %v1014_v51 = vsel %vm519_vm1, %v1012_v49, %v1010_v46 }
 0x35d   : > { %v1017_v52 = vmul.f32 %v3576_v10, %v1013_v50  ;;  %v998_v53 = vpop.permute.xlu1 %997  ;;  %v1018_v54 = vmul.f32 %v3571_v9, %v1014_v51 }
 0x35f   : > { %v1000_v57 = vpop.permute.xlu0 %999  ;;  %1065 = vmatprep.subr.mxu1 %v1018_v54  ;;  %v1022_v54 = vld [vmem:[#allocation3 + $0x10] sm:$0xff] }
 0x360   : > { %v1001_v58 = vsel %vm505_vm0, %v998_v53, %v1000_v57  ;;  %v1002_v59 = vsel %vm505_vm0, %v1000_v57, %v998_v53  ;;  %1066 = vmatpush1.msra.mxu1 %v1017_v52 }
 0x361   : > { %v1005_v60 = vmul.f32 %v3597_v20, %v1001_v58  ;;  %v986_v61 = vpop.permute.xlu1 %985  ;;  %v1006_v62 = vmul.f32 %v3587_v16, %v1002_v59 }
 0x363   : > { %v988_v1 = vpop.permute.xlu0 %987  ;;  %1067 = vmatprep.subr.mxu1 %v1006_v62 }
 0x364   : > { %v989_v3 = vsel %vm491_vm2, %v986_v61, %v988_v1  ;;  %v990_v4 = vsel %vm491_vm2, %v988_v1, %v986_v61  ;;  %1068 = vmatpush1.msra.mxu1 %v1005_v60 }
 0x365   : > { %v993_v5 = vmul.f32 %v3607_v22, %v989_v3  ;;  %v974_v7 = vpop.permute.xlu1 %973  ;;  %v994_v8 = vmul.f32 %v3602_v21, %v990_v4 }
 0x367   : > { %v976_v11 = vpop.permute.xlu0 %975  ;;  %1069 = vmatprep.subr.mxu1 %v994_v8  ;;  %v3163_v8 = vld [vmem:[%s4664_s3 + $0x48] sm:$0xff] }
 0x368   : > { %v977_v12 = vsel %vm477_vm3, %v974_v7, %v976_v11  ;;  %v978_v13 = vsel %vm477_vm3, %v976_v11, %v974_v7  ;;  %1070 = vmatpush1.msra.mxu1 %v993_v5  ;;  %v3161_v5 = vld [vmem:[%s4664_s3 + $0x18] sm:$0xff]  ;;  %v3946_v7 = vld [vmem:[%s4664_s3 + $0x40] sm:$0xff]  ;;  %v3165_v11 = vld [vmem:[%s4664_s3 + $0x50] sm:$0xff] }
 0x369   : > { %v981_v14 = vmul.f32 %v3626_v32, %v977_v12  ;;  %v960_v15 = vpop.permute.xlu1 %959  ;;  %v982_v17 = vmul.f32 %v3621_v31, %v978_v13 }
 0x36b   : > { %v962_v18 = vpop.permute.xlu0 %961  ;;  %1071 = vmatprep.subr.mxu1 %v982_v17 }
 0x36c   : > { %v963_v23 = vsel %vm4685_vm4, %v960_v15, %v962_v18  ;;  %v964_v25 = vsel %vm4685_vm4, %v962_v18, %v960_v15  ;;  %1072 = vmatpush1.msra.mxu1 %v981_v14 }
 0x36d   : > { %v967_v26 = vmul.f32 %v3643_v40, %v964_v25  ;;  %1073 = vmatprep.subr.mxu1 %v3808_v43  ;;  %v948_v27 = vpop.permute.xlu1 %947  ;;  %v968_v28 = vmul.f32 %v3638_v39, %v963_v23 }
 0x36e   : > { %1074 = vmatpush1.msra.mxu1 %v3803_v41 }
 0x36f   : > { %v950_v29 = vpop.permute.xlu0 %949  ;;  %1075 = vmatprep.subr.mxu1 %v968_v28 }
 0x370   : > { %v951_v30 = vsel %vm4682_vm5, %v948_v27, %v950_v29  ;;  %v952_v33 = vsel %vm4682_vm5, %v950_v29, %v948_v27  ;;  %1076 = vmatpush1.msra.mxu1 %v967_v26 }
 0x371   : > { %v955_v34 = vmul.f32 %v3662_v48, %v952_v33  ;;  %v936_v35 = vpop.permute.xlu1 %935  ;;  %v956_v36 = vmul.f32 %v3657_v47, %v951_v30 }
 0x373   : > { %v938_v37 = vpop.permute.xlu0 %937  ;;  %1077 = vmatprep.subr.mxu1 %v956_v36 }
 0x374   : > { %v939_v38 = vsel %vm4681_vm6, %v936_v35, %v938_v37  ;;  %v940_v42 = vsel %vm4681_vm6, %v938_v37, %v936_v35  ;;  %1078 = vmatpush1.msra.mxu1 %v955_v34 }
 0x375   : > { %v943_v44 = vmul.f32 %v3679_v56, %v940_v42  ;;  %v944_v45 = vmul.f32 %v3674_v55, %v939_v38  ;;  %v924_v46 = vpop.permute.xlu1 %923 }
 0x377   : > { %v926_v49 = vpop.permute.xlu0 %925  ;;  %1079 = vmatprep.subr.mxu1 %v944_v45 }
 0x378   : > { %v927_v50 = vsel %vm4680_vm7, %v924_v46, %v926_v49  ;;  %v928_v51 = vsel %vm4680_vm7, %v926_v49, %v924_v46  ;;  %1080 = vmatpush1.msra.mxu1 %v943_v44 }
 0x379   : > { %v931_v52 = vmul.f32 %v928_v51, %v3696_v0  ;;  %v932_v53 = vmul.f32 %v927_v50, %v3691_v63 }
 0x37b   : > { %1081 = vmatprep.subr.mxu1 %v932_v53 }
 0x37c   : > { %1082 = vmatpush1.msra.mxu1 %v931_v52 }
 0x37d   : > { %3146 = vmatmul.mubr.msk.f32.vlgmr.msra.gmra.mxu1 %vm554_vm8, %v1022_v54 }
 0x37e   : > { %1433 = vmatprep.mubr.f32.mxu1 %v3397_v2 }
 0x382   : > { %v1046_v57 = vpop.permute.xlu1 %1045 }
 0x43d   : > { %v1117_v58 = vpop.f32.mrf.mxu1 }
 0x43e   : > { %v1118_v59 = vadd.f32 %v1117_v58, %v1046_v57 }
 0x43f   : > { %v1119_v60 = vpop.f32.mrf.mxu1 }
 0x440   : > { %vm1122_vm13 = vcmp.ge.f32.partialorder %v1118_v59, 0.0  ;;  %v1124_v61 = vmul.f32 0.2, %v1118_v59  ;;  %v1120_v62 = vadd.f32 %v1119_v60, %v1046_v57 }
 0x442   : > { %v3902_v1 = vsel %vm1122_vm13, %v1118_v59, %v1124_v61  ;;  %vm1123_vm14 = vcmp.ge.f32.partialorder %v1120_v62, 0.0  ;;  %v1125_v3 = vmul.f32 0.2, %v1120_v62  ;;  %vm1465_vm13 = vcmask 130048  }
 0x443   : > { %1335 = vst [vmem:[%s401_s20] sm:$0xff] %v3902_v1  ;;  %1214 = vrot.lane.b32.xlu0 %v3902_v1, %s3393_s11 }
 0x444   : > { %v3907_v4 = vsel %vm1123_vm14, %v1120_v62, %v1125_v3  ;;  %vm1644_vm14 = vcmp.lt.s32.totalorder %v3564_v6, 94 }
 0x445   : > { %1336 = vst [vmem:[%s401_s20 + $0x8] sm:$0xff] %v3907_v4  ;;  %1216 = vrot.lane.b32.xlu1 %v3907_v4, %s3393_s11  ;;  %s3407_s20 = smov 30  }
 0x447   : > { %1202 = vrot.lane.b32.xlu0 %v3902_v1, %s3392_s29 }
 0x449   : > { %1204 = vrot.lane.b32.xlu1 %v3907_v4, %s3392_s29 }
 0x44b   : > { %1190 = vrot.lane.b32.xlu0 %v3902_v1, %s3394_s10 }
 0x44d   : > { %1192 = vrot.lane.b32.xlu1 %v3907_v4, %s3394_s10 }
 0x44f   : > { %1178 = vrot.lane.b32.xlu0 %v3902_v1, %s4683_s12 }
 0x451   : > { %1180 = vrot.lane.b32.xlu1 %v3907_v4, %s4683_s12 }
 0x453   : > { %1164 = vrot.lane.b32.xlu0 %v3902_v1, %s4677_s13 }
 0x455   : > { %1166 = vrot.lane.b32.xlu1 %v3907_v4, %s4677_s13  ;;  %s4690_s13 = smov 16  }
 0x457   : > { %1152 = vrot.lane.b32.xlu0 %v3902_v1, %s4675_s14 }
 0x459   : > { %1154 = vrot.lane.b32.xlu1 %v3907_v4, %s4675_s14 }
 0x45b   : > { %1140 = vrot.lane.b32.xlu0 %v3902_v1, %s4673_s15 }
 0x45d   : > { %1142 = vrot.lane.b32.xlu1 %v3907_v4, %s4673_s15  ;;  %s4688_s15 = smov 1  }
 0x45f   : > { %1128 = vrot.lane.b32.xlu0 %v3902_v1, %s4671_s16 }
 0x461   : > { %1130 = vrot.lane.b32.xlu1 %v3907_v4, %s4671_s16  ;;  %s4689_s16 = smov 15  }
 0x463   : > { %1250 = vperm.xlu0 %3316, %v3161_v5   ;;  %v1227_v5 = vld [vmem:[#allocation3 + $0x18] sm:$0xff] }
 0x465   : > { %846 = vperm.xlu1 %3317, %v3946_v7  }
 0x467   : > { %1362 = vperm.xlu0 %3316, %v3163_v8  }
 0x469   : > { %1462 = vperm.xlu1 %3317, %v3165_v11  }
 0x4b5   : > { %v1215_v12 = vpop.permute.xlu0 %1214 }
 0x4b7   : > { %v1217_v13 = vpop.permute.xlu1 %1216 }
 0x4b8   : > { %v1218_v14 = vsel %vm519_vm1, %v1215_v12, %v1217_v13  ;;  %v1219_v15 = vsel %vm519_vm1, %v1217_v13, %v1215_v12 }
 0x4b9   : > { %v1222_v17 = vmul.f32 %v3576_v10, %v1218_v14  ;;  %v1203_v18 = vpop.permute.xlu0 %1202  ;;  %v1223_v23 = vmul.f32 %v3571_v9, %v1219_v15 }
 0x4bb   : > { %v1205_v25 = vpop.permute.xlu1 %1204  ;;  %1270 = vmatprep.subr.mxu0 %v1223_v23 }
 0x4bc   : > { %v1206_v26 = vsel %vm505_vm0, %v1203_v18, %v1205_v25  ;;  %v1207_v27 = vsel %vm505_vm0, %v1205_v25, %v1203_v18  ;;  %1271 = vmatpush1.msra.mxu0 %v1222_v17 }
 0x4bd   : > { %v1210_v28 = vmul.f32 %v3597_v20, %v1206_v26  ;;  %v1191_v29 = vpop.permute.xlu0 %1190  ;;  %v1211_v30 = vmul.f32 %v3587_v16, %v1207_v27  ;;  %v1349_v26 = vld [vmem:[#allocation5] sm:$0xff] }
 0x4bf   : > { %v1193_v33 = vpop.permute.xlu1 %1192  ;;  %1272 = vmatprep.subr.mxu0 %v1211_v30 }
 0x4c0   : > { %v1194_v10 = vsel %vm491_vm2, %v1191_v29, %v1193_v33  ;;  %v1195_v9 = vsel %vm491_vm2, %v1193_v33, %v1191_v29  ;;  %1273 = vmatpush1.msra.mxu0 %v1210_v28 }
 0x4c1   : > { %v1198_v34 = vmul.f32 %v3607_v22, %v1194_v10  ;;  %v1179_v35 = vpop.permute.xlu0 %1178  ;;  %v1199_v36 = vmul.f32 %v3602_v21, %v1195_v9 }
 0x4c3   : > { %v1181_v37 = vpop.permute.xlu1 %1180  ;;  %1274 = vmatprep.subr.mxu0 %v1199_v36 }
 0x4c4   : > { %v1182_v20 = vsel %vm477_vm3, %v1179_v35, %v1181_v37  ;;  %v1183_v16 = vsel %vm477_vm3, %v1181_v37, %v1179_v35  ;;  %1275 = vmatpush1.msra.mxu0 %v1198_v34 }
 0x4c5   : > { %v1186_v38 = vmul.f32 %v3626_v32, %v1182_v20  ;;  %v1165_v42 = vpop.permute.xlu0 %1164  ;;  %v1187_v44 = vmul.f32 %v3621_v31, %v1183_v16 }
 0x4c7   : > { %v1167_v45 = vpop.permute.xlu1 %1166  ;;  %1276 = vmatprep.subr.mxu0 %v1187_v44  ;;  %v4075_v44 = vld [vmem:[%s4665_s4 + $0x110] sm:$0xff] }
 0x4c8   : > { %v1168_v22 = vsel %vm4685_vm4, %v1165_v42, %v1167_v45  ;;  %v1169_v21 = vsel %vm4685_vm4, %v1167_v45, %v1165_v42  ;;  %1277 = vmatpush1.msra.mxu0 %v1186_v38  ;;  %v3183_v38 = vld [vmem:[%s4664_s3 + $0x20] sm:$0xff]  ;;  %v4080_v45 = vld [vmem:[%s4665_s4 + $0x118] sm:$0xff] }
 0x4c9   : > { %v1172_v46 = vmul.f32 %v3643_v40, %v1169_v21  ;;  %1278 = vmatprep.subr.mxu0 %v3907_v4  ;;  %v1153_v49 = vpop.permute.xlu0 %1152  ;;  %v1173_v50 = vmul.f32 %v3638_v39, %v1168_v22 }
 0x4ca   : > { %1279 = vmatpush1.msra.mxu0 %v3902_v1 }
 0x4cb   : > { %v1155_v32 = vpop.permute.xlu1 %1154  ;;  %1280 = vmatprep.subr.mxu0 %v1173_v50 }
 0x4cc   : > { %v1156_v31 = vsel %vm4682_vm5, %v1153_v49, %v1155_v32  ;;  %v1157_v51 = vsel %vm4682_vm5, %v1155_v32, %v1153_v49  ;;  %1281 = vmatpush1.msra.mxu0 %v1172_v46 }
 0x4cd   : > { %v1160_v52 = vmul.f32 %v3662_v48, %v1157_v51  ;;  %v1161_v40 = vmul.f32 %v3657_v47, %v1156_v31  ;;  %v1141_v53 = vpop.permute.xlu0 %1140  ;;  %v4092_v31 = vld [vmem:[%s4665_s4 + $0x100] sm:$0xff]  ;;  %v4097_v51 = vld [vmem:[%s4665_s4 + $0x108] sm:$0xff] }
 0x4cf   : > { %v1143_v54 = vpop.permute.xlu1 %1142  ;;  %1282 = vmatprep.subr.mxu0 %v1161_v40 }
 0x4d0   : > { %v1144_v39 = vsel %vm4681_vm6, %v1141_v53, %v1143_v54  ;;  %v1145_v57 = vsel %vm4681_vm6, %v1143_v54, %v1141_v53  ;;  %1283 = vmatpush1.msra.mxu0 %v1160_v52 }
 0x4d1   : > { %v1148_v58 = vmul.f32 %v3679_v56, %v1145_v57  ;;  %v1149_v59 = vmul.f32 %v3674_v55, %v1144_v39  ;;  %v1129_v60 = vpop.permute.xlu0 %1128  ;;  %v918_v55 = vpop.f32.mrf.mxu0 }
 0x4d3   : > { %v1131_v61 = vpop.permute.xlu1 %1130  ;;  %1284 = vmatprep.subr.mxu0 %v1149_v59  ;;  %v920_v56 = vpop.f32.mrf.mxu0  ;;  %v4114_v59 = vld [vmem:[%s4665_s4 + $0xf8] sm:$0xff] }
 0x4d4   : > { %v1132_v47 = vsel %vm4680_vm7, %v1129_v60, %v1131_v61  ;;  %v1133_v48 = vsel %vm4680_vm7, %v1131_v61, %v1129_v60  ;;  %1285 = vmatpush1.msra.mxu0 %v1148_v58  ;;  %v4109_v58 = vld [vmem:[%s4665_s4 + $0xf0] sm:$0xff]  ;;  %vm1544_vm7 = vcmp.lt.s32.totalorder %v3564_v6, 34 }
 0x4d5   : > { %v1136_v62 = vmul.f32 %v1133_v48, %v3696_v0  ;;  %v1137_v3 = vmul.f32 %v1132_v47, %v3691_v63 }
 0x4d7   : > { %1286 = vmatprep.subr.mxu0 %v1137_v3 }
 0x4d8   : > { %1287 = vmatpush1.msra.mxu0 %v1136_v62 }
 0x4d9   : > { %3162 = vmatmul.mubr.msk.f32.vlgmr.msra.gmra.mxu0 %vm554_vm8, %v1227_v5  ;;  %v4126_v5 = vld [vmem:[%s4665_s4 + $0xe0] sm:$0xff] }
 0x4da   : > { %1533 = vmatprep.mubr.f32.mxu0 %v3397_v2 }
 0x4de   : > { %v1251_v63 = vpop.permute.xlu0 %1250 }
 0x4e0   : > { %v847_v8 = vpop.permute.xlu1 %846 }
 0x4e1   : > { %v919_v11 = vadd.f32 %v918_v55, %v847_v8  ;;  %v921_v12 = vadd.f32 %v920_v56, %v847_v8  ;;  %v4131_v55 = vld [vmem:[%s4665_s4 + $0xe8] sm:$0xff] }
 0x4e2   : > { %v1363_v27 = vpop.permute.xlu0 %1362 }
 0x4e3   : > { %1339 = vst [vmem:[%s411_s21] sm:$0xff] %v919_v11  ;;  %1340 = vst [vmem:[%s411_s21 + $0x8] sm:$0xff] %v921_v12  ;;  %1393 = vmatprep.subr.mxu1 %v921_v12  ;;  %s3408_s21 = smov 32  }
 0x4e4   : > { %1394 = vmatpush1.msra.mxu1 %v919_v11  ;;  %v1463_v35 = vpop.permute.xlu1 %1462 }
 0x599   : > { %v1322_v0 = vpop.f32.mrf.mxu0 }
 0x59a   : > { %v1323_v13 = vadd.f32 %v1322_v0, %v1251_v63 }
 0x59b   : > { %v1324_v14 = vpop.f32.mrf.mxu0 }
 0x59c   : > { %vm1327_vm15 = vcmp.ge.f32.partialorder %v1323_v13, 0.0  ;;  %v1329_v15 = vmul.f32 0.2, %v1323_v13  ;;  %v1325_v17 = vadd.f32 %v1324_v14, %v1251_v63  ;;  %v4148_v14 = vld [vmem:[%s4665_s4 + $0xc8] sm:$0xff] }
 0x59e   : > { %v1330_v18 = vmul.f32 0.2, %v1325_v17  ;;  %vm1328_vm9 = vcmp.ge.f32.partialorder %v1325_v17, 0.0  ;;  %v1331_v23 = vsel %vm1327_vm15, %v1323_v13, %v1329_v15  ;;  %vm1630_vm15 = vcmp.lt.s32.totalorder %v3564_v6, 96  ;;  %v4143_v13 = vld [vmem:[%s4665_s4 + $0xc0] sm:$0xff] }
 0x59f   : > { %1337 = vst [vmem:[%s406_s24] sm:$0xff] %v1331_v23 }
 0x5a0   : > { %v1332_v25 = vsel %vm1328_vm9, %v1325_v17, %v1330_v18  ;;  %vm1616_vm9 = vcmp.lt.s32.totalorder %v3564_v6, 98 }
 0x5a1   : > { %1338 = vst [vmem:[%s406_s24 + $0x8] sm:$0xff] %v1332_v25  ;;  %1395 = vmatprep.subr.mxu1 %v1332_v25  ;;  %s4699_s24 = smov 127  }
 0x5a2   : > { %1396 = vmatpush1.msra.mxu1 %v1331_v23 }
 0x5a3   : > { %1397 = vmatprep.subr.mxu1 %v3907_v4 }
 0x5a4   : > { %1398 = vmatpush1.msra.mxu1 %v3902_v1 }
 0x5a5   : > { %1399 = vmatprep.subr.mxu1 %v3808_v43  ;;  %v1453_v43 = vld [vmem:[#allocation5 + $0x8] sm:$0xff] }
 0x5a6   : > { %1400 = vmatpush1.msra.mxu1 %v3803_v41 }
 0x5a7   : > { %3164 = vmatmul.mubr.msk.f32.vlgmr.msra.gmra.mxu1 %vm4679_vm10, %v1349_v26  ;;  %vm1558_vm10 = vcmp.lt.s32.totalorder %v3564_v6, 32 }
 0x5a8   : > { %1748 = vmatprep.mubr.f32.mxu1 %v3397_v2 }
 0x667   : > { %v1435_v28 = vpop.f32.mrf.mxu1 }
 0x668   : > { %v1436_v29 = vadd.f32 %v1435_v28, %v1363_v27  ;;  %v4167_v28 = vld [vmem:[%s4665_s4 + $0xb8] sm:$0xff] }
 0x669   : > { %v1437_v30 = vpop.f32.mrf.mxu1 }
 0x66a   : > { %vm1440_vm11 = vcmp.ge.f32.partialorder %v1436_v29, 0.0  ;;  %v1442_v33 = vmul.f32 0.2, %v1436_v29  ;;  %v1438_v10 = vadd.f32 %v1437_v30, %v1363_v27  ;;  %v4162_v27 = vld [vmem:[%s4665_s4 + $0xb0] sm:$0xff] }
 0x66c   : > { %vm1441_vm12 = vcmp.ge.f32.partialorder %v1438_v10, 0.0  ;;  %v1443_v4 = vmul.f32 0.2, %v1438_v10  ;;  %v1444_v1 = vsel %vm1440_vm11, %v1436_v29, %v1442_v33  ;;  %vm1602_vm11 = vcmp.lt.s32.totalorder %v3564_v6, 126 }
 0x66d   : > { %v4025_v41 = vadd.f32 %v1444_v1, %v3706_v19 }
 0x66e   : > { %v1445_v9 = vsel %vm1441_vm12, %v1438_v10, %v1443_v4  ;;  %vm1586_vm12 = vcmp.lt.s32.totalorder %v3564_v6, 2 }
 0x66f   : > { %v4022_v34 = vadd.f32 %v1445_v9, %v3712_v24  ;;  %v4179_v9 = vld [vmem:[%s4665_s4 + $0xa0] sm:$0xff] }
 0x671   : > { %1497 = vmatprep.subr.mxu0 %v4022_v34 }
 0x672   : > { %1498 = vmatpush1.msra.mxu0 %v4025_v41 }
 0x673   : > { %1499 = vmatprep.subr.mxu0 %v3712_v24 }
 0x674   : > { %1500 = vmatpush1.msra.mxu0 %v3706_v19 }
 0x675   : > { %3166 = vmatmul.mubr.msk.f32.vlgmr.msra.gmra.mxu0 %vm1465_vm13, %v1453_v43  ;;  %vm1572_vm13 = vcmp.lt.s32.totalorder %v3564_v6, 30  ;;  %v4184_v43 = vld [vmem:[%s4665_s4 + $0xa8] sm:$0xff] }
 0x676   : > { %1953 = vmatprep.mubr.f32.mxu0 %v3397_v2 }
 0x735   : > { %v1535_v36 = vpop.f32.mrf.mxu0 }
 0x736   : > { %v4032_v37 = vadd.f32 %v1535_v36, %v1463_v35 }
 0x737   : > { %v1537_v20 = vpop.f32.mrf.mxu0 }
 0x738   : > { %v4034_v16 = vadd.f32 %v1537_v20, %v1463_v35  ;;  %1640 = vrot.lane.b32.xlu0 %v4032_v37, %s3402_s26 }
 0x73a   : > { %1642 = vrot.lane.b32.xlu1 %v4034_v16, %s3402_s26 }
 0x73c   : > { %1626 = vrot.lane.b32.xlu0 %v4032_v37, %s3403_s27 }
 0x73e   : > { %1628 = vrot.lane.b32.xlu1 %v4034_v16, %s3403_s27 }
 0x740   : > { %1612 = vrot.lane.b32.xlu0 %v4032_v37, %s3404_s17 }
 0x742   : > { %1614 = vrot.lane.b32.xlu1 %v4034_v16, %s3404_s17 }
 0x744   : > { %1598 = vrot.lane.b32.xlu0 %v4032_v37, %s3405_s18 }
 0x746   : > { %1600 = vrot.lane.b32.xlu1 %v4034_v16, %s3405_s18 }
 0x748   : > { %1582 = vrot.lane.b32.xlu0 %v4032_v37, %s3406_s19 }
 0x74a   : > { %1584 = vrot.lane.b32.xlu1 %v4034_v16, %s3406_s19 }
 0x74c   : > { %1568 = vrot.lane.b32.xlu0 %v4032_v37, %s3407_s20 }
 0x74e   : > { %1570 = vrot.lane.b32.xlu1 %v4034_v16, %s3407_s20 }
 0x750   : > { %1554 = vrot.lane.b32.xlu0 %v4032_v37, %s3408_s21 }
 0x752   : > { %1556 = vrot.lane.b32.xlu1 %v4034_v16, %s3408_s21 }
 0x754   : > { %1540 = vrot.lane.b32.xlu0 %v4032_v37, %s3409_s22 }
 0x756   : > { %1542 = vrot.lane.b32.xlu1 %v4034_v16, %s3409_s22 }
 0x758   : > { %1678 = vperm.xlu0 %3316, %v3183_v38  }
 0x7aa   : > { %v1641_v42 = vpop.permute.xlu0 %1640 }
 0x7ac   : > { %v1643_v22 = vpop.permute.xlu1 %1642 }
 0x7ad   : > { %v1645_v21 = vsel %vm1644_vm14, %v1641_v42, %v1643_v22  ;;  %v1646_v46 = vsel %vm1644_vm14, %v1643_v22, %v1641_v42  ;;  %v4196_v22 = vld [vmem:[%s4665_s4 + $0x90] sm:$0xff] }
 0x7ae   : > { %v1650_v49 = vmul.f32 %v4075_v44, %v1645_v21  ;;  %v1651_v50 = vmul.f32 %v4080_v45, %v1646_v46  ;;  %v1627_v32 = vpop.permute.xlu0 %1626  ;;  %v4201_v21 = vld [vmem:[%s4665_s4 + $0x98] sm:$0xff] }
 0x7b0   : > { %v1629_v52 = vpop.permute.xlu1 %1628  ;;  %1698 = vmatprep.subr.mxu1 %v1651_v50 }
 0x7b1   : > { %v1631_v40 = vsel %vm1630_vm15, %v1627_v32, %v1629_v52  ;;  %v1632_v53 = vsel %vm1630_vm15, %v1629_v52, %v1627_v32  ;;  %1699 = vmatpush1.msra.mxu1 %v1650_v49 }
 0x7b2   : > { %v1636_v54 = vmul.f32 %v4092_v31, %v1631_v40  ;;  %v1637_v39 = vmul.f32 %v4097_v51, %v1632_v53  ;;  %v1613_v57 = vpop.permute.xlu0 %1612  ;;  %v1655_v53 = vld [vmem:[#allocation3 + $0x20] sm:$0xff] }
 0x7b4   : > { %v1615_v60 = vpop.permute.xlu1 %1614  ;;  %1700 = vmatprep.subr.mxu1 %v1637_v39 }
 0x7b5   : > { %v1617_v61 = vsel %vm1616_vm9, %v1613_v57, %v1615_v60  ;;  %v1618_v47 = vsel %vm1616_vm9, %v1615_v60, %v1613_v57  ;;  %1701 = vmatpush1.msra.mxu1 %v1636_v54 }
 0x7b6   : > { %v1622_v48 = vmul.f32 %v4109_v58, %v1617_v61  ;;  %v1623_v62 = vmul.f32 %v4114_v59, %v1618_v47  ;;  %v1599_v3 = vpop.permute.xlu0 %1598 }
 0x7b8   : > { %v1601_v56 = vpop.permute.xlu1 %1600  ;;  %1702 = vmatprep.subr.mxu1 %v1623_v62 }
 0x7b9   : > { %v1603_v8 = vsel %vm1602_vm11, %v1599_v3, %v1601_v56  ;;  %v1604_v11 = vsel %vm1602_vm11, %v1601_v56, %v1599_v3  ;;  %1703 = vmatpush1.msra.mxu1 %v1622_v48  ;;  %v3201_v56 = vld [vmem:[%s4664_s3 + $0x28] sm:$0xff] }
 0x7ba   : > { %v1608_v12 = vmul.f32 %v4126_v5, %v1603_v8  ;;  %v1609_v63 = vmul.f32 %v4131_v55, %v1604_v11  ;;  %v1583_v0 = vpop.permute.xlu0 %1582 }
 0x7bc   : > { %v1585_v15 = vpop.permute.xlu1 %1584  ;;  %1704 = vmatprep.subr.mxu1 %v1609_v63 }
 0x7bd   : > { %v1587_v17 = vsel %vm1586_vm12, %v1583_v0, %v1585_v15  ;;  %v1588_v18 = vsel %vm1586_vm12, %v1585_v15, %v1583_v0  ;;  %1705 = vmatpush1.msra.mxu1 %v1608_v12 }
 0x7be   : > { %v1592_v23 = vmul.f32 %v4143_v13, %v1588_v18  ;;  %v1593_v25 = vmul.f32 %v4148_v14, %v1587_v17  ;;  %1706 = vmatprep.subr.mxu1 %v4034_v16  ;;  %v1569_v26 = vpop.permute.xlu0 %1568 }
 0x7bf   : > { %1707 = vmatpush1.msra.mxu1 %v4032_v37 }
 0x7c0   : > { %v1571_v29 = vpop.permute.xlu1 %1570  ;;  %1708 = vmatprep.subr.mxu1 %v1593_v25 }
 0x7c1   : > { %v1573_v30 = vsel %vm1572_vm13, %v1569_v26, %v1571_v29  ;;  %v1574_v33 = vsel %vm1572_vm13, %v1571_v29, %v1569_v26  ;;  %1709 = vmatpush1.msra.mxu1 %v1592_v23 }
 0x7c2   : > { %v1578_v10 = vmul.f32 %v4162_v27, %v1574_v33  ;;  %v1579_v4 = vmul.f32 %v4167_v28, %v1573_v30  ;;  %v1555_v1 = vpop.permute.xlu0 %1554 }
 0x7c4   : > { %v1557_v35 = vpop.permute.xlu1 %1556  ;;  %1710 = vmatprep.subr.mxu1 %v1579_v4 }
 0x7c5   : > { %v1559_v36 = vsel %vm1558_vm10, %v1555_v1, %v1557_v35  ;;  %v1560_v20 = vsel %vm1558_vm10, %v1557_v35, %v1555_v1  ;;  %1711 = vmatpush1.msra.mxu1 %v1578_v10 }
 0x7c6   : > { %v1564_v38 = vmul.f32 %v4179_v9, %v1560_v20  ;;  %v1565_v42 = vmul.f32 %v4184_v43, %v1559_v36  ;;  %v1541_v46 = vpop.permute.xlu0 %1540 }
 0x7c8   : > { %v1543_v49 = vpop.permute.xlu1 %1542  ;;  %1712 = vmatprep.subr.mxu1 %v1565_v42 }
 0x7c9   : > { %v1545_v50 = vsel %vm1544_vm7, %v1541_v46, %v1543_v49  ;;  %v1546_v32 = vsel %vm1544_vm7, %v1543_v49, %v1541_v46  ;;  %1713 = vmatpush1.msra.mxu1 %v1564_v38 }
 0x7ca   : > { %v1550_v52 = vmul.f32 %v4196_v22, %v1546_v32  ;;  %v1551_v40 = vmul.f32 %v4201_v21, %v1545_v50 }
 0x7cc   : > { %1714 = vmatprep.subr.mxu1 %v1551_v40 }
 0x7cd   : > { %1715 = vmatpush1.msra.mxu1 %v1550_v52 }
 0x7ce   : > { %3184 = vmatmul.mubr.msk.f32.vlgmr.msra.gmra.mxu1 %vm554_vm8, %v1655_v53 }
 0x7cf   : > { %2158 = vmatprep.mubr.f32.mxu1 %v3397_v2 }
 0x7d3   : > { %v1679_v54 = vpop.permute.xlu0 %1678 }
 0x88e   : > { %v1750_v39 = vpop.f32.mrf.mxu1 }
 0x88f   : > { %v1751_v57 = vadd.f32 %v1750_v39, %v1679_v54 }
 0x890   : > { %v1752_v60 = vpop.f32.mrf.mxu1 }
 0x891   : > { %vm1755_vm6 = vcmp.ge.f32.partialorder %v1751_v57, 0.0  ;;  %v1757_v61 = vmul.f32 0.2, %v1751_v57  ;;  %v1753_v47 = vadd.f32 %v1752_v60, %v1679_v54 }
 0x893   : > { %v4211_v48 = vsel %vm1755_vm6, %v1751_v57, %v1757_v61  ;;  %vm1756_vm5 = vcmp.ge.f32.partialorder %v1753_v47, 0.0  ;;  %v1758_v62 = vmul.f32 0.2, %v1753_v47 }
 0x894   : > { %1847 = vrot.lane.b32.xlu1 %v4211_v48, %s3402_s26 }
 0x895   : > { %v4215_v3 = vsel %vm1756_vm5, %v1753_v47, %v1758_v62  ;;  %vm4691_vm5 = vcmp.lt.s32.totalorder %v3564_v6, 15 }
 0x896   : > { %1849 = vrot.lane.b32.xlu0 %v4215_v3, %s3402_s26  ;;  %vm4692_vm6 = vmmov %vm4691_vm5 }
 0x898   : > { %1835 = vrot.lane.b32.xlu1 %v4211_v48, %s3403_s27 }
 0x89a   : > { %1837 = vrot.lane.b32.xlu0 %v4215_v3, %s3403_s27 }
 0x89c   : > { %1823 = vrot.lane.b32.xlu1 %v4211_v48, %s3404_s17 }
 0x89e   : > { %1825 = vrot.lane.b32.xlu0 %v4215_v3, %s3404_s17 }
 0x8a0   : > { %1811 = vrot.lane.b32.xlu1 %v4211_v48, %s3405_s18 }
 0x8a2   : > { %1813 = vrot.lane.b32.xlu0 %v4215_v3, %s3405_s18 }
 0x8a4   : > { %1797 = vrot.lane.b32.xlu1 %v4211_v48, %s3406_s19 }
 0x8a6   : > { %1799 = vrot.lane.b32.xlu0 %v4215_v3, %s3406_s19 }
 0x8a8   : > { %1785 = vrot.lane.b32.xlu1 %v4211_v48, %s3407_s20 }
 0x8aa   : > { %1787 = vrot.lane.b32.xlu0 %v4215_v3, %s3407_s20 }
 0x8ac   : > { %1773 = vrot.lane.b32.xlu1 %v4211_v48, %s3408_s21 }
 0x8ae   : > { %1775 = vrot.lane.b32.xlu0 %v4215_v3, %s3408_s21 }
 0x8b0   : > { %1761 = vrot.lane.b32.xlu1 %v4211_v48, %s3409_s22 }
 0x8b2   : > { %1763 = vrot.lane.b32.xlu0 %v4215_v3, %s3409_s22 }
 0x8b4   : > { %1883 = vperm.xlu1 %3317, %v3201_v56  }
 0x8b6   : > { %2257 = vrot.lane.b32.xlu0 %v4032_v37, %s3393_s11 }
 0x8b8   : > { %2259 = vrot.lane.b32.xlu1 %v4034_v16, %s3393_s11 }
 0x8ba   : > { %2245 = vrot.lane.b32.xlu0 %v4032_v37, %s3392_s29 }
 0x8bc   : > { %2247 = vrot.lane.b32.xlu1 %v4034_v16, %s3392_s29 }
 0x8be   : > { %2233 = vrot.lane.b32.xlu0 %v4032_v37, %s3394_s10 }
 0x8c0   : > { %2235 = vrot.lane.b32.xlu1 %v4034_v16, %s3394_s10 }
 0x8c2   : > { %2221 = vrot.lane.b32.xlu0 %v4032_v37, %s4683_s12 }
 0x8c4   : > { %2223 = vrot.lane.b32.xlu1 %v4034_v16, %s4683_s12 }
 0x8c6   : > { %2207 = vrot.lane.b32.xlu0 %v4032_v37, %s4688_s15 }
 0x8c8   : > { %2209 = vrot.lane.b32.xlu1 %v4034_v16, %s4688_s15 }
 0x8ca   : > { %2195 = vrot.lane.b32.xlu0 %v4032_v37, %s4689_s16 }
 0x8cc   : > { %2197 = vrot.lane.b32.xlu1 %v4034_v16, %s4689_s16 }
 0x8ce   : > { %2183 = vrot.lane.b32.xlu0 %v4032_v37, %s4690_s13 }
 0x8d0   : > { %2185 = vrot.lane.b32.xlu1 %v4034_v16, %s4690_s13 }
 0x906   : > { %v1848_v8 = vpop.permute.xlu1 %1847 }
 0x908   : > { %v1850_v11 = vpop.permute.xlu0 %1849 }
 0x909   : > { %v1851_v12 = vsel %vm1644_vm14, %v1848_v8, %v1850_v11  ;;  %v1852_v63 = vsel %vm1644_vm14, %v1850_v11, %v1848_v8 }
 0x90a   : > { %v1855_v0 = vmul.f32 %v4075_v44, %v1851_v12  ;;  %v1856_v15 = vmul.f32 %v4080_v45, %v1852_v63  ;;  %v1836_v17 = vpop.permute.xlu1 %1835 }
 0x90c   : > { %v1838_v18 = vpop.permute.xlu0 %1837  ;;  %1903 = vmatprep.subr.mxu0 %v1856_v15 }
 0x90d   : > { %v1839_v23 = vsel %vm1630_vm15, %v1836_v17, %v1838_v18  ;;  %v1840_v25 = vsel %vm1630_vm15, %v1838_v18, %v1836_v17  ;;  %1904 = vmatpush1.msra.mxu0 %v1855_v0 }
 0x90e   : > { %v1843_v26 = vmul.f32 %v4092_v31, %v1839_v23  ;;  %v1844_v29 = vmul.f32 %v4097_v51, %v1840_v25  ;;  %v1824_v30 = vpop.permute.xlu1 %1823 }
 0x910   : > { %v1826_v33 = vpop.permute.xlu0 %1825  ;;  %1905 = vmatprep.subr.mxu0 %v1844_v29  ;;  %v1860_v29 = vld [vmem:[#allocation3 + $0x28] sm:$0xff] }
 0x911   : > { %v1827_v10 = vsel %vm1616_vm9, %v1824_v30, %v1826_v33  ;;  %v1828_v4 = vsel %vm1616_vm9, %v1826_v33, %v1824_v30  ;;  %1906 = vmatpush1.msra.mxu0 %v1843_v26 }
 0x912   : > { %v1831_v1 = vmul.f32 %v4109_v58, %v1827_v10  ;;  %v1832_v35 = vmul.f32 %v4114_v59, %v1828_v4  ;;  %v1812_v36 = vpop.permute.xlu1 %1811  ;;  %v4335_v4 = vld [vmem:[%s4665_s4 + $0x80] sm:$0xff] }
 0x914   : > { %v1814_v20 = vpop.permute.xlu0 %1813  ;;  %1907 = vmatprep.subr.mxu0 %v1832_v35 }
 0x915   : > { %v1815_v38 = vsel %vm1602_vm11, %v1812_v36, %v1814_v20  ;;  %v1816_v42 = vsel %vm1602_vm11, %v1814_v20, %v1812_v36  ;;  %1908 = vmatpush1.msra.mxu0 %v1831_v1  ;;  %v4340_v1 = vld [vmem:[%s4665_s4 + $0x88] sm:$0xff] }
 0x916   : > { %v1819_v46 = vmul.f32 %v4126_v5, %v1815_v38  ;;  %v1820_v49 = vmul.f32 %v4131_v55, %v1816_v42  ;;  %v1798_v50 = vpop.permute.xlu1 %1797 }
 0x918   : > { %v1800_v32 = vpop.permute.xlu0 %1799  ;;  %1909 = vmatprep.subr.mxu0 %v1820_v49  ;;  %v4351_v49 = vld [vmem:[%s4665_s4 + $0x70] sm:$0xff] }
 0x919   : > { %v1801_v52 = vsel %vm1586_vm12, %v1798_v50, %v1800_v32  ;;  %v1802_v40 = vsel %vm1586_vm12, %v1800_v32, %v1798_v50  ;;  %1910 = vmatpush1.msra.mxu0 %v1819_v46  ;;  %v4356_v50 = vld [vmem:[%s4665_s4 + $0x78] sm:$0xff] }
 0x91a   : > { %v1805_v53 = vmul.f32 %v4143_v13, %v1802_v40  ;;  %v1806_v54 = vmul.f32 %v4148_v14, %v1801_v52  ;;  %1911 = vmatprep.subr.mxu0 %v4215_v3  ;;  %v1786_v39 = vpop.permute.xlu1 %1785 }
 0x91b   : > { %1912 = vmatpush1.msra.mxu0 %v4211_v48 }
 0x91c   : > { %v1788_v57 = vpop.permute.xlu0 %1787  ;;  %1913 = vmatprep.subr.mxu0 %v1806_v54 }
 0x91d   : > { %v1789_v60 = vsel %vm1572_vm13, %v1786_v39, %v1788_v57  ;;  %v1790_v61 = vsel %vm1572_vm13, %v1788_v57, %v1786_v39  ;;  %1914 = vmatpush1.msra.mxu0 %v1805_v53  ;;  %v4367_v57 = vld [vmem:[%s4665_s4 + $0x60] sm:$0xff] }
 0x91e   : > { %v1793_v47 = vmul.f32 %v4162_v27, %v1790_v61  ;;  %v1794_v62 = vmul.f32 %v4167_v28, %v1789_v60  ;;  %v1774_v56 = vpop.permute.xlu1 %1773  ;;  %v4372_v60 = vld [vmem:[%s4665_s4 + $0x68] sm:$0xff] }
 0x920   : > { %v1776_v8 = vpop.permute.xlu0 %1775  ;;  %1915 = vmatprep.subr.mxu0 %v1794_v62 }
 0x921   : > { %v1777_v11 = vsel %vm1558_vm10, %v1774_v56, %v1776_v8  ;;  %v1778_v12 = vsel %vm1558_vm10, %v1776_v8, %v1774_v56  ;;  %1916 = vmatpush1.msra.mxu0 %v1793_v47 }
 0x922   : > { %v1781_v63 = vmul.f32 %v4179_v9, %v1778_v12  ;;  %v1782_v0 = vmul.f32 %v4184_v43, %v1777_v11  ;;  %v1762_v15 = vpop.permute.xlu1 %1761  ;;  %v4383_v11 = vld [vmem:[%s4665_s4 + $0x50] sm:$0xff]  ;;  %v4388_v12 = vld [vmem:[%s4665_s4 + $0x58] sm:$0xff] }
 0x924   : > { %v1764_v17 = vpop.permute.xlu0 %1763  ;;  %1917 = vmatprep.subr.mxu0 %v1782_v0 }
 0x925   : > { %v1765_v18 = vsel %vm1544_vm7, %v1762_v15, %v1764_v17  ;;  %v1766_v23 = vsel %vm1544_vm7, %v1764_v17, %v1762_v15  ;;  %1918 = vmatpush1.msra.mxu0 %v1781_v63 }
 0x926   : > { %v1769_v25 = vmul.f32 %v4196_v22, %v1766_v23  ;;  %v1770_v26 = vmul.f32 %v4201_v21, %v1765_v18 }
 0x928   : > { %v2258_v30 = vpop.permute.xlu0 %2257  ;;  %1919 = vmatprep.subr.mxu0 %v1770_v26  ;;  %v4404_v26 = vld [vmem:[%s4665_s4 + $0x38] sm:$0xff] }
 0x929   : > { %1920 = vmatpush1.msra.mxu0 %v1769_v25  ;;  %v4399_v25 = vld [vmem:[%s4665_s4 + $0x30] sm:$0xff] }
 0x92a   : > { %3202 = vmatmul.mubr.msk.f32.vlgmr.msra.gmra.mxu0 %vm554_vm8, %v1860_v29 }
 0x92b   : > { %2361 = vmatprep.mubr.f32.mxu0 %v3397_v2 }
 0x92c   : > { %v2246_v33 = vpop.permute.xlu0 %2245 }
 0x92f   : > { %v4330_v10 = vpop.permute.xlu1 %1883 }
 0x930   : > { %v2234_v35 = vpop.permute.xlu0 %2233 }
 0x933   : > { %v2260_v36 = vpop.permute.xlu1 %2259 }
 0x934   : > { %v2261_v20 = vsel %vm519_vm1, %v2258_v30, %v2260_v36  ;;  %v2262_v38 = vsel %vm519_vm1, %v2260_v36, %v2258_v30  ;;  %v2222_v53 = vpop.permute.xlu0 %2221 }
 0x935   : > { %v2265_v42 = vmul.f32 %v4335_v4, %v2261_v20  ;;  %v2266_v46 = vmul.f32 %v4340_v1, %v2262_v38  ;;  %v4417_v38 = vld [vmem:[%s4665_s4 + $0x20] sm:$0xff] }
 0x937   : > { %2311 = vmatprep.subr.mxu0 %v2266_v46  ;;  %v2248_v32 = vpop.permute.xlu1 %2247 }
 0x938   : > { %v2249_v52 = vsel %vm505_vm0, %v2246_v33, %v2248_v32  ;;  %v2250_v40 = vsel %vm505_vm0, %v2248_v32, %v2246_v33  ;;  %2312 = vmatpush1.msra.mxu0 %v2265_v42  ;;  %v2208_v63 = vpop.permute.xlu0 %2207  ;;  %v4422_v42 = vld [vmem:[%s4665_s4 + $0x28] sm:$0xff] }
 0x939   : > { %v2253_v54 = vmul.f32 %v4351_v49, %v2249_v52  ;;  %v2254_v39 = vmul.f32 %v4356_v50, %v2250_v40 }
 0x93b   : > { %2313 = vmatprep.subr.mxu0 %v2254_v39  ;;  %v2236_v61 = vpop.permute.xlu1 %2235  ;;  %v4438_v39 = vld [vmem:[%s4665_s4 + $0x18] sm:$0xff] }
 0x93c   : > { %v2237_v47 = vsel %vm491_vm2, %v2234_v35, %v2236_v61  ;;  %v2238_v62 = vsel %vm491_vm2, %v2236_v61, %v2234_v35  ;;  %2314 = vmatpush1.msra.mxu0 %v2253_v54  ;;  %v2196_v35 = vpop.permute.xlu0 %2195  ;;  %v4433_v54 = vld [vmem:[%s4665_s4 + $0x10] sm:$0xff] }
 0x93d   : > { %v2241_v56 = vmul.f32 %v4367_v57, %v2237_v47  ;;  %v2242_v8 = vmul.f32 %v4372_v60, %v2238_v62 }
 0x93f   : > { %2315 = vmatprep.subr.mxu0 %v2242_v8  ;;  %v2224_v0 = vpop.permute.xlu1 %2223 }
 0x940   : > { %v2225_v15 = vsel %vm477_vm3, %v2222_v53, %v2224_v0  ;;  %v2226_v17 = vsel %vm477_vm3, %v2224_v0, %v2222_v53  ;;  %2316 = vmatpush1.msra.mxu0 %v2241_v56  ;;  %v2184_v61 = vpop.permute.xlu0 %2183 }
 0x941   : > { %v2229_v18 = vmul.f32 %v4383_v11, %v2225_v15  ;;  %v2230_v23 = vmul.f32 %v4388_v12, %v2226_v17 }
 0x943   : > { %2317 = vmatprep.subr.mxu0 %v2230_v23  ;;  %v2210_v29 = vpop.permute.xlu1 %2209 }
 0x944   : > { %v2211_v30 = vsel %vm4685_vm4, %v2208_v63, %v2210_v29  ;;  %v2212_v33 = vsel %vm4685_vm4, %v2210_v29, %v2208_v63  ;;  %2318 = vmatpush1.msra.mxu0 %v2229_v18 }
 0x945   : > { %v2215_v36 = vmul.f32 %v4399_v25, %v2212_v33  ;;  %v2216_v20 = vmul.f32 %v4404_v26, %v2211_v30  ;;  %2319 = vmatprep.subr.mxu0 %v4034_v16 }
 0x946   : > { %2320 = vmatpush1.msra.mxu0 %v4032_v37 }
 0x947   : > { %2321 = vmatprep.subr.mxu0 %v2216_v20  ;;  %v2198_v46 = vpop.permute.xlu1 %2197 }
 0x948   : > { %v2199_v32 = vsel %vm4691_vm5, %v2196_v35, %v2198_v46  ;;  %v2200_v52 = vsel %vm4692_vm6, %v2198_v46, %v2196_v35  ;;  %2322 = vmatpush1.msra.mxu0 %v2215_v36  ;;  %vm4693_vm5 = vcmp.lt.s32.totalorder %v3564_v6, 16  ;;  %v3237_v35 = vld [vmem:[%s4664_s3 + $0x58] sm:$0xff]  ;;  %v3239_v36 = vld [vmem:[%s4664_s3 + $0x60] sm:$0xff] }
 0x949   : > { %v2203_v40 = vmul.f32 %v4417_v38, %v2200_v52  ;;  %v2204_v53 = vmul.f32 %v4422_v42, %v2199_v32  ;;  %vm4694_vm6 = vmmov %vm4693_vm5 }
 0x94b   : > { %2323 = vmatprep.subr.mxu0 %v2204_v53  ;;  %v2186_v47 = vpop.permute.xlu1 %2185 }
 0x94c   : > { %v2187_v62 = vsel %vm4693_vm5, %v2184_v61, %v2186_v47  ;;  %v2188_v56 = vsel %vm4694_vm6, %v2186_v47, %v2184_v61  ;;  %2324 = vmatpush1.msra.mxu0 %v2203_v40 }
 0x94d   : > { %v2191_v8 = vmul.f32 %v4433_v54, %v2188_v56  ;;  %v2192_v63 = vmul.f32 %v4438_v39, %v2187_v62 }
 0x94f   : > { %2325 = vmatprep.subr.mxu0 %v2192_v63 }
 0x950   : > { %2326 = vmatpush1.msra.mxu0 %v2191_v8 }
 0x9ea   : > { %v1955_v0 = vpop.f32.mrf.mxu0 }
 0x9eb   : > { %v1956_v15 = vadd.f32 %v1955_v0, %v4330_v10 }
 0x9ec   : > { %v1957_v17 = vpop.f32.mrf.mxu0 }
 0x9ed   : > { %vm1960_vm4 = vcmp.ge.f32.partialorder %v1956_v15, 0.0  ;;  %v1962_v18 = vmul.f32 0.2, %v1956_v15  ;;  %v1958_v23 = vadd.f32 %v1957_v17, %v4330_v10  ;;  %v3219_v10 = vld [vmem:[%s4664_s3 + $0x30] sm:$0xff] }
 0x9ef   : > { %v4448_v29 = vsel %vm1960_vm4, %v1956_v15, %v1962_v18  ;;  %vm1961_vm5 = vcmp.ge.f32.partialorder %v1958_v23, 0.0  ;;  %v1963_v30 = vmul.f32 0.2, %v1958_v23  ;;  %vm4696_vm4 = vcmp.lt.s32.totalorder %v3564_v6, 17 }
 0x9f0   : > { %2052 = vrot.lane.b32.xlu0 %v4448_v29, %s3402_s26 }
 0x9f1   : > { %v4452_v33 = vsel %vm1961_vm5, %v1958_v23, %v1963_v30  ;;  %vm4705_vm5 = vmmov %vm4696_vm4 }
 0x9f2   : > { %2054 = vrot.lane.b32.xlu1 %v4452_v33, %s3402_s26  ;;  %s4695_s26 = smov 17  }
 0x9f4   : > { %2040 = vrot.lane.b32.xlu0 %v4448_v29, %s3403_s27 }
 0x9f6   : > { %2042 = vrot.lane.b32.xlu1 %v4452_v33, %s3403_s27 }
 0x9f8   : > { %2028 = vrot.lane.b32.xlu0 %v4448_v29, %s3404_s17 }
 0x9fa   : > { %2030 = vrot.lane.b32.xlu1 %v4452_v33, %s3404_s17 }
 0x9fc   : > { %2016 = vrot.lane.b32.xlu0 %v4448_v29, %s3405_s18 }
 0x9fe   : > { %2018 = vrot.lane.b32.xlu1 %v4452_v33, %s3405_s18 }
 0xa00   : > { %2002 = vrot.lane.b32.xlu0 %v4448_v29, %s3406_s19 }
 0xa02   : > { %2004 = vrot.lane.b32.xlu1 %v4452_v33, %s3406_s19 }
 0xa04   : > { %1990 = vrot.lane.b32.xlu0 %v4448_v29, %s3407_s20 }
 0xa06   : > { %1992 = vrot.lane.b32.xlu1 %v4452_v33, %s3407_s20 }
 0xa08   : > { %1978 = vrot.lane.b32.xlu0 %v4448_v29, %s3408_s21 }
 0xa0a   : > { %1980 = vrot.lane.b32.xlu1 %v4452_v33, %s3408_s21 }
 0xa0c   : > { %1966 = vrot.lane.b32.xlu0 %v4448_v29, %s3409_s22 }
 0xa0e   : > { %1968 = vrot.lane.b32.xlu1 %v4452_v33, %s3409_s22 }
 0xa10   : > { %2171 = vrot.lane.b32.xlu0 %v4032_v37, %s4695_s26 }
 0xa12   : > { %2173 = vrot.lane.b32.xlu1 %v4034_v16, %s4695_s26 }
 0xa14   : > { %2088 = vperm.xlu0 %3316, %v3219_v10  }
 0xa16   : > { %2291 = vperm.xlu1 %3317, %v3946_v7  }
 0xa18   : > { %2390 = vperm.xlu0 %3316, %v3237_v35  }
 0xa1a   : > { %2493 = vperm.xlu1 %3317, %v3239_v36  }
 0xa62   : > { %v2053_v20 = vpop.permute.xlu0 %2052 }
 0xa64   : > { %v2055_v46 = vpop.permute.xlu1 %2054 }
 0xa65   : > { %v2056_v32 = vsel %vm1644_vm14, %v2053_v20, %v2055_v46  ;;  %v2057_v52 = vsel %vm1644_vm14, %v2055_v46, %v2053_v20 }
 0xa66   : > { %v2060_v40 = vmul.f32 %v4075_v44, %v2056_v32  ;;  %v2061_v53 = vmul.f32 %v4080_v45, %v2057_v52  ;;  %v2041_v61 = vpop.permute.xlu0 %2040 }
 0xa68   : > { %2108 = vmatprep.subr.mxu1 %v2061_v53  ;;  %v2043_v7 = vpop.permute.xlu1 %2042 }
 0xa69   : > { %v2044_v47 = vsel %vm1630_vm15, %v2041_v61, %v2043_v7  ;;  %v2045_v62 = vsel %vm1630_vm15, %v2043_v7, %v2041_v61  ;;  %2109 = vmatpush1.msra.mxu1 %v2060_v40  ;;  %vm4698_vm15 = vcmask 261120  }
 0xa6a   : > { %v2048_v56 = vmul.f32 %v4092_v31, %v2044_v47  ;;  %v2049_v8 = vmul.f32 %v4097_v51, %v2045_v62  ;;  %v2029_v63 = vpop.permute.xlu0 %2028 }
 0xa6c   : > { %2110 = vmatprep.subr.mxu1 %v2049_v8  ;;  %v2031_v0 = vpop.permute.xlu1 %2030 }
 0xa6d   : > { %v2032_v44 = vsel %vm1616_vm9, %v2029_v63, %v2031_v0  ;;  %v2033_v45 = vsel %vm1616_vm9, %v2031_v0, %v2029_v63  ;;  %2111 = vmatpush1.msra.mxu1 %v2048_v56 }
 0xa6e   : > { %v2036_v15 = vmul.f32 %v4109_v58, %v2032_v44  ;;  %v2037_v17 = vmul.f32 %v4114_v59, %v2033_v45  ;;  %v2017_v18 = vpop.permute.xlu0 %2016  ;;  %v2065_v44 = vld [vmem:[#allocation3 + $0x30] sm:$0xff] }
 0xa70   : > { %2112 = vmatprep.subr.mxu1 %v2037_v17  ;;  %v2019_v23 = vpop.permute.xlu1 %2018 }
 0xa71   : > { %v2020_v31 = vsel %vm1602_vm11, %v2017_v18, %v2019_v23  ;;  %v2021_v51 = vsel %vm1602_vm11, %v2019_v23, %v2017_v18  ;;  %2113 = vmatpush1.msra.mxu1 %v2036_v15  ;;  %v2269_v23 = vld [vmem:[#allocation3 + $0x40] sm:$0xff] }
 0xa72   : > { %v2024_v30 = vmul.f32 %v4126_v5, %v2020_v31  ;;  %v2025_v10 = vmul.f32 %v4131_v55, %v2021_v51  ;;  %v2003_v35 = vpop.permute.xlu0 %2002 }
 0xa74   : > { %2114 = vmatprep.subr.mxu1 %v2025_v10  ;;  %v2005_v36 = vpop.permute.xlu1 %2004 }
 0xa75   : > { %v2006_v58 = vsel %vm1586_vm12, %v2003_v35, %v2005_v36  ;;  %v2007_v59 = vsel %vm1586_vm12, %v2005_v36, %v2003_v35  ;;  %2115 = vmatpush1.msra.mxu1 %v2024_v30  ;;  %vm2496_vm12 = vcmask 195584  }
 0xa76   : > { %v2010_v20 = vmul.f32 %v4143_v13, %v2007_v59  ;;  %v2011_v46 = vmul.f32 %v4148_v14, %v2006_v58  ;;  %v1991_v32 = vpop.permute.xlu0 %1990  ;;  %2116 = vmatprep.subr.mxu1 %v4452_v33 }
 0xa77   : > { %2117 = vmatpush1.msra.mxu1 %v4448_v29 }
 0xa78   : > { %2118 = vmatprep.subr.mxu1 %v2011_v46  ;;  %v1993_v5 = vpop.permute.xlu1 %1992 }
 0xa79   : > { %v1994_v55 = vsel %vm1572_vm13, %v1991_v32, %v1993_v5  ;;  %v1995_v52 = vsel %vm1572_vm13, %v1993_v5, %v1991_v32  ;;  %2119 = vmatpush1.msra.mxu1 %v2010_v20  ;;  %vm4704_vm13 = vmmov %vm4694_vm6 }
 0xa7a   : > { %v1998_v40 = vmul.f32 %v4162_v27, %v1995_v52  ;;  %v1999_v13 = vmul.f32 %v4167_v28, %v1994_v55  ;;  %v1979_v53 = vpop.permute.xlu0 %1978 }
 0xa7c   : > { %2120 = vmatprep.subr.mxu1 %v1999_v13  ;;  %v1981_v14 = vpop.permute.xlu1 %1980 }
 0xa7d   : > { %v1982_v61 = vsel %vm1558_vm10, %v1979_v53, %v1981_v14  ;;  %v1983_v7 = vsel %vm1558_vm10, %v1981_v14, %v1979_v53  ;;  %2121 = vmatpush1.msra.mxu1 %v1998_v40  ;;  %v2377_v40 = vld [vmem:[#allocation5 + $0x10] sm:$0xff] }
 0xa7e   : > { %v1986_v47 = vmul.f32 %v4179_v9, %v1983_v7  ;;  %v1987_v62 = vmul.f32 %v4184_v43, %v1982_v61  ;;  %v1967_v56 = vpop.permute.xlu0 %1966  ;;  %v4551_v9 = vld [vmem:[%s4665_s4] sm:$0xff]  ;;  %v4556_v43 = vld [vmem:[%s4665_s4 + $0x8] sm:$0xff] }
 0xa80   : > { %2122 = vmatprep.subr.mxu1 %v1987_v62  ;;  %v1969_v8 = vpop.permute.xlu1 %1968 }
 0xa81   : > { %v1970_v27 = vsel %vm1544_vm7, %v1967_v56, %v1969_v8  ;;  %v1971_v28 = vsel %vm1544_vm7, %v1969_v8, %v1967_v56  ;;  %2123 = vmatpush1.msra.mxu1 %v1986_v47  ;;  %vm4697_vm7 = vmmov %vm4696_vm4 }
 0xa82   : > { %v1974_v63 = vmul.f32 %v4196_v22, %v1971_v28  ;;  %v1975_v0 = vmul.f32 %v4201_v21, %v1970_v27  ;;  %v2172_v45 = vpop.permute.xlu0 %2171 }
 0xa84   : > { %2124 = vmatprep.subr.mxu1 %v1975_v0  ;;  %v2174_v15 = vpop.permute.xlu1 %2173 }
 0xa85   : > { %v2175_v17 = vsel %vm4696_vm4, %v2172_v45, %v2174_v15  ;;  %v2176_v22 = vsel %vm4697_vm7, %v2174_v15, %v2172_v45  ;;  %2125 = vmatpush1.msra.mxu1 %v1974_v63 }
 0xa86   : > { %v2179_v21 = vmul.f32 %v4551_v9, %v2176_v22  ;;  %v2180_v18 = vmul.f32 %v4556_v43, %v2175_v17  ;;  %3220 = vmatmul.mubr.msk.f32.vlgmr.msra.gmra.mxu1 %vm554_vm8, %v2065_v44 }
 0xa87   : > { %2460 = vmatprep.mubr.f32.mxu1 %v3397_v2 }
 0xa88   : > { %2327 = vmatprep.subr.mxu0 %v2180_v18 }
 0xa89   : > { %2328 = vmatpush1.msra.mxu0 %v2179_v21 }
 0xa8a   : > { %3236 = vmatmul.mubr.msk.f32.vlgmr.msra.gmra.mxu0 %vm554_vm8, %v2269_v23 }
 0xa8b   : > { %2564 = vmatprep.mubr.f32.mxu0 %v3397_v2 }
 0xa8f   : > { %v2089_v51 = vpop.permute.xlu0 %2088 }
 0xa91   : > { %v2292_v58 = vpop.permute.xlu1 %2291 }
 0xa93   : > { %v2391_v13 = vpop.permute.xlu0 %2390 }
 0xa95   : > { %v2494_v8 = vpop.permute.xlu1 %2493 }
 0xb46   : > { %v2160_v31 = vpop.f32.mrf.mxu1 }
 0xb47   : > { %v2161_v10 = vadd.f32 %v2160_v31, %v2089_v51 }
 0xb48   : > { %v2162_v30 = vpop.f32.mrf.mxu1 }
 0xb49   : > { %v2163_v35 = vadd.f32 %v2162_v30, %v2089_v51  ;;  %v2167_v46 = vmul.f32 0.2, %v2161_v10  ;;  %vm2165_vm14 = vcmp.ge.f32.partialorder %v2161_v10, 0.0 }
 0xb4a   : > { %v2363_v36 = vpop.f32.mrf.mxu0 }
 0xb4b   : > { %v2168_v59 = vmul.f32 0.2, %v2163_v35  ;;  %vm2166_vm10 = vcmp.ge.f32.partialorder %v2163_v35, 0.0  ;;  %v2364_v5 = vadd.f32 %v2363_v36, %v2292_v58  ;;  %v2169_v52 = vsel %vm2165_vm14, %v2161_v10, %v2167_v46 }
 0xb4c   : > { %v2365_v20 = vpop.f32.mrf.mxu0  ;;  %vm2789_vm14 = vcmask 64512  }
 0xb4d   : > { %v2366_v32 = vadd.f32 %v2365_v20, %v2292_v58  ;;  %v2170_v55 = vsel %vm2166_vm10, %v2163_v35, %v2168_v59 }
 0xb4f   : > { %2420 = vmatprep.subr.mxu1 %v2366_v32 }
 0xb50   : > { %2421 = vmatpush1.msra.mxu1 %v2364_v5 }
 0xb51   : > { %2422 = vmatprep.subr.mxu1 %v2170_v55 }
 0xb52   : > { %2423 = vmatpush1.msra.mxu1 %v2169_v52 }
 0xb53   : > { %2424 = vmatprep.subr.mxu1 %v4452_v33 }
 0xb54   : > { %2425 = vmatpush1.msra.mxu1 %v4448_v29 }
 0xb55   : > { %2426 = vmatprep.subr.mxu1 %v4215_v3 }
 0xb56   : > { %2427 = vmatpush1.msra.mxu1 %v4211_v48  ;;  %v2482_v48 = vld [vmem:[#allocation5 + $0x18] sm:$0xff] }
 0xb57   : > { %3238 = vmatmul.mubr.msk.f32.vlgmr.msra.gmra.mxu1 %vm4698_vm15, %v2377_v40 }
 0xb58   : > { %2763 = vmatprep.mubr.f32.mxu1 %v3397_v2 }
 0xc17   : > { %v2462_v53 = vpop.f32.mrf.mxu1 }
 0xc18   : > { %v2463_v14 = vadd.f32 %v2462_v53, %v2391_v13 }
 0xc19   : > { %v2464_v61 = vpop.f32.mrf.mxu1 }
 0xc1a   : > { %vm2467_vm9 = vcmp.ge.f32.partialorder %v2463_v14, 0.0  ;;  %v2469_v7 = vmul.f32 0.2, %v2463_v14  ;;  %v2465_v47 = vadd.f32 %v2464_v61, %v2391_v13 }
 0xc1c   : > { %vm2468_vm11 = vcmp.ge.f32.partialorder %v2465_v47, 0.0  ;;  %v2470_v33 = vmul.f32 0.2, %v2465_v47  ;;  %v2471_v62 = vsel %vm2467_vm9, %v2463_v14, %v2469_v7 }
 0xc1d   : > { %v2473_v3 = vadd.f32 %v2471_v62, %v4032_v37 }
 0xc1e   : > { %v2472_v29 = vsel %vm2468_vm11, %v2465_v47, %v2470_v33 }
 0xc1f   : > { %v2474_v56 = vadd.f32 %v2472_v29, %v4034_v16  ;;  %v2670_v29 = vld [vmem:[#allocation3 + $0x38] sm:$0xff] }
 0xc21   : > { %2526 = vmatprep.subr.mxu0 %v2474_v56 }
 0xc22   : > { %2527 = vmatpush1.msra.mxu0 %v2473_v3 }
 0xc23   : > { %2528 = vmatprep.subr.mxu0 %v4022_v34 }
 0xc24   : > { %2529 = vmatpush1.msra.mxu0 %v4025_v41 }
 0xc25   : > { %2530 = vmatprep.subr.mxu0 %v3712_v24 }
 0xc26   : > { %2531 = vmatpush1.msra.mxu0 %v3706_v19  ;;  %v3257_v19 = vld [vmem:[%s4664_s3 + $0x68] sm:$0xff] }
 0xc27   : > { %3240 = vmatmul.mubr.msk.f32.vlgmr.msra.gmra.mxu0 %vm2496_vm12, %v2482_v48 }
 0xc28   : > { %2857 = vmatprep.mubr.f32.mxu0 %v3397_v2  ;;  %v3255_v2 = vld [vmem:[%s4664_s3 + $0x38] sm:$0xff] }
 0xce7   : > { %v2566_v27 = vpop.f32.mrf.mxu0 }
 0xce8   : > { %v2567_v16 = vadd.f32 %v2566_v27, %v2494_v8 }
 0xce9   : > { %v2568_v28 = vpop.f32.mrf.mxu0 }
 0xcea   : > { %v2569_v37 = vadd.f32 %v2568_v28, %v2494_v8  ;;  %2657 = vrot.lane.b32.xlu0 %v2567_v16, %s3393_s11 }
 0xcec   : > { %2659 = vrot.lane.b32.xlu1 %v2569_v37, %s3393_s11 }
 0xcee   : > { %2645 = vrot.lane.b32.xlu0 %v2567_v16, %s3392_s29 }
 0xcf0   : > { %2647 = vrot.lane.b32.xlu1 %v2569_v37, %s3392_s29 }
 0xcf2   : > { %2633 = vrot.lane.b32.xlu0 %v2567_v16, %s3394_s10 }
 0xcf4   : > { %2635 = vrot.lane.b32.xlu1 %v2569_v37, %s3394_s10 }
 0xcf6   : > { %2621 = vrot.lane.b32.xlu0 %v2567_v16, %s4699_s24 }
 0xcf8   : > { %2623 = vrot.lane.b32.xlu1 %v2569_v37, %s4699_s24 }
 0xcfa   : > { %2607 = vrot.lane.b32.xlu0 %v2567_v16, %s4688_s15 }
 0xcfc   : > { %2609 = vrot.lane.b32.xlu1 %v2569_v37, %s4688_s15 }
 0xcfe   : > { %2595 = vrot.lane.b32.xlu0 %v2567_v16, %s4689_s16 }
 0xd00   : > { %2597 = vrot.lane.b32.xlu1 %v2569_v37, %s4689_s16 }
 0xd02   : > { %2583 = vrot.lane.b32.xlu0 %v2567_v16, %s4690_s13 }
 0xd04   : > { %2585 = vrot.lane.b32.xlu1 %v2569_v37, %s4690_s13  ;;  %s391_s13 = scalar_lea.vmem %s4666_s5, %s3513_s25 }
 0xd06   : > { %2571 = vrot.lane.b32.xlu0 %v2567_v16, %s4695_s26 }
 0xd08   : > { %2573 = vrot.lane.b32.xlu1 %v2569_v37, %s4695_s26 }
 0xd0a   : > { %2693 = vperm.xlu0 %3316, %v3255_v2  }
 0xd0c   : > { %2786 = vperm.xlu1 %3317, %v3257_v19   ;;  %v3318_v19 = vld [vmem:[%s3519_s28] sm:$0xff] }
 0xd5c   : > { %v2658_v24 = vpop.permute.xlu0 %2657 }
 0xd5e   : > { %v2660_v34 = vpop.permute.xlu1 %2659 }
 0xd5f   : > { %v2661_v41 = vsel %vm519_vm1, %v2658_v24, %v2660_v34  ;;  %v2662_v63 = vsel %vm519_vm1, %v2660_v34, %v2658_v24 }
 0xd60   : > { %v2665_v0 = vmul.f32 %v4335_v4, %v2661_v41  ;;  %v2666_v44 = vmul.f32 %v4340_v1, %v2662_v63  ;;  %v2646_v45 = vpop.permute.xlu0 %2645  ;;  %v3319_v41 = vld [vmem:[%s3519_s28 + $0x8] sm:$0xff] }
 0xd62   : > { %v2648_v15 = vpop.permute.xlu1 %2647  ;;  %2713 = vmatprep.subr.mxu1 %v2666_v44 }
 0xd63   : > { %v2649_v17 = vsel %vm505_vm0, %v2646_v45, %v2648_v15  ;;  %v2650_v22 = vsel %vm505_vm0, %v2648_v15, %v2646_v45  ;;  %2714 = vmatpush1.msra.mxu1 %v2665_v0  ;;  %vm4700_vm0 = vcmp.lt.s32.totalorder %v3564_v6, 1 }
 0xd64   : > { %v2653_v21 = vmul.f32 %v4351_v49, %v2649_v17  ;;  %v2654_v18 = vmul.f32 %v4356_v50, %v2650_v22  ;;  %v2634_v23 = vpop.permute.xlu0 %2633  ;;  %vm4701_vm1 = vmmov %vm4700_vm0 }
 0xd66   : > { %v2636_v31 = vpop.permute.xlu1 %2635  ;;  %2715 = vmatprep.subr.mxu1 %v2654_v18 }
 0xd67   : > { %v2637_v4 = vsel %vm491_vm2, %v2634_v23, %v2636_v31  ;;  %v2638_v1 = vsel %vm491_vm2, %v2636_v31, %v2634_v23  ;;  %2716 = vmatpush1.msra.mxu1 %v2653_v21  ;;  %vm4702_vm2 = vcmp.lt.s32.totalorder %v3564_v6, 15 }
 0xd68   : > { %v2641_v51 = vmul.f32 %v4367_v57, %v2637_v4  ;;  %v2642_v30 = vmul.f32 %v4372_v60, %v2638_v1  ;;  %v2622_v10 = vpop.permute.xlu0 %2621 }
 0xd6a   : > { %v2624_v35 = vpop.permute.xlu1 %2623  ;;  %2717 = vmatprep.subr.mxu1 %v2642_v30 }
 0xd6b   : > { %v2625_v49 = vsel %vm477_vm3, %v2622_v10, %v2624_v35  ;;  %v2626_v50 = vsel %vm477_vm3, %v2624_v35, %v2622_v10  ;;  %2718 = vmatpush1.msra.mxu1 %v2641_v51  ;;  %vm4703_vm3 = vmmov %vm4702_vm2 }
 0xd6c   : > { %v2629_v36 = vmul.f32 %v4383_v11, %v2625_v49  ;;  %v2630_v58 = vmul.f32 %v4388_v12, %v2626_v50  ;;  %v2608_v59 = vpop.permute.xlu0 %2607 }
 0xd6e   : > { %v2610_v20 = vpop.permute.xlu1 %2609  ;;  %2719 = vmatprep.subr.mxu1 %v2630_v58 }
 0xd6f   : > { %v2611_v57 = vsel %vm4700_vm0, %v2608_v59, %v2610_v20  ;;  %v2612_v60 = vsel %vm4701_vm1, %v2610_v20, %v2608_v59  ;;  %2720 = vmatpush1.msra.mxu1 %v2629_v36 }
 0xd70   : > { %v2615_v46 = vmul.f32 %v4399_v25, %v2612_v60  ;;  %v2616_v32 = vmul.f32 %v4404_v26, %v2611_v57  ;;  %2721 = vmatprep.subr.mxu1 %v2569_v37  ;;  %v2596_v5 = vpop.permute.xlu0 %2595 }
 0xd71   : > { %2722 = vmatpush1.msra.mxu1 %v2567_v16 }
 0xd72   : > { %v2598_v11 = vpop.permute.xlu1 %2597  ;;  %2723 = vmatprep.subr.mxu1 %v2616_v32 }
 0xd73   : > { %v2599_v12 = vsel %vm4702_vm2, %v2596_v5, %v2598_v11  ;;  %v2600_v55 = vsel %vm4703_vm3, %v2598_v11, %v2596_v5  ;;  %2724 = vmatpush1.msra.mxu1 %v2615_v46 }
 0xd74   : > { %v2603_v52 = vmul.f32 %v4417_v38, %v2600_v55  ;;  %v2604_v40 = vmul.f32 %v4422_v42, %v2599_v12  ;;  %v2584_v13 = vpop.permute.xlu0 %2583 }
 0xd76   : > { %v2586_v25 = vpop.permute.xlu1 %2585  ;;  %2725 = vmatprep.subr.mxu1 %v2604_v40 }
 0xd77   : > { %v2587_v26 = vsel %vm4704_vm13, %v2584_v13, %v2586_v25  ;;  %v2588_v53 = vsel %vm4694_vm6, %v2586_v25, %v2584_v13  ;;  %2726 = vmatpush1.msra.mxu1 %v2603_v52 }
 0xd78   : > { %v2591_v14 = vmul.f32 %v4433_v54, %v2588_v53  ;;  %v2592_v61 = vmul.f32 %v4438_v39, %v2587_v26  ;;  %v2572_v7 = vpop.permute.xlu0 %2571 }
 0xd7a   : > { %v2574_v47 = vpop.permute.xlu1 %2573  ;;  %2727 = vmatprep.subr.mxu1 %v2592_v61 }
 0xd7b   : > { %v2575_v38 = vsel %vm4705_vm5, %v2572_v7, %v2574_v47  ;;  %v2576_v42 = vsel %vm4696_vm4, %v2574_v47, %v2572_v7  ;;  %2728 = vmatpush1.msra.mxu1 %v2591_v14 }
 0xd7c   : > { %v2579_v33 = vmul.f32 %v2576_v42, %v4551_v9  ;;  %v2580_v62 = vmul.f32 %v2575_v38, %v4556_v43  ;;  %v2779_v9 = vld [vmem:[#allocation5 + $0x20] sm:$0xff] }
 0xd7e   : > { %2729 = vmatprep.subr.mxu1 %v2580_v62 }
 0xd7f   : > { %2730 = vmatpush1.msra.mxu1 %v2579_v33 }
 0xd80   : > { %3256 = vmatmul.mubr.msk.f32.vlgmr.msra.gmra.mxu1 %vm554_vm8, %v2670_v29 }
 0xd85   : > { %v2694_v54 = vpop.permute.xlu0 %2693 }
 0xd87   : > { %v2787_v16 = vpop.permute.xlu1 %2786 }
 0xe40   : > { %v2765_v39 = vpop.f32.mrf.mxu1 }
 0xe41   : > { %v2766_v56 = vadd.f32 %v2765_v39, %v2694_v54 }
 0xe42   : > { %v2767_v3 = vpop.f32.mrf.mxu1 }
 0xe43   : > { %v2768_v48 = vadd.f32 %v2767_v3, %v2694_v54  ;;  %v2772_v8 = vmul.f32 0.2, %v2766_v56  ;;  %vm2770_vm7 = vcmp.ge.f32.partialorder %v2766_v56, 0.0 }
 0xe45   : > { %v2773_v6 = vmul.f32 0.2, %v2768_v48  ;;  %vm2771_vm10 = vcmp.ge.f32.partialorder %v2768_v48, 0.0  ;;  %v2774_v43 = vsel %vm2770_vm7, %v2766_v56, %v2772_v8 }
 0xe47   : > { %v2775_v27 = vsel %vm2771_vm10, %v2768_v48, %v2773_v6 }
 0xe48   : > { %2823 = vmatprep.subr.mxu0 %v2775_v27 }
 0xe49   : > { %2824 = vmatpush1.msra.mxu0 %v2774_v43 }
 0xe4a   : > { %3258 = vmatmul.mubr.msk.f32.vlgmr.msra.gmra.mxu0 %vm2789_vm14, %v2779_v9 }
 0xf0a   : > { %v2859_v28 = vpop.f32.mrf.mxu0 }
 0xf0b   : > { %v2860_v37 = vadd.f32 %v2859_v28, %v2787_v16 }
 0xf0c   : > { %v2861_v2 = vpop.f32.mrf.mxu0 }
 0xf0d   : > { %v2864_v24 = vsub.f32 %v3318_v19, %v2860_v37  ;;  %v2862_v34 = vadd.f32 %v2861_v2, %v2787_v16 }
 0xf0f   : > { %2866 = vst [vmem:[%s391_s13] sm:$0xff] %v2864_v24  ;;  %v2865_v63 = vsub.f32 %v3319_v41, %v2862_v34 }
 0xf11   : > { %2867 = vst [vmem:[%s391_s13 + $0x8] sm:$0xff] %v2865_v63 }
 0xf12 PF: > { %s22_s30 = sadd.s32 1, %s3386_s30  }
 0xf13   : > { %p19_p2 = scmp.ge.s32.totalorder %s22_s30, 4  }
 0xf15   :  { %21 = sbr.rel (!%p19_p2) target bundleno = 2 (0x2), region = 167 }
 0xf1a   :  { %2953 = vsyncpa [#allocation4], 1 }
 0xf1b   :  { %2955 = vsyncpa [#allocation4 + $0x1], 1 }
 0xf1c   :  { %2956 = vsyncpa [#allocation6], 1 }

</bundles_post_ra>
